<compile_context>
chip_gen: v5e
topology: v5e:2x2
jax: 0.10.0
libtpu: 0.0.40
codegen_flags: <defaults>
</compile_context>

<pallas_src>
import functools
import math

import jax
import jax.numpy as jnp
from jax.experimental import pallas as pl
from jax.experimental.pallas import tpu as pltpu


# ----------------------------- in-kernel helpers ----------------------------

def _softmax_last(s):
    s = s - jnp.max(s, axis=-1, keepdims=True)
    p = jnp.exp(s)
    return p / jnp.sum(p, axis=-1, keepdims=True)


def _layernorm(y, g, b, eps=1e-5):
    mean = jnp.mean(y, axis=-1, keepdims=True)
    var = jnp.mean((y - mean) ** 2, axis=-1, keepdims=True)
    return (y - mean) * jax.lax.rsqrt(var + eps) * g + b


def _mha(q_in, kv_in, wq, wk, wv, wo, bq, bk, bv, bo, *, num_head, head_dim):
    """Multi-head attention for one batch element.

    q_in: [Lq, D], kv_in: [Lk, D]; wq/wk/wv/wo: [D, D]; bq/bk/bv/bo: [1, D].
    Full-width projections; per-head work uses static lane slices only and the
    output projection accumulates per head over Wo rows (no concat).
    """
    scale = float(head_dim) ** -0.5
    d_model = num_head * head_dim
    # Bias is added BEFORE the 1/sqrt(hd) scaling (matches the torch module).
    q = (jnp.dot(q_in, wq, preferred_element_type=jnp.float32) + bq) * scale
    k = jnp.dot(kv_in, wk, preferred_element_type=jnp.float32) + bk
    v = jnp.dot(kv_in, wv, preferred_element_type=jnp.float32) + bv
    acc = jnp.zeros((q_in.shape[0], d_model), jnp.float32)
    for h in range(num_head):                      # static unroll, H tiny
        sl = slice(h * head_dim, (h + 1) * head_dim)
        # q_h . k_h^T via dot_general (contract head dims) -> no transpose.
        s = jax.lax.dot_general(q[:, sl], k[:, sl], (((1,), (1,)), ((), ())),
                                preferred_element_type=jnp.float32)
        p = _softmax_last(s)
        o_h = jnp.dot(p, v[:, sl], preferred_element_type=jnp.float32)
        acc = acc + jnp.dot(o_h, wo[sl, :], preferred_element_type=jnp.float32)
    return acc + bo


# ----------------------------- fused stack kernels --------------------------
# Encoder vector slab rows (per layer): 0..3 bq,bk,bv,bo | 4,5 ln1_g,ln1_b |
#                                       6,7 ln2_g,ln2_b  | 8 b2
def _encoder_stack_kernel(x_ref, attn_w_ref, w1_ref, b1_ref, w2_ref, vec_ref,
                          o_ref, *, num_layers, num_head, head_dim):
    x = x_ref[0]                                             # [L, D]
    for l in range(num_layers):                              # static unroll
        vec = vec_ref[l]                                     # [9, D]
        att = _mha(x, x,
                   attn_w_ref[4 * l + 0], attn_w_ref[4 * l + 1],
                   attn_w_ref[4 * l + 2], attn_w_ref[4 * l + 3],
                   vec[0:1], vec[1:2], vec[2:3], vec[3:4],
                   num_head=num_head, head_dim=head_dim)
        y = _layernorm(x + att, vec[4:5], vec[5:6])
        h = jnp.maximum(
            jnp.dot(y, w1_ref[l], preferred_element_type=jnp.float32)
            + b1_ref[l], 0.0)
        f = jnp.dot(h, w2_ref[l], preferred_element_type=jnp.float32) + vec[8:9]
        x = _layernorm(y + f, vec[6:7], vec[7:8])
    o_ref[0] = x.astype(o_ref.dtype)


# Decoder vector slab rows (per layer): 0..3 self bq,bk,bv,bo |
#   4..7 cross bq,bk,bv,bo | 8,9 ln1 | 10,11 ln2 | 12,13 ln3 | 14 b2
def _decoder_stack_kernel(x_ref, mem_ref, attn_w_ref, w1_ref, b1_ref, w2_ref,
                          vec_ref, o_ref, *, num_layers, num_head, head_dim):
    x = x_ref[0]                                             # [Lt, D]
    mem = mem_ref[0]                                         # [Ls, D]
    for l in range(num_layers):                              # static unroll
        vec = vec_ref[l]                                     # [15, D]
        base = 8 * l
        sa = _mha(x, x,
                  attn_w_ref[base + 0], attn_w_ref[base + 1],
                  attn_w_ref[base + 2], attn_w_ref[base + 3],
                  vec[0:1], vec[1:2], vec[2:3], vec[3:4],
                  num_head=num_head, head_dim=head_dim)
        y = _layernorm(x + sa, vec[8:9], vec[9:10])
        ca = _mha(y, mem,
                  attn_w_ref[base + 4], attn_w_ref[base + 5],
                  attn_w_ref[base + 6], attn_w_ref[base + 7],
                  vec[4:5], vec[5:6], vec[6:7], vec[7:8],
                  num_head=num_head, head_dim=head_dim)
        z = _layernorm(y + ca, vec[10:11], vec[11:12])
        h = jnp.maximum(
            jnp.dot(z, w1_ref[l], preferred_element_type=jnp.float32)
            + b1_ref[l], 0.0)
        f = jnp.dot(h, w2_ref[l], preferred_element_type=jnp.float32) + vec[14:15]
        x = _layernorm(z + f, vec[12:13], vec[13:14])
    o_ref[0] = x.astype(o_ref.dtype)


# ----------------------------- wrappers --------------------------------------

def _const_spec(p):
    # Grid-invariant parameter slab (block index never changes with b).
    # TODO(synk): add pipeline_mode=pl.Buffered(1) at real sizes for VMEM headroom.
    nd = p.ndim
    return pl.BlockSpec(p.shape, lambda b, _nd=nd: (0,) * _nd)


def encoder_stack(layers, x, cfg):
    B, L, D = x.shape
    NL = len(layers)
    H = cfg.num_head
    hd = D // H
    F = cfg.dim_feedforward
    attn_w = jnp.concatenate(
        [jnp.stack([p["mha"]["wq"], p["mha"]["wk"], p["mha"]["wv"], p["mha"]["wo"]])
         for p in layers], axis=0)                                  # [NL*4, D, D]
    w1 = jnp.stack([p["w1"] for p in layers])                       # [NL, D, F]
    b1 = jnp.stack([p["b1"].reshape(1, F) for p in layers])         # [NL, 1, F]
    w2 = jnp.stack([p["w2"] for p in layers])                       # [NL, F, D]
    vec = jnp.stack([jnp.stack([p["mha"]["bq"], p["mha"]["bk"], p["mha"]["bv"],
                                p["mha"]["bo"], p["ln1_g"], p["ln1_b"],
                                p["ln2_g"], p["ln2_b"], p["b2"]])
                     for p in layers])                              # [NL, 9, D]
    params = [attn_w, w1, b1, w2, vec]
    kern = functools.partial(_encoder_stack_kernel, num_layers=NL,
                             num_head=H, head_dim=hd)
    return pl.pallas_call(
        kern,
        out_shape=jax.ShapeDtypeStruct((B, L, D), jnp.float32),
        grid=(B,),
        in_specs=[pl.BlockSpec((1, L, D), lambda b: (b, 0, 0))]
                 + [_const_spec(q) for q in params],
        out_specs=pl.BlockSpec((1, L, D), lambda b: (b, 0, 0)),
        compiler_params=pltpu.CompilerParams(dimension_semantics=("parallel",)),
    )(x, *params)


def decoder_stack(layers, x, memory, cfg):
    B, Lt, D = x.shape
    Ls = memory.shape[1]
    NL = len(layers)
    H = cfg.num_head
    hd = D // H
    F = cfg.dim_feedforward
    attn_w = jnp.concatenate(
        [jnp.stack([p["self_mha"]["wq"], p["self_mha"]["wk"],
                    p["self_mha"]["wv"], p["self_mha"]["wo"],
                    p["cross_mha"]["wq"], p["cross_mha"]["wk"],
                    p["cross_mha"]["wv"], p["cross_mha"]["wo"]])
         for p in layers], axis=0)                                  # [NL*8, D, D]
    w1 = jnp.stack([p["w1"] for p in layers])                       # [NL, D, F]
    b1 = jnp.stack([p["b1"].reshape(1, F) for p in layers])         # [NL, 1, F]
    w2 = jnp.stack([p["w2"] for p in layers])                       # [NL, F, D]
    vec = jnp.stack([jnp.stack([p["self_mha"]["bq"], p["self_mha"]["bk"],
                                p["self_mha"]["bv"], p["self_mha"]["bo"],
                                p["cross_mha"]["bq"], p["cross_mha"]["bk"],
                                p["cross_mha"]["bv"], p["cross_mha"]["bo"],
                                p["ln1_g"], p["ln1_b"], p["ln2_g"], p["ln2_b"],
                                p["ln3_g"], p["ln3_b"], p["b2"]])
                     for p in layers])                              # [NL, 15, D]
    params = [attn_w, w1, b1, w2, vec]
    kern = functools.partial(_decoder_stack_kernel, num_layers=NL,
                             num_head=H, head_dim=hd)
    return pl.pallas_call(
        kern,
        out_shape=jax.ShapeDtypeStruct((B, Lt, D), jnp.float32),
        grid=(B,),
        in_specs=[pl.BlockSpec((1, Lt, D), lambda b: (b, 0, 0)),
                  pl.BlockSpec((1, Ls, D), lambda b: (b, 0, 0))]
                 + [_const_spec(q) for q in params],
        out_specs=pl.BlockSpec((1, Lt, D), lambda b: (b, 0, 0)),
        compiler_params=pltpu.CompilerParams(dimension_semantics=("parallel",)),
    )(x, memory, *params)


# ----------------------------- model params ---------------------------------

class Config:
    d_model = 32
    num_head = 4
    dim_feedforward = 64
    num_encoder_layers = 2
    num_decoder_layers = 2
    dropout = 0.1  # eval mode -> identity


def xavier_uniform(key, shape):
    fan_in, fan_out = shape[0], shape[1]
    bound = math.sqrt(6.0 / (fan_in + fan_out))
    return jax.random.uniform(key, shape, jnp.float32, -bound, bound)


def init_mha_params(key, cfg):
    ks = jax.random.split(key, 4)
    D = cfg.d_model
    p = {}
    for name, k in zip(("q", "k", "v", "o"), ks):
        p["w" + name] = xavier_uniform(k, (D, D))
        p["b" + name] = jnp.zeros((D,), jnp.float32)
    return p


def init_encoder_layer(key, cfg):
    k = jax.random.split(key, 3)
    D, F = cfg.d_model, cfg.dim_feedforward
    return {
        "mha": init_mha_params(k[0], cfg),
        "ln1_g": jnp.ones((D,), jnp.float32), "ln1_b": jnp.zeros((D,), jnp.float32),
        "ln2_g": jnp.ones((D,), jnp.float32), "ln2_b": jnp.zeros((D,), jnp.float32),
        "w1": xavier_uniform(k[1], (D, F)), "b1": jnp.zeros((F,), jnp.float32),
        "w2": xavier_uniform(k[2], (F, D)), "b2": jnp.zeros((D,), jnp.float32),
    }


def init_decoder_layer(key, cfg):
    k = jax.random.split(key, 4)
    D, F = cfg.d_model, cfg.dim_feedforward
    return {
        "self_mha": init_mha_params(k[0], cfg),
        "cross_mha": init_mha_params(k[1], cfg),
        "ln1_g": jnp.ones((D,), jnp.float32), "ln1_b": jnp.zeros((D,), jnp.float32),
        "ln2_g": jnp.ones((D,), jnp.float32), "ln2_b": jnp.zeros((D,), jnp.float32),
        "ln3_g": jnp.ones((D,), jnp.float32), "ln3_b": jnp.zeros((D,), jnp.float32),
        "w1": xavier_uniform(k[2], (D, F)), "b1": jnp.zeros((F,), jnp.float32),
        "w2": xavier_uniform(k[3], (F, D)), "b2": jnp.zeros((D,), jnp.float32),
    }


def init_transformer(key, cfg):
    keys = jax.random.split(key, cfg.num_encoder_layers + cfg.num_decoder_layers)
    enc = [init_encoder_layer(keys[i], cfg) for i in range(cfg.num_encoder_layers)]
    dec = [init_decoder_layer(keys[cfg.num_encoder_layers + i], cfg)
           for i in range(cfg.num_decoder_layers)]
    return {"encoder": enc, "decoder": dec}


def transformer_forward(params, embds, out_embds, cfg):
    memory = encoder_stack(params["encoder"], embds, cfg)
    output = decoder_stack(params["decoder"], out_embds, memory, cfg)
    return output


# ----------------------------- main ------------------------------------------

if __name__ == "__main__":
    cfg = Config()
    key = jax.random.PRNGKey(0)
    k_params, k_src, k_tgt = jax.random.split(key, 3)

    params = init_transformer(k_params, cfg)

    B, S_src, S_tgt = 2, 8, 8
    embds = jax.random.normal(k_src, (B, S_src, cfg.d_model), jnp.float32)
    out_embds = jax.random.normal(k_tgt, (B, S_tgt, cfg.d_model), jnp.float32)

    fwd = jax.jit(functools.partial(transformer_forward, cfg=cfg))
    out = fwd(params, embds, out_embds)
    out = jax.block_until_ready(out)

    assert out.shape == (B, S_tgt, cfg.d_model)
    assert bool(jnp.all(jnp.isfinite(out)))
    print("KERNEL_OK")
</pallas_src>

<mosaic_0001>
module attributes {stable_mosaic.version = 11 : i64} {
  func.func @_encoder_stack_kernel(%arg0: i32, %arg1: memref<1x8x32xf32, #tpu.memory_space<vmem>>, %arg2: memref<8x32x32xf32, #tpu.memory_space<vmem>>, %arg3: memref<2x32x64xf32, #tpu.memory_space<vmem>>, %arg4: memref<2x1x64xf32, #tpu.memory_space<vmem>>, %arg5: memref<2x64x32xf32, #tpu.memory_space<vmem>>, %arg6: memref<2x9x32xf32, #tpu.memory_space<vmem>>, %arg7: memref<1x8x32xf32, #tpu.memory_space<vmem>>) attributes {dimension_semantics = [#tpu.dimension_semantics<parallel>], iteration_bounds = array<i64: 2>, scalar_prefetch = 0 : i64, scratch_operands = 0 : i64, tpu.core_type = #tpu.core_type<tc>, window_params = [{transform_indices = @transform_0, window_bounds = array<i64: 1, 8, 32>}, {pipeline_mode = #tpu.pipeline_mode<synchronous>, transform_indices = @transform_1, window_bounds = array<i64: 8, 32, 32>}, {pipeline_mode = #tpu.pipeline_mode<synchronous>, transform_indices = @transform_2, window_bounds = array<i64: 2, 32, 64>}, {pipeline_mode = #tpu.pipeline_mode<synchronous>, transform_indices = @transform_3, window_bounds = array<i64: 2, 1, 64>}, {pipeline_mode = #tpu.pipeline_mode<synchronous>, transform_indices = @transform_4, window_bounds = array<i64: 2, 64, 32>}, {pipeline_mode = #tpu.pipeline_mode<synchronous>, transform_indices = @transform_5, window_bounds = array<i64: 2, 9, 32>}, {transform_indices = @transform_6, window_bounds = array<i64: 1, 8, 32>}]} {
    %c0 = arith.constant 0 : index
    %c0_0 = arith.constant 0 : index
    %c0_1 = arith.constant 0 : index
    %0 = vector.load %arg1[%c0, %c0_0, %c0_1] : memref<1x8x32xf32, #tpu.memory_space<vmem>>, vector<1x8x32xf32>
    %1 = vector.shape_cast %0 : vector<1x8x32xf32> to vector<8x32xf32>
    %c0_2 = arith.constant 0 : index
    %c0_3 = arith.constant 0 : index
    %c0_4 = arith.constant 0 : index
    %2 = vector.load %arg6[%c0_2, %c0_3, %c0_4] : memref<2x9x32xf32, #tpu.memory_space<vmem>>, vector<1x9x32xf32>
    %3 = vector.shape_cast %2 : vector<1x9x32xf32> to vector<9x32xf32>
    %c0_5 = arith.constant 0 : index
    %c0_6 = arith.constant 0 : index
    %c0_7 = arith.constant 0 : index
    %4 = vector.load %arg2[%c0_5, %c0_6, %c0_7] : memref<8x32x32xf32, #tpu.memory_space<vmem>>, vector<1x32x32xf32>
    %5 = vector.shape_cast %4 : vector<1x32x32xf32> to vector<32x32xf32>
    %c1 = arith.constant 1 : index
    %c0_8 = arith.constant 0 : index
    %c0_9 = arith.constant 0 : index
    %6 = vector.load %arg2[%c1, %c0_8, %c0_9] : memref<8x32x32xf32, #tpu.memory_space<vmem>>, vector<1x32x32xf32>
    %7 = vector.shape_cast %6 : vector<1x32x32xf32> to vector<32x32xf32>
    %c2 = arith.constant 2 : index
    %c0_10 = arith.constant 0 : index
    %c0_11 = arith.constant 0 : index
    %8 = vector.load %arg2[%c2, %c0_10, %c0_11] : memref<8x32x32xf32, #tpu.memory_space<vmem>>, vector<1x32x32xf32>
    %9 = vector.shape_cast %8 : vector<1x32x32xf32> to vector<32x32xf32>
    %c3 = arith.constant 3 : index
    %c0_12 = arith.constant 0 : index
    %c0_13 = arith.constant 0 : index
    %10 = vector.load %arg2[%c3, %c0_12, %c0_13] : memref<8x32x32xf32, #tpu.memory_space<vmem>>, vector<1x32x32xf32>
    %11 = vector.shape_cast %10 : vector<1x32x32xf32> to vector<32x32xf32>
    %12 = vector.extract_strided_slice %3 {offsets = [0, 0], sizes = [1, 32], strides = [1, 1]} : vector<9x32xf32> to vector<1x32xf32>
    %13 = vector.extract_strided_slice %3 {offsets = [1, 0], sizes = [1, 32], strides = [1, 1]} : vector<9x32xf32> to vector<1x32xf32>
    %14 = vector.extract_strided_slice %3 {offsets = [2, 0], sizes = [1, 32], strides = [1, 1]} : vector<9x32xf32> to vector<1x32xf32>
    %15 = vector.extract_strided_slice %3 {offsets = [3, 0], sizes = [1, 32], strides = [1, 1]} : vector<9x32xf32> to vector<1x32xf32>
    %cst = arith.constant dense<0.000000e+00> : vector<8x32xf32>
    %16 = tpu.matmul %1, %5, %cst {dimension_numbers = #tpu.dot_dimension_numbers<[1], [0], [0], [1], [0, 0, 1, 1], [], []>} : vector<8x32xf32>, vector<32x32xf32>, vector<8x32xf32> -> vector<8x32xf32>
    %17 = vector.broadcast %12 : vector<1x32xf32> to vector<8x32xf32>
    %18 = arith.addf %16, %17 : vector<8x32xf32>
    %cst_14 = arith.constant 0.353553385 : f32
    %19 = vector.broadcast %cst_14 : f32 to vector<8x32xf32>
    %20 = arith.mulf %18, %19 : vector<8x32xf32>
    %cst_15 = arith.constant dense<0.000000e+00> : vector<8x32xf32>
    %21 = tpu.matmul %1, %7, %cst_15 {dimension_numbers = #tpu.dot_dimension_numbers<[1], [0], [0], [1], [0, 0, 1, 1], [], []>} : vector<8x32xf32>, vector<32x32xf32>, vector<8x32xf32> -> vector<8x32xf32>
    %22 = vector.broadcast %13 : vector<1x32xf32> to vector<8x32xf32>
    %23 = arith.addf %21, %22 : vector<8x32xf32>
    %cst_16 = arith.constant dense<0.000000e+00> : vector<8x32xf32>
    %24 = tpu.matmul %1, %9, %cst_16 {dimension_numbers = #tpu.dot_dimension_numbers<[1], [0], [0], [1], [0, 0, 1, 1], [], []>} : vector<8x32xf32>, vector<32x32xf32>, vector<8x32xf32> -> vector<8x32xf32>
    %25 = vector.broadcast %14 : vector<1x32xf32> to vector<8x32xf32>
    %26 = arith.addf %24, %25 : vector<8x32xf32>
    %cst_17 = arith.constant 0.000000e+00 : f32
    %27 = vector.broadcast %cst_17 : f32 to vector<8x32xf32>
    %28 = vector.extract_strided_slice %20 {offsets = [0, 0], sizes = [8, 8], strides = [1, 1]} : vector<8x32xf32> to vector<8x8xf32>
    %29 = vector.extract_strided_slice %23 {offsets = [0, 0], sizes = [8, 8], strides = [1, 1]} : vector<8x32xf32> to vector<8x8xf32>
    %cst_18 = arith.constant dense<0.000000e+00> : vector<8x8xf32>
    %30 = tpu.matmul %28, %29, %cst_18 {dimension_numbers = #tpu.dot_dimension_numbers<[1], [1], [0], [0], [0, 0, 1, 0], [], []>} : vector<8x8xf32>, vector<8x8xf32>, vector<8x8xf32> -> vector<8x8xf32>
    %cst_19 = arith.constant dense<0xFF800000> : vector<8xf32>
    %31 = vector.multi_reduction <maximumf>, %30, %cst_19 [1] : vector<8x8xf32> to vector<8xf32>
    %32 = vector.shape_cast %31 : vector<8xf32> to vector<8x1xf32>
    %33 = vector.broadcast %32 : vector<8x1xf32> to vector<8x8xf32>
    %34 = arith.subf %30, %33 : vector<8x8xf32>
    %35 = math.exp %34 : vector<8x8xf32>
    %cst_20 = arith.constant dense<0.000000e+00> : vector<8xf32>
    %36 = vector.multi_reduction <add>, %35, %cst_20 [1] : vector<8x8xf32> to vector<8xf32>
    %37 = vector.shape_cast %36 : vector<8xf32> to vector<8x1xf32>
    %38 = vector.broadcast %37 : vector<8x1xf32> to vector<8x8xf32>
    %39 = arith.divf %35, %38 : vector<8x8xf32>
    %40 = vector.extract_strided_slice %26 {offsets = [0, 0], sizes = [8, 8], strides = [1, 1]} : vector<8x32xf32> to vector<8x8xf32>
    %cst_21 = arith.constant dense<0.000000e+00> : vector<8x8xf32>
    %41 = tpu.matmul %39, %40, %cst_21 {dimension_numbers = #tpu.dot_dimension_numbers<[1], [0], [0], [1], [0, 0, 1, 1], [], []>} : vector<8x8xf32>, vector<8x8xf32>, vector<8x8xf32> -> vector<8x8xf32>
    %42 = vector.extract_strided_slice %11 {offsets = [0, 0], sizes = [8, 32], strides = [1, 1]} : vector<32x32xf32> to vector<8x32xf32>
    %cst_22 = arith.constant dense<0.000000e+00> : vector<8x32xf32>
    %43 = tpu.matmul %41, %42, %cst_22 {dimension_numbers = #tpu.dot_dimension_numbers<[1], [0], [0], [1], [0, 0, 1, 1], [], []>} : vector<8x8xf32>, vector<8x32xf32>, vector<8x32xf32> -> vector<8x32xf32>
    %44 = arith.addf %27, %43 : vector<8x32xf32>
    %45 = vector.extract_strided_slice %20 {offsets = [0, 8], sizes = [8, 8], strides = [1, 1]} : vector<8x32xf32> to vector<8x8xf32>
    %46 = vector.extract_strided_slice %23 {offsets = [0, 8], sizes = [8, 8], strides = [1, 1]} : vector<8x32xf32> to vector<8x8xf32>
    %cst_23 = arith.constant dense<0.000000e+00> : vector<8x8xf32>
    %47 = tpu.matmul %45, %46, %cst_23 {dimension_numbers = #tpu.dot_dimension_numbers<[1], [1], [0], [0], [0, 0, 1, 0], [], []>} : vector<8x8xf32>, vector<8x8xf32>, vector<8x8xf32> -> vector<8x8xf32>
    %cst_24 = arith.constant dense<0xFF800000> : vector<8xf32>
    %48 = vector.multi_reduction <maximumf>, %47, %cst_24 [1] : vector<8x8xf32> to vector<8xf32>
    %49 = vector.shape_cast %48 : vector<8xf32> to vector<8x1xf32>
    %50 = vector.broadcast %49 : vector<8x1xf32> to vector<8x8xf32>
    %51 = arith.subf %47, %50 : vector<8x8xf32>
    %52 = math.exp %51 : vector<8x8xf32>
    %cst_25 = arith.constant dense<0.000000e+00> : vector<8xf32>
    %53 = vector.multi_reduction <add>, %52, %cst_25 [1] : vector<8x8xf32> to vector<8xf32>
    %54 = vector.shape_cast %53 : vector<8xf32> to vector<8x1xf32>
    %55 = vector.broadcast %54 : vector<8x1xf32> to vector<8x8xf32>
    %56 = arith.divf %52, %55 : vector<8x8xf32>
    %57 = vector.extract_strided_slice %26 {offsets = [0, 8], sizes = [8, 8], strides = [1, 1]} : vector<8x32xf32> to vector<8x8xf32>
    %cst_26 = arith.constant dense<0.000000e+00> : vector<8x8xf32>
    %58 = tpu.matmul %56, %57, %cst_26 {dimension_numbers = #tpu.dot_dimension_numbers<[1], [0], [0], [1], [0, 0, 1, 1], [], []>} : vector<8x8xf32>, vector<8x8xf32>, vector<8x8xf32> -> vector<8x8xf32>
    %59 = vector.extract_strided_slice %11 {offsets = [8, 0], sizes = [8, 32], strides = [1, 1]} : vector<32x32xf32> to vector<8x32xf32>
    %cst_27 = arith.constant dense<0.000000e+00> : vector<8x32xf32>
    %60 = tpu.matmul %58, %59, %cst_27 {dimension_numbers = #tpu.dot_dimension_numbers<[1], [0], [0], [1], [0, 0, 1, 1], [], []>} : vector<8x8xf32>, vector<8x32xf32>, vector<8x32xf32> -> vector<8x32xf32>
    %61 = arith.addf %44, %60 : vector<8x32xf32>
    %62 = vector.extract_strided_slice %20 {offsets = [0, 16], sizes = [8, 8], strides = [1, 1]} : vector<8x32xf32> to vector<8x8xf32>
    %63 = vector.extract_strided_slice %23 {offsets = [0, 16], sizes = [8, 8], strides = [1, 1]} : vector<8x32xf32> to vector<8x8xf32>
    %cst_28 = arith.constant dense<0.000000e+00> : vector<8x8xf32>
    %64 = tpu.matmul %62, %63, %cst_28 {dimension_numbers = #tpu.dot_dimension_numbers<[1], [1], [0], [0], [0, 0, 1, 0], [], []>} : vector<8x8xf32>, vector<8x8xf32>, vector<8x8xf32> -> vector<8x8xf32>
    %cst_29 = arith.constant dense<0xFF800000> : vector<8xf32>
    %65 = vector.multi_reduction <maximumf>, %64, %cst_29 [1] : vector<8x8xf32> to vector<8xf32>
    %66 = vector.shape_cast %65 : vector<8xf32> to vector<8x1xf32>
    %67 = vector.broadcast %66 : vector<8x1xf32> to vector<8x8xf32>
    %68 = arith.subf %64, %67 : vector<8x8xf32>
    %69 = math.exp %68 : vector<8x8xf32>
    %cst_30 = arith.constant dense<0.000000e+00> : vector<8xf32>
    %70 = vector.multi_reduction <add>, %69, %cst_30 [1] : vector<8x8xf32> to vector<8xf32>
    %71 = vector.shape_cast %70 : vector<8xf32> to vector<8x1xf32>
    %72 = vector.broadcast %71 : vector<8x1xf32> to vector<8x8xf32>
    %73 = arith.divf %69, %72 : vector<8x8xf32>
    %74 = vector.extract_strided_slice %26 {offsets = [0, 16], sizes = [8, 8], strides = [1, 1]} : vector<8x32xf32> to vector<8x8xf32>
    %cst_31 = arith.constant dense<0.000000e+00> : vector<8x8xf32>
    %75 = tpu.matmul %73, %74, %cst_31 {dimension_numbers = #tpu.dot_dimension_numbers<[1], [0], [0], [1], [0, 0, 1, 1], [], []>} : vector<8x8xf32>, vector<8x8xf32>, vector<8x8xf32> -> vector<8x8xf32>
    %76 = vector.extract_strided_slice %11 {offsets = [16, 0], sizes = [8, 32], strides = [1, 1]} : vector<32x32xf32> to vector<8x32xf32>
    %cst_32 = arith.constant dense<0.000000e+00> : vector<8x32xf32>
    %77 = tpu.matmul %75, %76, %cst_32 {dimension_numbers = #tpu.dot_dimension_numbers<[1], [0], [0], [1], [0, 0, 1, 1], [], []>} : vector<8x8xf32>, vector<8x32xf32>, vector<8x32xf32> -> vector<8x32xf32>
    %78 = arith.addf %61, %77 : vector<8x32xf32>
    %79 = vector.extract_strided_slice %20 {offsets = [0, 24], sizes = [8, 8], strides = [1, 1]} : vector<8x32xf32> to vector<8x8xf32>
    %80 = vector.extract_strided_slice %23 {offsets = [0, 24], sizes = [8, 8], strides = [1, 1]} : vector<8x32xf32> to vector<8x8xf32>
    %cst_33 = arith.constant dense<0.000000e+00> : vector<8x8xf32>
    %81 = tpu.matmul %79, %80, %cst_33 {dimension_numbers = #tpu.dot_dimension_numbers<[1], [1], [0], [0], [0, 0, 1, 0], [], []>} : vector<8x8xf32>, vector<8x8xf32>, vector<8x8xf32> -> vector<8x8xf32>
    %cst_34 = arith.constant dense<0xFF800000> : vector<8xf32>
    %82 = vector.multi_reduction <maximumf>, %81, %cst_34 [1] : vector<8x8xf32> to vector<8xf32>
    %83 = vector.shape_cast %82 : vector<8xf32> to vector<8x1xf32>
    %84 = vector.broadcast %83 : vector<8x1xf32> to vector<8x8xf32>
    %85 = arith.subf %81, %84 : vector<8x8xf32>
    %86 = math.exp %85 : vector<8x8xf32>
    %cst_35 = arith.constant dense<0.000000e+00> : vector<8xf32>
    %87 = vector.multi_reduction <add>, %86, %cst_35 [1] : vector<8x8xf32> to vector<8xf32>
    %88 = vector.shape_cast %87 : vector<8xf32> to vector<8x1xf32>
    %89 = vector.broadcast %88 : vector<8x1xf32> to vector<8x8xf32>
    %90 = arith.divf %86, %89 : vector<8x8xf32>
    %91 = vector.extract_strided_slice %26 {offsets = [0, 24], sizes = [8, 8], strides = [1, 1]} : vector<8x32xf32> to vector<8x8xf32>
    %cst_36 = arith.constant dense<0.000000e+00> : vector<8x8xf32>
    %92 = tpu.matmul %90, %91, %cst_36 {dimension_numbers = #tpu.dot_dimension_numbers<[1], [0], [0], [1], [0, 0, 1, 1], [], []>} : vector<8x8xf32>, vector<8x8xf32>, vector<8x8xf32> -> vector<8x8xf32>
    %93 = vector.extract_strided_slice %11 {offsets = [24, 0], sizes = [8, 32], strides = [1, 1]} : vector<32x32xf32> to vector<8x32xf32>
    %cst_37 = arith.constant dense<0.000000e+00> : vector<8x32xf32>
    %94 = tpu.matmul %92, %93, %cst_37 {dimension_numbers = #tpu.dot_dimension_numbers<[1], [0], [0], [1], [0, 0, 1, 1], [], []>} : vector<8x8xf32>, vector<8x32xf32>, vector<8x32xf32> -> vector<8x32xf32>
    %95 = arith.addf %78, %94 : vector<8x32xf32>
    %96 = vector.broadcast %15 : vector<1x32xf32> to vector<8x32xf32>
    %97 = arith.addf %95, %96 : vector<8x32xf32>
    %98 = arith.addf %1, %97 : vector<8x32xf32>
    %99 = vector.extract_strided_slice %3 {offsets = [4, 0], sizes = [1, 32], strides = [1, 1]} : vector<9x32xf32> to vector<1x32xf32>
    %100 = vector.extract_strided_slice %3 {offsets = [5, 0], sizes = [1, 32], strides = [1, 1]} : vector<9x32xf32> to vector<1x32xf32>
    %cst_38 = arith.constant dense<0.000000e+00> : vector<8xf32>
    %101 = vector.multi_reduction <add>, %98, %cst_38 [1] : vector<8x32xf32> to vector<8xf32>
    %102 = vector.shape_cast %101 : vector<8xf32> to vector<8x1xf32>
    %cst_39 = arith.constant 3.200000e+01 : f32
    %103 = vector.broadcast %cst_39 : f32 to vector<8x1xf32>
    %104 = arith.divf %102, %103 : vector<8x1xf32>
    %105 = vector.broadcast %104 : vector<8x1xf32> to vector<8x32xf32>
    %106 = arith.subf %98, %105 : vector<8x32xf32>
    %107 = arith.mulf %106, %106 : vector<8x32xf32>
    %cst_40 = arith.constant dense<0.000000e+00> : vector<8xf32>
    %108 = vector.multi_reduction <add>, %107, %cst_40 [1] : vector<8x32xf32> to vector<8xf32>
    %109 = vector.shape_cast %108 : vector<8xf32> to vector<8x1xf32>
    %cst_41 = arith.constant 3.200000e+01 : f32
    %110 = vector.broadcast %cst_41 : f32 to vector<8x1xf32>
    %111 = arith.divf %109, %110 : vector<8x1xf32>
    %112 = vector.broadcast %104 : vector<8x1xf32> to vector<8x32xf32>
    %113 = arith.subf %98, %112 : vector<8x32xf32>
    %cst_42 = arith.constant 9.99999974E-6 : f32
    %114 = vector.broadcast %cst_42 : f32 to vector<8x1xf32>
    %115 = arith.addf %111, %114 : vector<8x1xf32>
    %116 = math.rsqrt %115 : vector<8x1xf32>
    %117 = vector.broadcast %116 : vector<8x1xf32> to vector<8x32xf32>
    %118 = arith.mulf %113, %117 : vector<8x32xf32>
    %119 = vector.broadcast %99 : vector<1x32xf32> to vector<8x32xf32>
    %120 = arith.mulf %118, %119 : vector<8x32xf32>
    %121 = vector.broadcast %100 : vector<1x32xf32> to vector<8x32xf32>
    %122 = arith.addf %120, %121 : vector<8x32xf32>
    %c0_43 = arith.constant 0 : index
    %c0_44 = arith.constant 0 : index
    %c0_45 = arith.constant 0 : index
    %123 = vector.load %arg3[%c0_43, %c0_44, %c0_45] : memref<2x32x64xf32, #tpu.memory_space<vmem>>, vector<1x32x64xf32>
    %124 = vector.shape_cast %123 : vector<1x32x64xf32> to vector<32x64xf32>
    %cst_46 = arith.constant dense<0.000000e+00> : vector<8x64xf32>
    %125 = tpu.matmul %122, %124, %cst_46 {dimension_numbers = #tpu.dot_dimension_numbers<[1], [0], [0], [1], [0, 0, 1, 1], [], []>} : vector<8x32xf32>, vector<32x64xf32>, vector<8x64xf32> -> vector<8x64xf32>
    %c0_47 = arith.constant 0 : index
    %c0_48 = arith.constant 0 : index
    %c0_49 = arith.constant 0 : index
    %126 = vector.load %arg4[%c0_47, %c0_48, %c0_49] : memref<2x1x64xf32, #tpu.memory_space<vmem>>, vector<1x1x64xf32>
    %127 = vector.shape_cast %126 : vector<1x1x64xf32> to vector<1x64xf32>
    %128 = vector.broadcast %127 : vector<1x64xf32> to vector<8x64xf32>
    %129 = arith.addf %125, %128 : vector<8x64xf32>
    %cst_50 = arith.constant 0.000000e+00 : f32
    %130 = vector.broadcast %cst_50 : f32 to vector<8x64xf32>
    %131 = arith.maximumf %129, %130 : vector<8x64xf32>
    %c0_51 = arith.constant 0 : index
    %c0_52 = arith.constant 0 : index
    %c0_53 = arith.constant 0 : index
    %132 = vector.load %arg5[%c0_51, %c0_52, %c0_53] : memref<2x64x32xf32, #tpu.memory_space<vmem>>, vector<1x64x32xf32>
    %133 = vector.shape_cast %132 : vector<1x64x32xf32> to vector<64x32xf32>
    %cst_54 = arith.constant dense<0.000000e+00> : vector<8x32xf32>
    %134 = tpu.matmul %131, %133, %cst_54 {dimension_numbers = #tpu.dot_dimension_numbers<[1], [0], [0], [1], [0, 0, 1, 1], [], []>} : vector<8x64xf32>, vector<64x32xf32>, vector<8x32xf32> -> vector<8x32xf32>
    %135 = vector.extract_strided_slice %3 {offsets = [8, 0], sizes = [1, 32], strides = [1, 1]} : vector<9x32xf32> to vector<1x32xf32>
    %136 = vector.broadcast %135 : vector<1x32xf32> to vector<8x32xf32>
    %137 = arith.addf %134, %136 : vector<8x32xf32>
    %138 = arith.addf %122, %137 : vector<8x32xf32>
    %139 = vector.extract_strided_slice %3 {offsets = [6, 0], sizes = [1, 32], strides = [1, 1]} : vector<9x32xf32> to vector<1x32xf32>
    %140 = vector.extract_strided_slice %3 {offsets = [7, 0], sizes = [1, 32], strides = [1, 1]} : vector<9x32xf32> to vector<1x32xf32>
    %cst_55 = arith.constant dense<0.000000e+00> : vector<8xf32>
    %141 = vector.multi_reduction <add>, %138, %cst_55 [1] : vector<8x32xf32> to vector<8xf32>
    %142 = vector.shape_cast %141 : vector<8xf32> to vector<8x1xf32>
    %cst_56 = arith.constant 3.200000e+01 : f32
    %143 = vector.broadcast %cst_56 : f32 to vector<8x1xf32>
    %144 = arith.divf %142, %143 : vector<8x1xf32>
    %145 = vector.broadcast %144 : vector<8x1xf32> to vector<8x32xf32>
    %146 = arith.subf %138, %145 : vector<8x32xf32>
    %147 = arith.mulf %146, %146 : vector<8x32xf32>
    %cst_57 = arith.constant dense<0.000000e+00> : vector<8xf32>
    %148 = vector.multi_reduction <add>, %147, %cst_57 [1] : vector<8x32xf32> to vector<8xf32>
    %149 = vector.shape_cast %148 : vector<8xf32> to vector<8x1xf32>
    %cst_58 = arith.constant 3.200000e+01 : f32
    %150 = vector.broadcast %cst_58 : f32 to vector<8x1xf32>
    %151 = arith.divf %149, %150 : vector<8x1xf32>
    %152 = vector.broadcast %144 : vector<8x1xf32> to vector<8x32xf32>
    %153 = arith.subf %138, %152 : vector<8x32xf32>
    %cst_59 = arith.constant 9.99999974E-6 : f32
    %154 = vector.broadcast %cst_59 : f32 to vector<8x1xf32>
    %155 = arith.addf %151, %154 : vector<8x1xf32>
    %156 = math.rsqrt %155 : vector<8x1xf32>
    %157 = vector.broadcast %156 : vector<8x1xf32> to vector<8x32xf32>
    %158 = arith.mulf %153, %157 : vector<8x32xf32>
    %159 = vector.broadcast %139 : vector<1x32xf32> to vector<8x32xf32>
    %160 = arith.mulf %158, %159 : vector<8x32xf32>
    %161 = vector.broadcast %140 : vector<1x32xf32> to vector<8x32xf32>
    %162 = arith.addf %160, %161 : vector<8x32xf32>
    %c1_60 = arith.constant 1 : index
    %c0_61 = arith.constant 0 : index
    %c0_62 = arith.constant 0 : index
    %163 = vector.load %arg6[%c1_60, %c0_61, %c0_62] : memref<2x9x32xf32, #tpu.memory_space<vmem>>, vector<1x9x32xf32>
    %164 = vector.shape_cast %163 : vector<1x9x32xf32> to vector<9x32xf32>
    %c4 = arith.constant 4 : index
    %c0_63 = arith.constant 0 : index
    %c0_64 = arith.constant 0 : index
    %165 = vector.load %arg2[%c4, %c0_63, %c0_64] : memref<8x32x32xf32, #tpu.memory_space<vmem>>, vector<1x32x32xf32>
    %166 = vector.shape_cast %165 : vector<1x32x32xf32> to vector<32x32xf32>
    %c5 = arith.constant 5 : index
    %c0_65 = arith.constant 0 : index
    %c0_66 = arith.constant 0 : index
    %167 = vector.load %arg2[%c5, %c0_65, %c0_66] : memref<8x32x32xf32, #tpu.memory_space<vmem>>, vector<1x32x32xf32>
    %168 = vector.shape_cast %167 : vector<1x32x32xf32> to vector<32x32xf32>
    %c6 = arith.constant 6 : index
    %c0_67 = arith.constant 0 : index
    %c0_68 = arith.constant 0 : index
    %169 = vector.load %arg2[%c6, %c0_67, %c0_68] : memref<8x32x32xf32, #tpu.memory_space<vmem>>, vector<1x32x32xf32>
    %170 = vector.shape_cast %169 : vector<1x32x32xf32> to vector<32x32xf32>
    %c7 = arith.constant 7 : index
    %c0_69 = arith.constant 0 : index
    %c0_70 = arith.constant 0 : index
    %171 = vector.load %arg2[%c7, %c0_69, %c0_70] : memref<8x32x32xf32, #tpu.memory_space<vmem>>, vector<1x32x32xf32>
    %172 = vector.shape_cast %171 : vector<1x32x32xf32> to vector<32x32xf32>
    %173 = vector.extract_strided_slice %164 {offsets = [0, 0], sizes = [1, 32], strides = [1, 1]} : vector<9x32xf32> to vector<1x32xf32>
    %174 = vector.extract_strided_slice %164 {offsets = [1, 0], sizes = [1, 32], strides = [1, 1]} : vector<9x32xf32> to vector<1x32xf32>
    %175 = vector.extract_strided_slice %164 {offsets = [2, 0], sizes = [1, 32], strides = [1, 1]} : vector<9x32xf32> to vector<1x32xf32>
    %176 = vector.extract_strided_slice %164 {offsets = [3, 0], sizes = [1, 32], strides = [1, 1]} : vector<9x32xf32> to vector<1x32xf32>
    %cst_71 = arith.constant dense<0.000000e+00> : vector<8x32xf32>
    %177 = tpu.matmul %162, %166, %cst_71 {dimension_numbers = #tpu.dot_dimension_numbers<[1], [0], [0], [1], [0, 0, 1, 1], [], []>} : vector<8x32xf32>, vector<32x32xf32>, vector<8x32xf32> -> vector<8x32xf32>
    %178 = vector.broadcast %173 : vector<1x32xf32> to vector<8x32xf32>
    %179 = arith.addf %177, %178 : vector<8x32xf32>
    %cst_72 = arith.constant 0.353553385 : f32
    %180 = vector.broadcast %cst_72 : f32 to vector<8x32xf32>
    %181 = arith.mulf %179, %180 : vector<8x32xf32>
    %cst_73 = arith.constant dense<0.000000e+00> : vector<8x32xf32>
    %182 = tpu.matmul %162, %168, %cst_73 {dimension_numbers = #tpu.dot_dimension_numbers<[1], [0], [0], [1], [0, 0, 1, 1], [], []>} : vector<8x32xf32>, vector<32x32xf32>, vector<8x32xf32> -> vector<8x32xf32>
    %183 = vector.broadcast %174 : vector<1x32xf32> to vector<8x32xf32>
    %184 = arith.addf %182, %183 : vector<8x32xf32>
    %cst_74 = arith.constant dense<0.000000e+00> : vector<8x32xf32>
    %185 = tpu.matmul %162, %170, %cst_74 {dimension_numbers = #tpu.dot_dimension_numbers<[1], [0], [0], [1], [0, 0, 1, 1], [], []>} : vector<8x32xf32>, vector<32x32xf32>, vector<8x32xf32> -> vector<8x32xf32>
    %186 = vector.broadcast %175 : vector<1x32xf32> to vector<8x32xf32>
    %187 = arith.addf %185, %186 : vector<8x32xf32>
    %cst_75 = arith.constant 0.000000e+00 : f32
    %188 = vector.broadcast %cst_75 : f32 to vector<8x32xf32>
    %189 = vector.extract_strided_slice %181 {offsets = [0, 0], sizes = [8, 8], strides = [1, 1]} : vector<8x32xf32> to vector<8x8xf32>
    %190 = vector.extract_strided_slice %184 {offsets = [0, 0], sizes = [8, 8], strides = [1, 1]} : vector<8x32xf32> to vector<8x8xf32>
    %cst_76 = arith.constant dense<0.000000e+00> : vector<8x8xf32>
    %191 = tpu.matmul %189, %190, %cst_76 {dimension_numbers = #tpu.dot_dimension_numbers<[1], [1], [0], [0], [0, 0, 1, 0], [], []>} : vector<8x8xf32>, vector<8x8xf32>, vector<8x8xf32> -> vector<8x8xf32>
    %cst_77 = arith.constant dense<0xFF800000> : vector<8xf32>
    %192 = vector.multi_reduction <maximumf>, %191, %cst_77 [1] : vector<8x8xf32> to vector<8xf32>
    %193 = vector.shape_cast %192 : vector<8xf32> to vector<8x1xf32>
    %194 = vector.broadcast %193 : vector<8x1xf32> to vector<8x8xf32>
    %195 = arith.subf %191, %194 : vector<8x8xf32>
    %196 = math.exp %195 : vector<8x8xf32>
    %cst_78 = arith.constant dense<0.000000e+00> : vector<8xf32>
    %197 = vector.multi_reduction <add>, %196, %cst_78 [1] : vector<8x8xf32> to vector<8xf32>
    %198 = vector.shape_cast %197 : vector<8xf32> to vector<8x1xf32>
    %199 = vector.broadcast %198 : vector<8x1xf32> to vector<8x8xf32>
    %200 = arith.divf %196, %199 : vector<8x8xf32>
    %201 = vector.extract_strided_slice %187 {offsets = [0, 0], sizes = [8, 8], strides = [1, 1]} : vector<8x32xf32> to vector<8x8xf32>
    %cst_79 = arith.constant dense<0.000000e+00> : vector<8x8xf32>
    %202 = tpu.matmul %200, %201, %cst_79 {dimension_numbers = #tpu.dot_dimension_numbers<[1], [0], [0], [1], [0, 0, 1, 1], [], []>} : vector<8x8xf32>, vector<8x8xf32>, vector<8x8xf32> -> vector<8x8xf32>
    %203 = vector.extract_strided_slice %172 {offsets = [0, 0], sizes = [8, 32], strides = [1, 1]} : vector<32x32xf32> to vector<8x32xf32>
    %cst_80 = arith.constant dense<0.000000e+00> : vector<8x32xf32>
    %204 = tpu.matmul %202, %203, %cst_80 {dimension_numbers = #tpu.dot_dimension_numbers<[1], [0], [0], [1], [0, 0, 1, 1], [], []>} : vector<8x8xf32>, vector<8x32xf32>, vector<8x32xf32> -> vector<8x32xf32>
    %205 = arith.addf %188, %204 : vector<8x32xf32>
    %206 = vector.extract_strided_slice %181 {offsets = [0, 8], sizes = [8, 8], strides = [1, 1]} : vector<8x32xf32> to vector<8x8xf32>
    %207 = vector.extract_strided_slice %184 {offsets = [0, 8], sizes = [8, 8], strides = [1, 1]} : vector<8x32xf32> to vector<8x8xf32>
    %cst_81 = arith.constant dense<0.000000e+00> : vector<8x8xf32>
    %208 = tpu.matmul %206, %207, %cst_81 {dimension_numbers = #tpu.dot_dimension_numbers<[1], [1], [0], [0], [0, 0, 1, 0], [], []>} : vector<8x8xf32>, vector<8x8xf32>, vector<8x8xf32> -> vector<8x8xf32>
    %cst_82 = arith.constant dense<0xFF800000> : vector<8xf32>
    %209 = vector.multi_reduction <maximumf>, %208, %cst_82 [1] : vector<8x8xf32> to vector<8xf32>
    %210 = vector.shape_cast %209 : vector<8xf32> to vector<8x1xf32>
    %211 = vector.broadcast %210 : vector<8x1xf32> to vector<8x8xf32>
    %212 = arith.subf %208, %211 : vector<8x8xf32>
    %213 = math.exp %212 : vector<8x8xf32>
    %cst_83 = arith.constant dense<0.000000e+00> : vector<8xf32>
    %214 = vector.multi_reduction <add>, %213, %cst_83 [1] : vector<8x8xf32> to vector<8xf32>
    %215 = vector.shape_cast %214 : vector<8xf32> to vector<8x1xf32>
    %216 = vector.broadcast %215 : vector<8x1xf32> to vector<8x8xf32>
    %217 = arith.divf %213, %216 : vector<8x8xf32>
    %218 = vector.extract_strided_slice %187 {offsets = [0, 8], sizes = [8, 8], strides = [1, 1]} : vector<8x32xf32> to vector<8x8xf32>
    %cst_84 = arith.constant dense<0.000000e+00> : vector<8x8xf32>
    %219 = tpu.matmul %217, %218, %cst_84 {dimension_numbers = #tpu.dot_dimension_numbers<[1], [0], [0], [1], [0, 0, 1, 1], [], []>} : vector<8x8xf32>, vector<8x8xf32>, vector<8x8xf32> -> vector<8x8xf32>
    %220 = vector.extract_strided_slice %172 {offsets = [8, 0], sizes = [8, 32], strides = [1, 1]} : vector<32x32xf32> to vector<8x32xf32>
    %cst_85 = arith.constant dense<0.000000e+00> : vector<8x32xf32>
    %221 = tpu.matmul %219, %220, %cst_85 {dimension_numbers = #tpu.dot_dimension_numbers<[1], [0], [0], [1], [0, 0, 1, 1], [], []>} : vector<8x8xf32>, vector<8x32xf32>, vector<8x32xf32> -> vector<8x32xf32>
    %222 = arith.addf %205, %221 : vector<8x32xf32>
    %223 = vector.extract_strided_slice %181 {offsets = [0, 16], sizes = [8, 8], strides = [1, 1]} : vector<8x32xf32> to vector<8x8xf32>
    %224 = vector.extract_strided_slice %184 {offsets = [0, 16], sizes = [8, 8], strides = [1, 1]} : vector<8x32xf32> to vector<8x8xf32>
    %cst_86 = arith.constant dense<0.000000e+00> : vector<8x8xf32>
    %225 = tpu.matmul %223, %224, %cst_86 {dimension_numbers = #tpu.dot_dimension_numbers<[1], [1], [0], [0], [0, 0, 1, 0], [], []>} : vector<8x8xf32>, vector<8x8xf32>, vector<8x8xf32> -> vector<8x8xf32>
    %cst_87 = arith.constant dense<0xFF800000> : vector<8xf32>
    %226 = vector.multi_reduction <maximumf>, %225, %cst_87 [1] : vector<8x8xf32> to vector<8xf32>
    %227 = vector.shape_cast %226 : vector<8xf32> to vector<8x1xf32>
    %228 = vector.broadcast %227 : vector<8x1xf32> to vector<8x8xf32>
    %229 = arith.subf %225, %228 : vector<8x8xf32>
    %230 = math.exp %229 : vector<8x8xf32>
    %cst_88 = arith.constant dense<0.000000e+00> : vector<8xf32>
    %231 = vector.multi_reduction <add>, %230, %cst_88 [1] : vector<8x8xf32> to vector<8xf32>
    %232 = vector.shape_cast %231 : vector<8xf32> to vector<8x1xf32>
    %233 = vector.broadcast %232 : vector<8x1xf32> to vector<8x8xf32>
    %234 = arith.divf %230, %233 : vector<8x8xf32>
    %235 = vector.extract_strided_slice %187 {offsets = [0, 16], sizes = [8, 8], strides = [1, 1]} : vector<8x32xf32> to vector<8x8xf32>
    %cst_89 = arith.constant dense<0.000000e+00> : vector<8x8xf32>
    %236 = tpu.matmul %234, %235, %cst_89 {dimension_numbers = #tpu.dot_dimension_numbers<[1], [0], [0], [1], [0, 0, 1, 1], [], []>} : vector<8x8xf32>, vector<8x8xf32>, vector<8x8xf32> -> vector<8x8xf32>
    %237 = vector.extract_strided_slice %172 {offsets = [16, 0], sizes = [8, 32], strides = [1, 1]} : vector<32x32xf32> to vector<8x32xf32>
    %cst_90 = arith.constant dense<0.000000e+00> : vector<8x32xf32>
    %238 = tpu.matmul %236, %237, %cst_90 {dimension_numbers = #tpu.dot_dimension_numbers<[1], [0], [0], [1], [0, 0, 1, 1], [], []>} : vector<8x8xf32>, vector<8x32xf32>, vector<8x32xf32> -> vector<8x32xf32>
    %239 = arith.addf %222, %238 : vector<8x32xf32>
    %240 = vector.extract_strided_slice %181 {offsets = [0, 24], sizes = [8, 8], strides = [1, 1]} : vector<8x32xf32> to vector<8x8xf32>
    %241 = vector.extract_strided_slice %184 {offsets = [0, 24], sizes = [8, 8], strides = [1, 1]} : vector<8x32xf32> to vector<8x8xf32>
    %cst_91 = arith.constant dense<0.000000e+00> : vector<8x8xf32>
    %242 = tpu.matmul %240, %241, %cst_91 {dimension_numbers = #tpu.dot_dimension_numbers<[1], [1], [0], [0], [0, 0, 1, 0], [], []>} : vector<8x8xf32>, vector<8x8xf32>, vector<8x8xf32> -> vector<8x8xf32>
    %cst_92 = arith.constant dense<0xFF800000> : vector<8xf32>
    %243 = vector.multi_reduction <maximumf>, %242, %cst_92 [1] : vector<8x8xf32> to vector<8xf32>
    %244 = vector.shape_cast %243 : vector<8xf32> to vector<8x1xf32>
    %245 = vector.broadcast %244 : vector<8x1xf32> to vector<8x8xf32>
    %246 = arith.subf %242, %245 : vector<8x8xf32>
    %247 = math.exp %246 : vector<8x8xf32>
    %cst_93 = arith.constant dense<0.000000e+00> : vector<8xf32>
    %248 = vector.multi_reduction <add>, %247, %cst_93 [1] : vector<8x8xf32> to vector<8xf32>
    %249 = vector.shape_cast %248 : vector<8xf32> to vector<8x1xf32>
    %250 = vector.broadcast %249 : vector<8x1xf32> to vector<8x8xf32>
    %251 = arith.divf %247, %250 : vector<8x8xf32>
    %252 = vector.extract_strided_slice %187 {offsets = [0, 24], sizes = [8, 8], strides = [1, 1]} : vector<8x32xf32> to vector<8x8xf32>
    %cst_94 = arith.constant dense<0.000000e+00> : vector<8x8xf32>
    %253 = tpu.matmul %251, %252, %cst_94 {dimension_numbers = #tpu.dot_dimension_numbers<[1], [0], [0], [1], [0, 0, 1, 1], [], []>} : vector<8x8xf32>, vector<8x8xf32>, vector<8x8xf32> -> vector<8x8xf32>
    %254 = vector.extract_strided_slice %172 {offsets = [24, 0], sizes = [8, 32], strides = [1, 1]} : vector<32x32xf32> to vector<8x32xf32>
    %cst_95 = arith.constant dense<0.000000e+00> : vector<8x32xf32>
    %255 = tpu.matmul %253, %254, %cst_95 {dimension_numbers = #tpu.dot_dimension_numbers<[1], [0], [0], [1], [0, 0, 1, 1], [], []>} : vector<8x8xf32>, vector<8x32xf32>, vector<8x32xf32> -> vector<8x32xf32>
    %256 = arith.addf %239, %255 : vector<8x32xf32>
    %257 = vector.broadcast %176 : vector<1x32xf32> to vector<8x32xf32>
    %258 = arith.addf %256, %257 : vector<8x32xf32>
    %259 = arith.addf %162, %258 : vector<8x32xf32>
    %260 = vector.extract_strided_slice %164 {offsets = [4, 0], sizes = [1, 32], strides = [1, 1]} : vector<9x32xf32> to vector<1x32xf32>
    %261 = vector.extract_strided_slice %164 {offsets = [5, 0], sizes = [1, 32], strides = [1, 1]} : vector<9x32xf32> to vector<1x32xf32>
    %cst_96 = arith.constant dense<0.000000e+00> : vector<8xf32>
    %262 = vector.multi_reduction <add>, %259, %cst_96 [1] : vector<8x32xf32> to vector<8xf32>
    %263 = vector.shape_cast %262 : vector<8xf32> to vector<8x1xf32>
    %cst_97 = arith.constant 3.200000e+01 : f32
    %264 = vector.broadcast %cst_97 : f32 to vector<8x1xf32>
    %265 = arith.divf %263, %264 : vector<8x1xf32>
    %266 = vector.broadcast %265 : vector<8x1xf32> to vector<8x32xf32>
    %267 = arith.subf %259, %266 : vector<8x32xf32>
    %268 = arith.mulf %267, %267 : vector<8x32xf32>
    %cst_98 = arith.constant dense<0.000000e+00> : vector<8xf32>
    %269 = vector.multi_reduction <add>, %268, %cst_98 [1] : vector<8x32xf32> to vector<8xf32>
    %270 = vector.shape_cast %269 : vector<8xf32> to vector<8x1xf32>
    %cst_99 = arith.constant 3.200000e+01 : f32
    %271 = vector.broadcast %cst_99 : f32 to vector<8x1xf32>
    %272 = arith.divf %270, %271 : vector<8x1xf32>
    %273 = vector.broadcast %265 : vector<8x1xf32> to vector<8x32xf32>
    %274 = arith.subf %259, %273 : vector<8x32xf32>
    %cst_100 = arith.constant 9.99999974E-6 : f32
    %275 = vector.broadcast %cst_100 : f32 to vector<8x1xf32>
    %276 = arith.addf %272, %275 : vector<8x1xf32>
    %277 = math.rsqrt %276 : vector<8x1xf32>
    %278 = vector.broadcast %277 : vector<8x1xf32> to vector<8x32xf32>
    %279 = arith.mulf %274, %278 : vector<8x32xf32>
    %280 = vector.broadcast %260 : vector<1x32xf32> to vector<8x32xf32>
    %281 = arith.mulf %279, %280 : vector<8x32xf32>
    %282 = vector.broadcast %261 : vector<1x32xf32> to vector<8x32xf32>
    %283 = arith.addf %281, %282 : vector<8x32xf32>
    %c1_101 = arith.constant 1 : index
    %c0_102 = arith.constant 0 : index
    %c0_103 = arith.constant 0 : index
    %284 = vector.load %arg3[%c1_101, %c0_102, %c0_103] : memref<2x32x64xf32, #tpu.memory_space<vmem>>, vector<1x32x64xf32>
    %285 = vector.shape_cast %284 : vector<1x32x64xf32> to vector<32x64xf32>
    %cst_104 = arith.constant dense<0.000000e+00> : vector<8x64xf32>
    %286 = tpu.matmul %283, %285, %cst_104 {dimension_numbers = #tpu.dot_dimension_numbers<[1], [0], [0], [1], [0, 0, 1, 1], [], []>} : vector<8x32xf32>, vector<32x64xf32>, vector<8x64xf32> -> vector<8x64xf32>
    %c1_105 = arith.constant 1 : index
    %c0_106 = arith.constant 0 : index
    %c0_107 = arith.constant 0 : index
    %287 = vector.load %arg4[%c1_105, %c0_106, %c0_107] : memref<2x1x64xf32, #tpu.memory_space<vmem>>, vector<1x1x64xf32>
    %288 = vector.shape_cast %287 : vector<1x1x64xf32> to vector<1x64xf32>
    %289 = vector.broadcast %288 : vector<1x64xf32> to vector<8x64xf32>
    %290 = arith.addf %286, %289 : vector<8x64xf32>
    %cst_108 = arith.constant 0.000000e+00 : f32
    %291 = vector.broadcast %cst_108 : f32 to vector<8x64xf32>
    %292 = arith.maximumf %290, %291 : vector<8x64xf32>
    %c1_109 = arith.constant 1 : index
    %c0_110 = arith.constant 0 : index
    %c0_111 = arith.constant 0 : index
    %293 = vector.load %arg5[%c1_109, %c0_110, %c0_111] : memref<2x64x32xf32, #tpu.memory_space<vmem>>, vector<1x64x32xf32>
    %294 = vector.shape_cast %293 : vector<1x64x32xf32> to vector<64x32xf32>
    %cst_112 = arith.constant dense<0.000000e+00> : vector<8x32xf32>
    %295 = tpu.matmul %292, %294, %cst_112 {dimension_numbers = #tpu.dot_dimension_numbers<[1], [0], [0], [1], [0, 0, 1, 1], [], []>} : vector<8x64xf32>, vector<64x32xf32>, vector<8x32xf32> -> vector<8x32xf32>
    %296 = vector.extract_strided_slice %164 {offsets = [8, 0], sizes = [1, 32], strides = [1, 1]} : vector<9x32xf32> to vector<1x32xf32>
    %297 = vector.broadcast %296 : vector<1x32xf32> to vector<8x32xf32>
    %298 = arith.addf %295, %297 : vector<8x32xf32>
    %299 = arith.addf %283, %298 : vector<8x32xf32>
    %300 = vector.extract_strided_slice %164 {offsets = [6, 0], sizes = [1, 32], strides = [1, 1]} : vector<9x32xf32> to vector<1x32xf32>
    %301 = vector.extract_strided_slice %164 {offsets = [7, 0], sizes = [1, 32], strides = [1, 1]} : vector<9x32xf32> to vector<1x32xf32>
    %cst_113 = arith.constant dense<0.000000e+00> : vector<8xf32>
    %302 = vector.multi_reduction <add>, %299, %cst_113 [1] : vector<8x32xf32> to vector<8xf32>
    %303 = vector.shape_cast %302 : vector<8xf32> to vector<8x1xf32>
    %cst_114 = arith.constant 3.200000e+01 : f32
    %304 = vector.broadcast %cst_114 : f32 to vector<8x1xf32>
    %305 = arith.divf %303, %304 : vector<8x1xf32>
    %306 = vector.broadcast %305 : vector<8x1xf32> to vector<8x32xf32>
    %307 = arith.subf %299, %306 : vector<8x32xf32>
    %308 = arith.mulf %307, %307 : vector<8x32xf32>
    %cst_115 = arith.constant dense<0.000000e+00> : vector<8xf32>
    %309 = vector.multi_reduction <add>, %308, %cst_115 [1] : vector<8x32xf32> to vector<8xf32>
    %310 = vector.shape_cast %309 : vector<8xf32> to vector<8x1xf32>
    %cst_116 = arith.constant 3.200000e+01 : f32
    %311 = vector.broadcast %cst_116 : f32 to vector<8x1xf32>
    %312 = arith.divf %310, %311 : vector<8x1xf32>
    %313 = vector.broadcast %305 : vector<8x1xf32> to vector<8x32xf32>
    %314 = arith.subf %299, %313 : vector<8x32xf32>
    %cst_117 = arith.constant 9.99999974E-6 : f32
    %315 = vector.broadcast %cst_117 : f32 to vector<8x1xf32>
    %316 = arith.addf %312, %315 : vector<8x1xf32>
    %317 = math.rsqrt %316 : vector<8x1xf32>
    %318 = vector.broadcast %317 : vector<8x1xf32> to vector<8x32xf32>
    %319 = arith.mulf %314, %318 : vector<8x32xf32>
    %320 = vector.broadcast %300 : vector<1x32xf32> to vector<8x32xf32>
    %321 = arith.mulf %319, %320 : vector<8x32xf32>
    %322 = vector.broadcast %301 : vector<1x32xf32> to vector<8x32xf32>
    %323 = arith.addf %321, %322 : vector<8x32xf32>
    %c0_118 = arith.constant 0 : index
    %c0_119 = arith.constant 0 : index
    %c0_120 = arith.constant 0 : index
    %324 = vector.load %arg7[%c0_118, %c0_119, %c0_120] : memref<1x8x32xf32, #tpu.memory_space<vmem>>, vector<1x8x32xf32>
    %325 = vector.shape_cast %324 : vector<1x8x32xf32> to vector<8x32xf32>
    %326 = vector.shape_cast %323 : vector<8x32xf32> to vector<1x8x32xf32>
    tpu.vector_store %arg7[%c0_118, %c0_119, %c0_120], %326 {strides = array<i32>} : memref<1x8x32xf32, #tpu.memory_space<vmem>>, vector<1x8x32xf32>,
    return
  }
  func.func @transform_0(%arg0: i32) -> (i32, i32, i32) {
    %c0_i32 = arith.constant 0 : i32
    %c0_i32_0 = arith.constant 0 : i32
    %c0_i32_1 = arith.constant 0 : i32
    return %arg0, %c0_i32, %c0_i32_0 : i32, i32, i32
  }
  func.func @transform_1(%arg0: i32) -> (i32, i32, i32) {
    %c0_i32 = arith.constant 0 : i32
    %c0_i32_0 = arith.constant 0 : i32
    %c0_i32_1 = arith.constant 0 : i32
    %c0_i32_2 = arith.constant 0 : i32
    return %c0_i32, %c0_i32_0, %c0_i32_1 : i32, i32, i32
  }
  func.func @transform_2(%arg0: i32) -> (i32, i32, i32) {
    %c0_i32 = arith.constant 0 : i32
    %c0_i32_0 = arith.constant 0 : i32
    %c0_i32_1 = arith.constant 0 : i32
    %c0_i32_2 = arith.constant 0 : i32
    return %c0_i32, %c0_i32_0, %c0_i32_1 : i32, i32, i32
  }
  func.func @transform_3(%arg0: i32) -> (i32, i32, i32) {
    %c0_i32 = arith.constant 0 : i32
    %c0_i32_0 = arith.constant 0 : i32
    %c0_i32_1 = arith.constant 0 : i32
    %c0_i32_2 = arith.constant 0 : i32
    return %c0_i32, %c0_i32_0, %c0_i32_1 : i32, i32, i32
  }
  func.func @transform_4(%arg0: i32) -> (i32, i32, i32) {
    %c0_i32 = arith.constant 0 : i32
    %c0_i32_0 = arith.constant 0 : i32
    %c0_i32_1 = arith.constant 0 : i32
    %c0_i32_2 = arith.constant 0 : i32
    return %c0_i32, %c0_i32_0, %c0_i32_1 : i32, i32, i32
  }
  func.func @transform_5(%arg0: i32) -> (i32, i32, i32) {
    %c0_i32 = arith.constant 0 : i32
    %c0_i32_0 = arith.constant 0 : i32
    %c0_i32_1 = arith.constant 0 : i32
    %c0_i32_2 = arith.constant 0 : i32
    return %c0_i32, %c0_i32_0, %c0_i32_1 : i32, i32, i32
  }
  func.func @transform_6(%arg0: i32) -> (i32, i32, i32) {
    %c0_i32 = arith.constant 0 : i32
    %c0_i32_0 = arith.constant 0 : i32
    %c0_i32_1 = arith.constant 0 : i32
    return %arg0, %c0_i32, %c0_i32_0 : i32, i32, i32
  }
}

module attributes {stable_mosaic.version = 11 : i64} {
  func.func @_decoder_stack_kernel(%arg0: i32, %arg1: memref<1x8x32xf32, #tpu.memory_space<vmem>>, %arg2: memref<1x8x32xf32, #tpu.memory_space<vmem>>, %arg3: memref<16x32x32xf32, #tpu.memory_space<vmem>>, %arg4: memref<2x32x64xf32, #tpu.memory_space<vmem>>, %arg5: memref<2x1x64xf32, #tpu.memory_space<vmem>>, %arg6: memref<2x64x32xf32, #tpu.memory_space<vmem>>, %arg7: memref<2x15x32xf32, #tpu.memory_space<vmem>>, %arg8: memref<1x8x32xf32, #tpu.memory_space<vmem>>) attributes {dimension_semantics = [#tpu.dimension_semantics<parallel>], iteration_bounds = array<i64: 2>, scalar_prefetch = 0 : i64, scratch_operands = 0 : i64, tpu.core_type = #tpu.core_type<tc>, window_params = [{transform_indices = @transform_0, window_bounds = array<i64: 1, 8, 32>}, {transform_indices = @transform_1, window_bounds = array<i64: 1, 8, 32>}, {pipeline_mode = #tpu.pipeline_mode<synchronous>, transform_indices = @transform_2, window_bounds = array<i64: 16, 32, 32>}, {pipeline_mode = #tpu.pipeline_mode<synchronous>, transform_indices = @transform_3, window_bounds = array<i64: 2, 32, 64>}, {pipeline_mode = #tpu.pipeline_mode<synchronous>, transform_indices = @transform_4, window_bounds = array<i64: 2, 1, 64>}, {pipeline_mode = #tpu.pipeline_mode<synchronous>, transform_indices = @transform_5, window_bounds = array<i64: 2, 64, 32>}, {pipeline_mode = #tpu.pipeline_mode<synchronous>, transform_indices = @transform_6, window_bounds = array<i64: 2, 15, 32>}, {transform_indices = @transform_7, window_bounds = array<i64: 1, 8, 32>}]} {
    %c0 = arith.constant 0 : index
    %c0_0 = arith.constant 0 : index
    %c0_1 = arith.constant 0 : index
    %0 = vector.load %arg1[%c0, %c0_0, %c0_1] : memref<1x8x32xf32, #tpu.memory_space<vmem>>, vector<1x8x32xf32>
    %1 = vector.shape_cast %0 : vector<1x8x32xf32> to vector<8x32xf32>
    %c0_2 = arith.constant 0 : index
    %c0_3 = arith.constant 0 : index
    %c0_4 = arith.constant 0 : index
    %2 = vector.load %arg2[%c0_2, %c0_3, %c0_4] : memref<1x8x32xf32, #tpu.memory_space<vmem>>, vector<1x8x32xf32>
    %3 = vector.shape_cast %2 : vector<1x8x32xf32> to vector<8x32xf32>
    %c0_5 = arith.constant 0 : index
    %c0_6 = arith.constant 0 : index
    %c0_7 = arith.constant 0 : index
    %4 = vector.load %arg7[%c0_5, %c0_6, %c0_7] : memref<2x15x32xf32, #tpu.memory_space<vmem>>, vector<1x15x32xf32>
    %5 = vector.shape_cast %4 : vector<1x15x32xf32> to vector<15x32xf32>
    %c0_8 = arith.constant 0 : index
    %c0_9 = arith.constant 0 : index
    %c0_10 = arith.constant 0 : index
    %6 = vector.load %arg3[%c0_8, %c0_9, %c0_10] : memref<16x32x32xf32, #tpu.memory_space<vmem>>, vector<1x32x32xf32>
    %7 = vector.shape_cast %6 : vector<1x32x32xf32> to vector<32x32xf32>
    %c1 = arith.constant 1 : index
    %c0_11 = arith.constant 0 : index
    %c0_12 = arith.constant 0 : index
    %8 = vector.load %arg3[%c1, %c0_11, %c0_12] : memref<16x32x32xf32, #tpu.memory_space<vmem>>, vector<1x32x32xf32>
    %9 = vector.shape_cast %8 : vector<1x32x32xf32> to vector<32x32xf32>
    %c2 = arith.constant 2 : index
    %c0_13 = arith.constant 0 : index
    %c0_14 = arith.constant 0 : index
    %10 = vector.load %arg3[%c2, %c0_13, %c0_14] : memref<16x32x32xf32, #tpu.memory_space<vmem>>, vector<1x32x32xf32>
    %11 = vector.shape_cast %10 : vector<1x32x32xf32> to vector<32x32xf32>
    %c3 = arith.constant 3 : index
    %c0_15 = arith.constant 0 : index
    %c0_16 = arith.constant 0 : index
    %12 = vector.load %arg3[%c3, %c0_15, %c0_16] : memref<16x32x32xf32, #tpu.memory_space<vmem>>, vector<1x32x32xf32>
    %13 = vector.shape_cast %12 : vector<1x32x32xf32> to vector<32x32xf32>
    %14 = vector.extract_strided_slice %5 {offsets = [0, 0], sizes = [1, 32], strides = [1, 1]} : vector<15x32xf32> to vector<1x32xf32>
    %15 = vector.extract_strided_slice %5 {offsets = [1, 0], sizes = [1, 32], strides = [1, 1]} : vector<15x32xf32> to vector<1x32xf32>
    %16 = vector.extract_strided_slice %5 {offsets = [2, 0], sizes = [1, 32], strides = [1, 1]} : vector<15x32xf32> to vector<1x32xf32>
    %17 = vector.extract_strided_slice %5 {offsets = [3, 0], sizes = [1, 32], strides = [1, 1]} : vector<15x32xf32> to vector<1x32xf32>
    %cst = arith.constant dense<0.000000e+00> : vector<8x32xf32>
    %18 = tpu.matmul %1, %7, %cst {dimension_numbers = #tpu.dot_dimension_numbers<[1], [0], [0], [1], [0, 0, 1, 1], [], []>} : vector<8x32xf32>, vector<32x32xf32>, vector<8x32xf32> -> vector<8x32xf32>
    %19 = vector.broadcast %14 : vector<1x32xf32> to vector<8x32xf32>
    %20 = arith.addf %18, %19 : vector<8x32xf32>
    %cst_17 = arith.constant 0.353553385 : f32
    %21 = vector.broadcast %cst_17 : f32 to vector<8x32xf32>
    %22 = arith.mulf %20, %21 : vector<8x32xf32>
    %cst_18 = arith.constant dense<0.000000e+00> : vector<8x32xf32>
    %23 = tpu.matmul %1, %9, %cst_18 {dimension_numbers = #tpu.dot_dimension_numbers<[1], [0], [0], [1], [0, 0, 1, 1], [], []>} : vector<8x32xf32>, vector<32x32xf32>, vector<8x32xf32> -> vector<8x32xf32>
    %24 = vector.broadcast %15 : vector<1x32xf32> to vector<8x32xf32>
    %25 = arith.addf %23, %24 : vector<8x32xf32>
    %cst_19 = arith.constant dense<0.000000e+00> : vector<8x32xf32>
    %26 = tpu.matmul %1, %11, %cst_19 {dimension_numbers = #tpu.dot_dimension_numbers<[1], [0], [0], [1], [0, 0, 1, 1], [], []>} : vector<8x32xf32>, vector<32x32xf32>, vector<8x32xf32> -> vector<8x32xf32>
    %27 = vector.broadcast %16 : vector<1x32xf32> to vector<8x32xf32>
    %28 = arith.addf %26, %27 : vector<8x32xf32>
    %cst_20 = arith.constant 0.000000e+00 : f32
    %29 = vector.broadcast %cst_20 : f32 to vector<8x32xf32>
    %30 = vector.extract_strided_slice %22 {offsets = [0, 0], sizes = [8, 8], strides = [1, 1]} : vector<8x32xf32> to vector<8x8xf32>
    %31 = vector.extract_strided_slice %25 {offsets = [0, 0], sizes = [8, 8], strides = [1, 1]} : vector<8x32xf32> to vector<8x8xf32>
    %cst_21 = arith.constant dense<0.000000e+00> : vector<8x8xf32>
    %32 = tpu.matmul %30, %31, %cst_21 {dimension_numbers = #tpu.dot_dimension_numbers<[1], [1], [0], [0], [0, 0, 1, 0], [], []>} : vector<8x8xf32>, vector<8x8xf32>, vector<8x8xf32> -> vector<8x8xf32>
    %cst_22 = arith.constant dense<0xFF800000> : vector<8xf32>
    %33 = vector.multi_reduction <maximumf>, %32, %cst_22 [1] : vector<8x8xf32> to vector<8xf32>
    %34 = vector.shape_cast %33 : vector<8xf32> to vector<8x1xf32>
    %35 = vector.broadcast %34 : vector<8x1xf32> to vector<8x8xf32>
    %36 = arith.subf %32, %35 : vector<8x8xf32>
    %37 = math.exp %36 : vector<8x8xf32>
    %cst_23 = arith.constant dense<0.000000e+00> : vector<8xf32>
    %38 = vector.multi_reduction <add>, %37, %cst_23 [1] : vector<8x8xf32> to vector<8xf32>
    %39 = vector.shape_cast %38 : vector<8xf32> to vector<8x1xf32>
    %40 = vector.broadcast %39 : vector<8x1xf32> to vector<8x8xf32>
    %41 = arith.divf %37, %40 : vector<8x8xf32>
    %42 = vector.extract_strided_slice %28 {offsets = [0, 0], sizes = [8, 8], strides = [1, 1]} : vector<8x32xf32> to vector<8x8xf32>
    %cst_24 = arith.constant dense<0.000000e+00> : vector<8x8xf32>
    %43 = tpu.matmul %41, %42, %cst_24 {dimension_numbers = #tpu.dot_dimension_numbers<[1], [0], [0], [1], [0, 0, 1, 1], [], []>} : vector<8x8xf32>, vector<8x8xf32>, vector<8x8xf32> -> vector<8x8xf32>
    %44 = vector.extract_strided_slice %13 {offsets = [0, 0], sizes = [8, 32], strides = [1, 1]} : vector<32x32xf32> to vector<8x32xf32>
    %cst_25 = arith.constant dense<0.000000e+00> : vector<8x32xf32>
    %45 = tpu.matmul %43, %44, %cst_25 {dimension_numbers = #tpu.dot_dimension_numbers<[1], [0], [0], [1], [0, 0, 1, 1], [], []>} : vector<8x8xf32>, vector<8x32xf32>, vector<8x32xf32> -> vector<8x32xf32>
    %46 = arith.addf %29, %45 : vector<8x32xf32>
    %47 = vector.extract_strided_slice %22 {offsets = [0, 8], sizes = [8, 8], strides = [1, 1]} : vector<8x32xf32> to vector<8x8xf32>
    %48 = vector.extract_strided_slice %25 {offsets = [0, 8], sizes = [8, 8], strides = [1, 1]} : vector<8x32xf32> to vector<8x8xf32>
    %cst_26 = arith.constant dense<0.000000e+00> : vector<8x8xf32>
    %49 = tpu.matmul %47, %48, %cst_26 {dimension_numbers = #tpu.dot_dimension_numbers<[1], [1], [0], [0], [0, 0, 1, 0], [], []>} : vector<8x8xf32>, vector<8x8xf32>, vector<8x8xf32> -> vector<8x8xf32>
    %cst_27 = arith.constant dense<0xFF800000> : vector<8xf32>
    %50 = vector.multi_reduction <maximumf>, %49, %cst_27 [1] : vector<8x8xf32> to vector<8xf32>
    %51 = vector.shape_cast %50 : vector<8xf32> to vector<8x1xf32>
    %52 = vector.broadcast %51 : vector<8x1xf32> to vector<8x8xf32>
    %53 = arith.subf %49, %52 : vector<8x8xf32>
    %54 = math.exp %53 : vector<8x8xf32>
    %cst_28 = arith.constant dense<0.000000e+00> : vector<8xf32>
    %55 = vector.multi_reduction <add>, %54, %cst_28 [1] : vector<8x8xf32> to vector<8xf32>
    %56 = vector.shape_cast %55 : vector<8xf32> to vector<8x1xf32>
    %57 = vector.broadcast %56 : vector<8x1xf32> to vector<8x8xf32>
    %58 = arith.divf %54, %57 : vector<8x8xf32>
    %59 = vector.extract_strided_slice %28 {offsets = [0, 8], sizes = [8, 8], strides = [1, 1]} : vector<8x32xf32> to vector<8x8xf32>
    %cst_29 = arith.constant dense<0.000000e+00> : vector<8x8xf32>
    %60 = tpu.matmul %58, %59, %cst_29 {dimension_numbers = #tpu.dot_dimension_numbers<[1], [0], [0], [1], [0, 0, 1, 1], [], []>} : vector<8x8xf32>, vector<8x8xf32>, vector<8x8xf32> -> vector<8x8xf32>
    %61 = vector.extract_strided_slice %13 {offsets = [8, 0], sizes = [8, 32], strides = [1, 1]} : vector<32x32xf32> to vector<8x32xf32>
    %cst_30 = arith.constant dense<0.000000e+00> : vector<8x32xf32>
    %62 = tpu.matmul %60, %61, %cst_30 {dimension_numbers = #tpu.dot_dimension_numbers<[1], [0], [0], [1], [0, 0, 1, 1], [], []>} : vector<8x8xf32>, vector<8x32xf32>, vector<8x32xf32> -> vector<8x32xf32>
    %63 = arith.addf %46, %62 : vector<8x32xf32>
    %64 = vector.extract_strided_slice %22 {offsets = [0, 16], sizes = [8, 8], strides = [1, 1]} : vector<8x32xf32> to vector<8x8xf32>
    %65 = vector.extract_strided_slice %25 {offsets = [0, 16], sizes = [8, 8], strides = [1, 1]} : vector<8x32xf32> to vector<8x8xf32>
    %cst_31 = arith.constant dense<0.000000e+00> : vector<8x8xf32>
    %66 = tpu.matmul %64, %65, %cst_31 {dimension_numbers = #tpu.dot_dimension_numbers<[1], [1], [0], [0], [0, 0, 1, 0], [], []>} : vector<8x8xf32>, vector<8x8xf32>, vector<8x8xf32> -> vector<8x8xf32>
    %cst_32 = arith.constant dense<0xFF800000> : vector<8xf32>
    %67 = vector.multi_reduction <maximumf>, %66, %cst_32 [1] : vector<8x8xf32> to vector<8xf32>
    %68 = vector.shape_cast %67 : vector<8xf32> to vector<8x1xf32>
    %69 = vector.broadcast %68 : vector<8x1xf32> to vector<8x8xf32>
    %70 = arith.subf %66, %69 : vector<8x8xf32>
    %71 = math.exp %70 : vector<8x8xf32>
    %cst_33 = arith.constant dense<0.000000e+00> : vector<8xf32>
    %72 = vector.multi_reduction <add>, %71, %cst_33 [1] : vector<8x8xf32> to vector<8xf32>
    %73 = vector.shape_cast %72 : vector<8xf32> to vector<8x1xf32>
    %74 = vector.broadcast %73 : vector<8x1xf32> to vector<8x8xf32>
    %75 = arith.divf %71, %74 : vector<8x8xf32>
    %76 = vector.extract_strided_slice %28 {offsets = [0, 16], sizes = [8, 8], strides = [1, 1]} : vector<8x32xf32> to vector<8x8xf32>
    %cst_34 = arith.constant dense<0.000000e+00> : vector<8x8xf32>
    %77 = tpu.matmul %75, %76, %cst_34 {dimension_numbers = #tpu.dot_dimension_numbers<[1], [0], [0], [1], [0, 0, 1, 1], [], []>} : vector<8x8xf32>, vector<8x8xf32>, vector<8x8xf32> -> vector<8x8xf32>
    %78 = vector.extract_strided_slice %13 {offsets = [16, 0], sizes = [8, 32], strides = [1, 1]} : vector<32x32xf32> to vector<8x32xf32>
    %cst_35 = arith.constant dense<0.000000e+00> : vector<8x32xf32>
    %79 = tpu.matmul %77, %78, %cst_35 {dimension_numbers = #tpu.dot_dimension_numbers<[1], [0], [0], [1], [0, 0, 1, 1], [], []>} : vector<8x8xf32>, vector<8x32xf32>, vector<8x32xf32> -> vector<8x32xf32>
    %80 = arith.addf %63, %79 : vector<8x32xf32>
    %81 = vector.extract_strided_slice %22 {offsets = [0, 24], sizes = [8, 8], strides = [1, 1]} : vector<8x32xf32> to vector<8x8xf32>
    %82 = vector.extract_strided_slice %25 {offsets = [0, 24], sizes = [8, 8], strides = [1, 1]} : vector<8x32xf32> to vector<8x8xf32>
    %cst_36 = arith.constant dense<0.000000e+00> : vector<8x8xf32>
    %83 = tpu.matmul %81, %82, %cst_36 {dimension_numbers = #tpu.dot_dimension_numbers<[1], [1], [0], [0], [0, 0, 1, 0], [], []>} : vector<8x8xf32>, vector<8x8xf32>, vector<8x8xf32> -> vector<8x8xf32>
    %cst_37 = arith.constant dense<0xFF800000> : vector<8xf32>
    %84 = vector.multi_reduction <maximumf>, %83, %cst_37 [1] : vector<8x8xf32> to vector<8xf32>
    %85 = vector.shape_cast %84 : vector<8xf32> to vector<8x1xf32>
    %86 = vector.broadcast %85 : vector<8x1xf32> to vector<8x8xf32>
    %87 = arith.subf %83, %86 : vector<8x8xf32>
    %88 = math.exp %87 : vector<8x8xf32>
    %cst_38 = arith.constant dense<0.000000e+00> : vector<8xf32>
    %89 = vector.multi_reduction <add>, %88, %cst_38 [1] : vector<8x8xf32> to vector<8xf32>
    %90 = vector.shape_cast %89 : vector<8xf32> to vector<8x1xf32>
    %91 = vector.broadcast %90 : vector<8x1xf32> to vector<8x8xf32>
    %92 = arith.divf %88, %91 : vector<8x8xf32>
    %93 = vector.extract_strided_slice %28 {offsets = [0, 24], sizes = [8, 8], strides = [1, 1]} : vector<8x32xf32> to vector<8x8xf32>
    %cst_39 = arith.constant dense<0.000000e+00> : vector<8x8xf32>
    %94 = tpu.matmul %92, %93, %cst_39 {dimension_numbers = #tpu.dot_dimension_numbers<[1], [0], [0], [1], [0, 0, 1, 1], [], []>} : vector<8x8xf32>, vector<8x8xf32>, vector<8x8xf32> -> vector<8x8xf32>
    %95 = vector.extract_strided_slice %13 {offsets = [24, 0], sizes = [8, 32], strides = [1, 1]} : vector<32x32xf32> to vector<8x32xf32>
    %cst_40 = arith.constant dense<0.000000e+00> : vector<8x32xf32>
    %96 = tpu.matmul %94, %95, %cst_40 {dimension_numbers = #tpu.dot_dimension_numbers<[1], [0], [0], [1], [0, 0, 1, 1], [], []>} : vector<8x8xf32>, vector<8x32xf32>, vector<8x32xf32> -> vector<8x32xf32>
    %97 = arith.addf %80, %96 : vector<8x32xf32>
    %98 = vector.broadcast %17 : vector<1x32xf32> to vector<8x32xf32>
    %99 = arith.addf %97, %98 : vector<8x32xf32>
    %100 = arith.addf %1, %99 : vector<8x32xf32>
    %101 = vector.extract_strided_slice %5 {offsets = [8, 0], sizes = [1, 32], strides = [1, 1]} : vector<15x32xf32> to vector<1x32xf32>
    %102 = vector.extract_strided_slice %5 {offsets = [9, 0], sizes = [1, 32], strides = [1, 1]} : vector<15x32xf32> to vector<1x32xf32>
    %cst_41 = arith.constant dense<0.000000e+00> : vector<8xf32>
    %103 = vector.multi_reduction <add>, %100, %cst_41 [1] : vector<8x32xf32> to vector<8xf32>
    %104 = vector.shape_cast %103 : vector<8xf32> to vector<8x1xf32>
    %cst_42 = arith.constant 3.200000e+01 : f32
    %105 = vector.broadcast %cst_42 : f32 to vector<8x1xf32>
    %106 = arith.divf %104, %105 : vector<8x1xf32>
    %107 = vector.broadcast %106 : vector<8x1xf32> to vector<8x32xf32>
    %108 = arith.subf %100, %107 : vector<8x32xf32>
    %109 = arith.mulf %108, %108 : vector<8x32xf32>
    %cst_43 = arith.constant dense<0.000000e+00> : vector<8xf32>
    %110 = vector.multi_reduction <add>, %109, %cst_43 [1] : vector<8x32xf32> to vector<8xf32>
    %111 = vector.shape_cast %110 : vector<8xf32> to vector<8x1xf32>
    %cst_44 = arith.constant 3.200000e+01 : f32
    %112 = vector.broadcast %cst_44 : f32 to vector<8x1xf32>
    %113 = arith.divf %111, %112 : vector<8x1xf32>
    %114 = vector.broadcast %106 : vector<8x1xf32> to vector<8x32xf32>
    %115 = arith.subf %100, %114 : vector<8x32xf32>
    %cst_45 = arith.constant 9.99999974E-6 : f32
    %116 = vector.broadcast %cst_45 : f32 to vector<8x1xf32>
    %117 = arith.addf %113, %116 : vector<8x1xf32>
    %118 = math.rsqrt %117 : vector<8x1xf32>
    %119 = vector.broadcast %118 : vector<8x1xf32> to vector<8x32xf32>
    %120 = arith.mulf %115, %119 : vector<8x32xf32>
    %121 = vector.broadcast %101 : vector<1x32xf32> to vector<8x32xf32>
    %122 = arith.mulf %120, %121 : vector<8x32xf32>
    %123 = vector.broadcast %102 : vector<1x32xf32> to vector<8x32xf32>
    %124 = arith.addf %122, %123 : vector<8x32xf32>
    %c4 = arith.constant 4 : index
    %c0_46 = arith.constant 0 : index
    %c0_47 = arith.constant 0 : index
    %125 = vector.load %arg3[%c4, %c0_46, %c0_47] : memref<16x32x32xf32, #tpu.memory_space<vmem>>, vector<1x32x32xf32>
    %126 = vector.shape_cast %125 : vector<1x32x32xf32> to vector<32x32xf32>
    %c5 = arith.constant 5 : index
    %c0_48 = arith.constant 0 : index
    %c0_49 = arith.constant 0 : index
    %127 = vector.load %arg3[%c5, %c0_48, %c0_49] : memref<16x32x32xf32, #tpu.memory_space<vmem>>, vector<1x32x32xf32>
    %128 = vector.shape_cast %127 : vector<1x32x32xf32> to vector<32x32xf32>
    %c6 = arith.constant 6 : index
    %c0_50 = arith.constant 0 : index
    %c0_51 = arith.constant 0 : index
    %129 = vector.load %arg3[%c6, %c0_50, %c0_51] : memref<16x32x32xf32, #tpu.memory_space<vmem>>, vector<1x32x32xf32>
    %130 = vector.shape_cast %129 : vector<1x32x32xf32> to vector<32x32xf32>
    %c7 = arith.constant 7 : index
    %c0_52 = arith.constant 0 : index
    %c0_53 = arith.constant 0 : index
    %131 = vector.load %arg3[%c7, %c0_52, %c0_53] : memref<16x32x32xf32, #tpu.memory_space<vmem>>, vector<1x32x32xf32>
    %132 = vector.shape_cast %131 : vector<1x32x32xf32> to vector<32x32xf32>
    %133 = vector.extract_strided_slice %5 {offsets = [4, 0], sizes = [1, 32], strides = [1, 1]} : vector<15x32xf32> to vector<1x32xf32>
    %134 = vector.extract_strided_slice %5 {offsets = [5, 0], sizes = [1, 32], strides = [1, 1]} : vector<15x32xf32> to vector<1x32xf32>
    %135 = vector.extract_strided_slice %5 {offsets = [6, 0], sizes = [1, 32], strides = [1, 1]} : vector<15x32xf32> to vector<1x32xf32>
    %136 = vector.extract_strided_slice %5 {offsets = [7, 0], sizes = [1, 32], strides = [1, 1]} : vector<15x32xf32> to vector<1x32xf32>
    %cst_54 = arith.constant dense<0.000000e+00> : vector<8x32xf32>
    %137 = tpu.matmul %124, %126, %cst_54 {dimension_numbers = #tpu.dot_dimension_numbers<[1], [0], [0], [1], [0, 0, 1, 1], [], []>} : vector<8x32xf32>, vector<32x32xf32>, vector<8x32xf32> -> vector<8x32xf32>
    %138 = vector.broadcast %133 : vector<1x32xf32> to vector<8x32xf32>
    %139 = arith.addf %137, %138 : vector<8x32xf32>
    %cst_55 = arith.constant 0.353553385 : f32
    %140 = vector.broadcast %cst_55 : f32 to vector<8x32xf32>
    %141 = arith.mulf %139, %140 : vector<8x32xf32>
    %cst_56 = arith.constant dense<0.000000e+00> : vector<8x32xf32>
    %142 = tpu.matmul %3, %128, %cst_56 {dimension_numbers = #tpu.dot_dimension_numbers<[1], [0], [0], [1], [0, 0, 1, 1], [], []>} : vector<8x32xf32>, vector<32x32xf32>, vector<8x32xf32> -> vector<8x32xf32>
    %143 = vector.broadcast %134 : vector<1x32xf32> to vector<8x32xf32>
    %144 = arith.addf %142, %143 : vector<8x32xf32>
    %cst_57 = arith.constant dense<0.000000e+00> : vector<8x32xf32>
    %145 = tpu.matmul %3, %130, %cst_57 {dimension_numbers = #tpu.dot_dimension_numbers<[1], [0], [0], [1], [0, 0, 1, 1], [], []>} : vector<8x32xf32>, vector<32x32xf32>, vector<8x32xf32> -> vector<8x32xf32>
    %146 = vector.broadcast %135 : vector<1x32xf32> to vector<8x32xf32>
    %147 = arith.addf %145, %146 : vector<8x32xf32>
    %cst_58 = arith.constant 0.000000e+00 : f32
    %148 = vector.broadcast %cst_58 : f32 to vector<8x32xf32>
    %149 = vector.extract_strided_slice %141 {offsets = [0, 0], sizes = [8, 8], strides = [1, 1]} : vector<8x32xf32> to vector<8x8xf32>
    %150 = vector.extract_strided_slice %144 {offsets = [0, 0], sizes = [8, 8], strides = [1, 1]} : vector<8x32xf32> to vector<8x8xf32>
    %cst_59 = arith.constant dense<0.000000e+00> : vector<8x8xf32>
    %151 = tpu.matmul %149, %150, %cst_59 {dimension_numbers = #tpu.dot_dimension_numbers<[1], [1], [0], [0], [0, 0, 1, 0], [], []>} : vector<8x8xf32>, vector<8x8xf32>, vector<8x8xf32> -> vector<8x8xf32>
    %cst_60 = arith.constant dense<0xFF800000> : vector<8xf32>
    %152 = vector.multi_reduction <maximumf>, %151, %cst_60 [1] : vector<8x8xf32> to vector<8xf32>
    %153 = vector.shape_cast %152 : vector<8xf32> to vector<8x1xf32>
    %154 = vector.broadcast %153 : vector<8x1xf32> to vector<8x8xf32>
    %155 = arith.subf %151, %154 : vector<8x8xf32>
    %156 = math.exp %155 : vector<8x8xf32>
    %cst_61 = arith.constant dense<0.000000e+00> : vector<8xf32>
    %157 = vector.multi_reduction <add>, %156, %cst_61 [1] : vector<8x8xf32> to vector<8xf32>
    %158 = vector.shape_cast %157 : vector<8xf32> to vector<8x1xf32>
    %159 = vector.broadcast %158 : vector<8x1xf32> to vector<8x8xf32>
    %160 = arith.divf %156, %159 : vector<8x8xf32>
    %161 = vector.extract_strided_slice %147 {offsets = [0, 0], sizes = [8, 8], strides = [1, 1]} : vector<8x32xf32> to vector<8x8xf32>
    %cst_62 = arith.constant dense<0.000000e+00> : vector<8x8xf32>
    %162 = tpu.matmul %160, %161, %cst_62 {dimension_numbers = #tpu.dot_dimension_numbers<[1], [0], [0], [1], [0, 0, 1, 1], [], []>} : vector<8x8xf32>, vector<8x8xf32>, vector<8x8xf32> -> vector<8x8xf32>
    %163 = vector.extract_strided_slice %132 {offsets = [0, 0], sizes = [8, 32], strides = [1, 1]} : vector<32x32xf32> to vector<8x32xf32>
    %cst_63 = arith.constant dense<0.000000e+00> : vector<8x32xf32>
    %164 = tpu.matmul %162, %163, %cst_63 {dimension_numbers = #tpu.dot_dimension_numbers<[1], [0], [0], [1], [0, 0, 1, 1], [], []>} : vector<8x8xf32>, vector<8x32xf32>, vector<8x32xf32> -> vector<8x32xf32>
    %165 = arith.addf %148, %164 : vector<8x32xf32>
    %166 = vector.extract_strided_slice %141 {offsets = [0, 8], sizes = [8, 8], strides = [1, 1]} : vector<8x32xf32> to vector<8x8xf32>
    %167 = vector.extract_strided_slice %144 {offsets = [0, 8], sizes = [8, 8], strides = [1, 1]} : vector<8x32xf32> to vector<8x8xf32>
    %cst_64 = arith.constant dense<0.000000e+00> : vector<8x8xf32>
    %168 = tpu.matmul %166, %167, %cst_64 {dimension_numbers = #tpu.dot_dimension_numbers<[1], [1], [0], [0], [0, 0, 1, 0], [], []>} : vector<8x8xf32>, vector<8x8xf32>, vector<8x8xf32> -> vector<8x8xf32>
    %cst_65 = arith.constant dense<0xFF800000> : vector<8xf32>
    %169 = vector.multi_reduction <maximumf>, %168, %cst_65 [1] : vector<8x8xf32> to vector<8xf32>
    %170 = vector.shape_cast %169 : vector<8xf32> to vector<8x1xf32>
    %171 = vector.broadcast %170 : vector<8x1xf32> to vector<8x8xf32>
    %172 = arith.subf %168, %171 : vector<8x8xf32>
    %173 = math.exp %172 : vector<8x8xf32>
    %cst_66 = arith.constant dense<0.000000e+00> : vector<8xf32>
    %174 = vector.multi_reduction <add>, %173, %cst_66 [1] : vector<8x8xf32> to vector<8xf32>
    %175 = vector.shape_cast %174 : vector<8xf32> to vector<8x1xf32>
    %176 = vector.broadcast %175 : vector<8x1xf32> to vector<8x8xf32>
    %177 = arith.divf %173, %176 : vector<8x8xf32>
    %178 = vector.extract_strided_slice %147 {offsets = [0, 8], sizes = [8, 8], strides = [1, 1]} : vector<8x32xf32> to vector<8x8xf32>
    %cst_67 = arith.constant dense<0.000000e+00> : vector<8x8xf32>
    %179 = tpu.matmul %177, %178, %cst_67 {dimension_numbers = #tpu.dot_dimension_numbers<[1], [0], [0], [1], [0, 0, 1, 1], [], []>} : vector<8x8xf32>, vector<8x8xf32>, vector<8x8xf32> -> vector<8x8xf32>
    %180 = vector.extract_strided_slice %132 {offsets = [8, 0], sizes = [8, 32], strides = [1, 1]} : vector<32x32xf32> to vector<8x32xf32>
    %cst_68 = arith.constant dense<0.000000e+00> : vector<8x32xf32>
    %181 = tpu.matmul %179, %180, %cst_68 {dimension_numbers = #tpu.dot_dimension_numbers<[1], [0], [0], [1], [0, 0, 1, 1], [], []>} : vector<8x8xf32>, vector<8x32xf32>, vector<8x32xf32> -> vector<8x32xf32>
    %182 = arith.addf %165, %181 : vector<8x32xf32>
    %183 = vector.extract_strided_slice %141 {offsets = [0, 16], sizes = [8, 8], strides = [1, 1]} : vector<8x32xf32> to vector<8x8xf32>
    %184 = vector.extract_strided_slice %144 {offsets = [0, 16], sizes = [8, 8], strides = [1, 1]} : vector<8x32xf32> to vector<8x8xf32>
    %cst_69 = arith.constant dense<0.000000e+00> : vector<8x8xf32>
    %185 = tpu.matmul %183, %184, %cst_69 {dimension_numbers = #tpu.dot_dimension_numbers<[1], [1], [0], [0], [0, 0, 1, 0], [], []>} : vector<8x8xf32>, vector<8x8xf32>, vector<8x8xf32> -> vector<8x8xf32>
    %cst_70 = arith.constant dense<0xFF800000> : vector<8xf32>
    %186 = vector.multi_reduction <maximumf>, %185, %cst_70 [1] : vector<8x8xf32> to vector<8xf32>
    %187 = vector.shape_cast %186 : vector<8xf32> to vector<8x1xf32>
    %188 = vector.broadcast %187 : vector<8x1xf32> to vector<8x8xf32>
    %189 = arith.subf %185, %188 : vector<8x8xf32>
    %190 = math.exp %189 : vector<8x8xf32>
    %cst_71 = arith.constant dense<0.000000e+00> : vector<8xf32>
    %191 = vector.multi_reduction <add>, %190, %cst_71 [1] : vector<8x8xf32> to vector<8xf32>
    %192 = vector.shape_cast %191 : vector<8xf32> to vector<8x1xf32>
    %193 = vector.broadcast %192 : vector<8x1xf32> to vector<8x8xf32>
    %194 = arith.divf %190, %193 : vector<8x8xf32>
    %195 = vector.extract_strided_slice %147 {offsets = [0, 16], sizes = [8, 8], strides = [1, 1]} : vector<8x32xf32> to vector<8x8xf32>
    %cst_72 = arith.constant dense<0.000000e+00> : vector<8x8xf32>
    %196 = tpu.matmul %194, %195, %cst_72 {dimension_numbers = #tpu.dot_dimension_numbers<[1], [0], [0], [1], [0, 0, 1, 1], [], []>} : vector<8x8xf32>, vector<8x8xf32>, vector<8x8xf32> -> vector<8x8xf32>
    %197 = vector.extract_strided_slice %132 {offsets = [16, 0], sizes = [8, 32], strides = [1, 1]} : vector<32x32xf32> to vector<8x32xf32>
    %cst_73 = arith.constant dense<0.000000e+00> : vector<8x32xf32>
    %198 = tpu.matmul %196, %197, %cst_73 {dimension_numbers = #tpu.dot_dimension_numbers<[1], [0], [0], [1], [0, 0, 1, 1], [], []>} : vector<8x8xf32>, vector<8x32xf32>, vector<8x32xf32> -> vector<8x32xf32>
    %199 = arith.addf %182, %198 : vector<8x32xf32>
    %200 = vector.extract_strided_slice %141 {offsets = [0, 24], sizes = [8, 8], strides = [1, 1]} : vector<8x32xf32> to vector<8x8xf32>
    %201 = vector.extract_strided_slice %144 {offsets = [0, 24], sizes = [8, 8], strides = [1, 1]} : vector<8x32xf32> to vector<8x8xf32>
    %cst_74 = arith.constant dense<0.000000e+00> : vector<8x8xf32>
    %202 = tpu.matmul %200, %201, %cst_74 {dimension_numbers = #tpu.dot_dimension_numbers<[1], [1], [0], [0], [0, 0, 1, 0], [], []>} : vector<8x8xf32>, vector<8x8xf32>, vector<8x8xf32> -> vector<8x8xf32>
    %cst_75 = arith.constant dense<0xFF800000> : vector<8xf32>
    %203 = vector.multi_reduction <maximumf>, %202, %cst_75 [1] : vector<8x8xf32> to vector<8xf32>
    %204 = vector.shape_cast %203 : vector<8xf32> to vector<8x1xf32>
    %205 = vector.broadcast %204 : vector<8x1xf32> to vector<8x8xf32>
    %206 = arith.subf %202, %205 : vector<8x8xf32>
    %207 = math.exp %206 : vector<8x8xf32>
    %cst_76 = arith.constant dense<0.000000e+00> : vector<8xf32>
    %208 = vector.multi_reduction <add>, %207, %cst_76 [1] : vector<8x8xf32> to vector<8xf32>
    %209 = vector.shape_cast %208 : vector<8xf32> to vector<8x1xf32>
    %210 = vector.broadcast %209 : vector<8x1xf32> to vector<8x8xf32>
    %211 = arith.divf %207, %210 : vector<8x8xf32>
    %212 = vector.extract_strided_slice %147 {offsets = [0, 24], sizes = [8, 8], strides = [1, 1]} : vector<8x32xf32> to vector<8x8xf32>
    %cst_77 = arith.constant dense<0.000000e+00> : vector<8x8xf32>
    %213 = tpu.matmul %211, %212, %cst_77 {dimension_numbers = #tpu.dot_dimension_numbers<[1], [0], [0], [1], [0, 0, 1, 1], [], []>} : vector<8x8xf32>, vector<8x8xf32>, vector<8x8xf32> -> vector<8x8xf32>
    %214 = vector.extract_strided_slice %132 {offsets = [24, 0], sizes = [8, 32], strides = [1, 1]} : vector<32x32xf32> to vector<8x32xf32>
    %cst_78 = arith.constant dense<0.000000e+00> : vector<8x32xf32>
    %215 = tpu.matmul %213, %214, %cst_78 {dimension_numbers = #tpu.dot_dimension_numbers<[1], [0], [0], [1], [0, 0, 1, 1], [], []>} : vector<8x8xf32>, vector<8x32xf32>, vector<8x32xf32> -> vector<8x32xf32>
    %216 = arith.addf %199, %215 : vector<8x32xf32>
    %217 = vector.broadcast %136 : vector<1x32xf32> to vector<8x32xf32>
    %218 = arith.addf %216, %217 : vector<8x32xf32>
    %219 = arith.addf %124, %218 : vector<8x32xf32>
    %220 = vector.extract_strided_slice %5 {offsets = [10, 0], sizes = [1, 32], strides = [1, 1]} : vector<15x32xf32> to vector<1x32xf32>
    %221 = vector.extract_strided_slice %5 {offsets = [11, 0], sizes = [1, 32], strides = [1, 1]} : vector<15x32xf32> to vector<1x32xf32>
    %cst_79 = arith.constant dense<0.000000e+00> : vector<8xf32>
    %222 = vector.multi_reduction <add>, %219, %cst_79 [1] : vector<8x32xf32> to vector<8xf32>
    %223 = vector.shape_cast %222 : vector<8xf32> to vector<8x1xf32>
    %cst_80 = arith.constant 3.200000e+01 : f32
    %224 = vector.broadcast %cst_80 : f32 to vector<8x1xf32>
    %225 = arith.divf %223, %224 : vector<8x1xf32>
    %226 = vector.broadcast %225 : vector<8x1xf32> to vector<8x32xf32>
    %227 = arith.subf %219, %226 : vector<8x32xf32>
    %228 = arith.mulf %227, %227 : vector<8x32xf32>
    %cst_81 = arith.constant dense<0.000000e+00> : vector<8xf32>
    %229 = vector.multi_reduction <add>, %228, %cst_81 [1] : vector<8x32xf32> to vector<8xf32>
    %230 = vector.shape_cast %229 : vector<8xf32> to vector<8x1xf32>
    %cst_82 = arith.constant 3.200000e+01 : f32
    %231 = vector.broadcast %cst_82 : f32 to vector<8x1xf32>
    %232 = arith.divf %230, %231 : vector<8x1xf32>
    %233 = vector.broadcast %225 : vector<8x1xf32> to vector<8x32xf32>
    %234 = arith.subf %219, %233 : vector<8x32xf32>
    %cst_83 = arith.constant 9.99999974E-6 : f32
    %235 = vector.broadcast %cst_83 : f32 to vector<8x1xf32>
    %236 = arith.addf %232, %235 : vector<8x1xf32>
    %237 = math.rsqrt %236 : vector<8x1xf32>
    %238 = vector.broadcast %237 : vector<8x1xf32> to vector<8x32xf32>
    %239 = arith.mulf %234, %238 : vector<8x32xf32>
    %240 = vector.broadcast %220 : vector<1x32xf32> to vector<8x32xf32>
    %241 = arith.mulf %239, %240 : vector<8x32xf32>
    %242 = vector.broadcast %221 : vector<1x32xf32> to vector<8x32xf32>
    %243 = arith.addf %241, %242 : vector<8x32xf32>
    %c0_84 = arith.constant 0 : index
    %c0_85 = arith.constant 0 : index
    %c0_86 = arith.constant 0 : index
    %244 = vector.load %arg4[%c0_84, %c0_85, %c0_86] : memref<2x32x64xf32, #tpu.memory_space<vmem>>, vector<1x32x64xf32>
    %245 = vector.shape_cast %244 : vector<1x32x64xf32> to vector<32x64xf32>
    %cst_87 = arith.constant dense<0.000000e+00> : vector<8x64xf32>
    %246 = tpu.matmul %243, %245, %cst_87 {dimension_numbers = #tpu.dot_dimension_numbers<[1], [0], [0], [1], [0, 0, 1, 1], [], []>} : vector<8x32xf32>, vector<32x64xf32>, vector<8x64xf32> -> vector<8x64xf32>
    %c0_88 = arith.constant 0 : index
    %c0_89 = arith.constant 0 : index
    %c0_90 = arith.constant 0 : index
    %247 = vector.load %arg5[%c0_88, %c0_89, %c0_90] : memref<2x1x64xf32, #tpu.memory_space<vmem>>, vector<1x1x64xf32>
    %248 = vector.shape_cast %247 : vector<1x1x64xf32> to vector<1x64xf32>
    %249 = vector.broadcast %248 : vector<1x64xf32> to vector<8x64xf32>
    %250 = arith.addf %246, %249 : vector<8x64xf32>
    %cst_91 = arith.constant 0.000000e+00 : f32
    %251 = vector.broadcast %cst_91 : f32 to vector<8x64xf32>
    %252 = arith.maximumf %250, %251 : vector<8x64xf32>
    %c0_92 = arith.constant 0 : index
    %c0_93 = arith.constant 0 : index
    %c0_94 = arith.constant 0 : index
    %253 = vector.load %arg6[%c0_92, %c0_93, %c0_94] : memref<2x64x32xf32, #tpu.memory_space<vmem>>, vector<1x64x32xf32>
    %254 = vector.shape_cast %253 : vector<1x64x32xf32> to vector<64x32xf32>
    %cst_95 = arith.constant dense<0.000000e+00> : vector<8x32xf32>
    %255 = tpu.matmul %252, %254, %cst_95 {dimension_numbers = #tpu.dot_dimension_numbers<[1], [0], [0], [1], [0, 0, 1, 1], [], []>} : vector<8x64xf32>, vector<64x32xf32>, vector<8x32xf32> -> vector<8x32xf32>
    %256 = vector.extract_strided_slice %5 {offsets = [14, 0], sizes = [1, 32], strides = [1, 1]} : vector<15x32xf32> to vector<1x32xf32>
    %257 = vector.broadcast %256 : vector<1x32xf32> to vector<8x32xf32>
    %258 = arith.addf %255, %257 : vector<8x32xf32>
    %259 = arith.addf %243, %258 : vector<8x32xf32>
    %260 = vector.extract_strided_slice %5 {offsets = [12, 0], sizes = [1, 32], strides = [1, 1]} : vector<15x32xf32> to vector<1x32xf32>
    %261 = vector.extract_strided_slice %5 {offsets = [13, 0], sizes = [1, 32], strides = [1, 1]} : vector<15x32xf32> to vector<1x32xf32>
    %cst_96 = arith.constant dense<0.000000e+00> : vector<8xf32>
    %262 = vector.multi_reduction <add>, %259, %cst_96 [1] : vector<8x32xf32> to vector<8xf32>
    %263 = vector.shape_cast %262 : vector<8xf32> to vector<8x1xf32>
    %cst_97 = arith.constant 3.200000e+01 : f32
    %264 = vector.broadcast %cst_97 : f32 to vector<8x1xf32>
    %265 = arith.divf %263, %264 : vector<8x1xf32>
    %266 = vector.broadcast %265 : vector<8x1xf32> to vector<8x32xf32>
    %267 = arith.subf %259, %266 : vector<8x32xf32>
    %268 = arith.mulf %267, %267 : vector<8x32xf32>
    %cst_98 = arith.constant dense<0.000000e+00> : vector<8xf32>
    %269 = vector.multi_reduction <add>, %268, %cst_98 [1] : vector<8x32xf32> to vector<8xf32>
    %270 = vector.shape_cast %269 : vector<8xf32> to vector<8x1xf32>
    %cst_99 = arith.constant 3.200000e+01 : f32
    %271 = vector.broadcast %cst_99 : f32 to vector<8x1xf32>
    %272 = arith.divf %270, %271 : vector<8x1xf32>
    %273 = vector.broadcast %265 : vector<8x1xf32> to vector<8x32xf32>
    %274 = arith.subf %259, %273 : vector<8x32xf32>
    %cst_100 = arith.constant 9.99999974E-6 : f32
    %275 = vector.broadcast %cst_100 : f32 to vector<8x1xf32>
    %276 = arith.addf %272, %275 : vector<8x1xf32>
    %277 = math.rsqrt %276 : vector<8x1xf32>
    %278 = vector.broadcast %277 : vector<8x1xf32> to vector<8x32xf32>
    %279 = arith.mulf %274, %278 : vector<8x32xf32>
    %280 = vector.broadcast %260 : vector<1x32xf32> to vector<8x32xf32>
    %281 = arith.mulf %279, %280 : vector<8x32xf32>
    %282 = vector.broadcast %261 : vector<1x32xf32> to vector<8x32xf32>
    %283 = arith.addf %281, %282 : vector<8x32xf32>
    %c1_101 = arith.constant 1 : index
    %c0_102 = arith.constant 0 : index
    %c0_103 = arith.constant 0 : index
    %284 = vector.load %arg7[%c1_101, %c0_102, %c0_103] : memref<2x15x32xf32, #tpu.memory_space<vmem>>, vector<1x15x32xf32>
    %285 = vector.shape_cast %284 : vector<1x15x32xf32> to vector<15x32xf32>
    %c8 = arith.constant 8 : index
    %c0_104 = arith.constant 0 : index
    %c0_105 = arith.constant 0 : index
    %286 = vector.load %arg3[%c8, %c0_104, %c0_105] : memref<16x32x32xf32, #tpu.memory_space<vmem>>, vector<1x32x32xf32>
    %287 = vector.shape_cast %286 : vector<1x32x32xf32> to vector<32x32xf32>
    %c9 = arith.constant 9 : index
    %c0_106 = arith.constant 0 : index
    %c0_107 = arith.constant 0 : index
    %288 = vector.load %arg3[%c9, %c0_106, %c0_107] : memref<16x32x32xf32, #tpu.memory_space<vmem>>, vector<1x32x32xf32>
    %289 = vector.shape_cast %288 : vector<1x32x32xf32> to vector<32x32xf32>
    %c10 = arith.constant 10 : index
    %c0_108 = arith.constant 0 : index
    %c0_109 = arith.constant 0 : index
    %290 = vector.load %arg3[%c10, %c0_108, %c0_109] : memref<16x32x32xf32, #tpu.memory_space<vmem>>, vector<1x32x32xf32>
    %291 = vector.shape_cast %290 : vector<1x32x32xf32> to vector<32x32xf32>
    %c11 = arith.constant 11 : index
    %c0_110 = arith.constant 0 : index
    %c0_111 = arith.constant 0 : index
    %292 = vector.load %arg3[%c11, %c0_110, %c0_111] : memref<16x32x32xf32, #tpu.memory_space<vmem>>, vector<1x32x32xf32>
    %293 = vector.shape_cast %292 : vector<1x32x32xf32> to vector<32x32xf32>
    %294 = vector.extract_strided_slice %285 {offsets = [0, 0], sizes = [1, 32], strides = [1, 1]} : vector<15x32xf32> to vector<1x32xf32>
    %295 = vector.extract_strided_slice %285 {offsets = [1, 0], sizes = [1, 32], strides = [1, 1]} : vector<15x32xf32> to vector<1x32xf32>
    %296 = vector.extract_strided_slice %285 {offsets = [2, 0], sizes = [1, 32], strides = [1, 1]} : vector<15x32xf32> to vector<1x32xf32>
    %297 = vector.extract_strided_slice %285 {offsets = [3, 0], sizes = [1, 32], strides = [1, 1]} : vector<15x32xf32> to vector<1x32xf32>
    %cst_112 = arith.constant dense<0.000000e+00> : vector<8x32xf32>
    %298 = tpu.matmul %283, %287, %cst_112 {dimension_numbers = #tpu.dot_dimension_numbers<[1], [0], [0], [1], [0, 0, 1, 1], [], []>} : vector<8x32xf32>, vector<32x32xf32>, vector<8x32xf32> -> vector<8x32xf32>
    %299 = vector.broadcast %294 : vector<1x32xf32> to vector<8x32xf32>
    %300 = arith.addf %298, %299 : vector<8x32xf32>
    %cst_113 = arith.constant 0.353553385 : f32
    %301 = vector.broadcast %cst_113 : f32 to vector<8x32xf32>
    %302 = arith.mulf %300, %301 : vector<8x32xf32>
    %cst_114 = arith.constant dense<0.000000e+00> : vector<8x32xf32>
    %303 = tpu.matmul %283, %289, %cst_114 {dimension_numbers = #tpu.dot_dimension_numbers<[1], [0], [0], [1], [0, 0, 1, 1], [], []>} : vector<8x32xf32>, vector<32x32xf32>, vector<8x32xf32> -> vector<8x32xf32>
    %304 = vector.broadcast %295 : vector<1x32xf32> to vector<8x32xf32>
    %305 = arith.addf %303, %304 : vector<8x32xf32>
    %cst_115 = arith.constant dense<0.000000e+00> : vector<8x32xf32>
    %306 = tpu.matmul %283, %291, %cst_115 {dimension_numbers = #tpu.dot_dimension_numbers<[1], [0], [0], [1], [0, 0, 1, 1], [], []>} : vector<8x32xf32>, vector<32x32xf32>, vector<8x32xf32> -> vector<8x32xf32>
    %307 = vector.broadcast %296 : vector<1x32xf32> to vector<8x32xf32>
    %308 = arith.addf %306, %307 : vector<8x32xf32>
    %cst_116 = arith.constant 0.000000e+00 : f32
    %309 = vector.broadcast %cst_116 : f32 to vector<8x32xf32>
    %310 = vector.extract_strided_slice %302 {offsets = [0, 0], sizes = [8, 8], strides = [1, 1]} : vector<8x32xf32> to vector<8x8xf32>
    %311 = vector.extract_strided_slice %305 {offsets = [0, 0], sizes = [8, 8], strides = [1, 1]} : vector<8x32xf32> to vector<8x8xf32>
    %cst_117 = arith.constant dense<0.000000e+00> : vector<8x8xf32>
    %312 = tpu.matmul %310, %311, %cst_117 {dimension_numbers = #tpu.dot_dimension_numbers<[1], [1], [0], [0], [0, 0, 1, 0], [], []>} : vector<8x8xf32>, vector<8x8xf32>, vector<8x8xf32> -> vector<8x8xf32>
    %cst_118 = arith.constant dense<0xFF800000> : vector<8xf32>
    %313 = vector.multi_reduction <maximumf>, %312, %cst_118 [1] : vector<8x8xf32> to vector<8xf32>
    %314 = vector.shape_cast %313 : vector<8xf32> to vector<8x1xf32>
    %315 = vector.broadcast %314 : vector<8x1xf32> to vector<8x8xf32>
    %316 = arith.subf %312, %315 : vector<8x8xf32>
    %317 = math.exp %316 : vector<8x8xf32>
    %cst_119 = arith.constant dense<0.000000e+00> : vector<8xf32>
    %318 = vector.multi_reduction <add>, %317, %cst_119 [1] : vector<8x8xf32> to vector<8xf32>
    %319 = vector.shape_cast %318 : vector<8xf32> to vector<8x1xf32>
    %320 = vector.broadcast %319 : vector<8x1xf32> to vector<8x8xf32>
    %321 = arith.divf %317, %320 : vector<8x8xf32>
    %322 = vector.extract_strided_slice %308 {offsets = [0, 0], sizes = [8, 8], strides = [1, 1]} : vector<8x32xf32> to vector<8x8xf32>
    %cst_120 = arith.constant dense<0.000000e+00> : vector<8x8xf32>
    %323 = tpu.matmul %321, %322, %cst_120 {dimension_numbers = #tpu.dot_dimension_numbers<[1], [0], [0], [1], [0, 0, 1, 1], [], []>} : vector<8x8xf32>, vector<8x8xf32>, vector<8x8xf32> -> vector<8x8xf32>
    %324 = vector.extract_strided_slice %293 {offsets = [0, 0], sizes = [8, 32], strides = [1, 1]} : vector<32x32xf32> to vector<8x32xf32>
    %cst_121 = arith.constant dense<0.000000e+00> : vector<8x32xf32>
    %325 = tpu.matmul %323, %324, %cst_121 {dimension_numbers = #tpu.dot_dimension_numbers<[1], [0], [0], [1], [0, 0, 1, 1], [], []>} : vector<8x8xf32>, vector<8x32xf32>, vector<8x32xf32> -> vector<8x32xf32>
    %326 = arith.addf %309, %325 : vector<8x32xf32>
    %327 = vector.extract_strided_slice %302 {offsets = [0, 8], sizes = [8, 8], strides = [1, 1]} : vector<8x32xf32> to vector<8x8xf32>
    %328 = vector.extract_strided_slice %305 {offsets = [0, 8], sizes = [8, 8], strides = [1, 1]} : vector<8x32xf32> to vector<8x8xf32>
    %cst_122 = arith.constant dense<0.000000e+00> : vector<8x8xf32>
    %329 = tpu.matmul %327, %328, %cst_122 {dimension_numbers = #tpu.dot_dimension_numbers<[1], [1], [0], [0], [0, 0, 1, 0], [], []>} : vector<8x8xf32>, vector<8x8xf32>, vector<8x8xf32> -> vector<8x8xf32>
    %cst_123 = arith.constant dense<0xFF800000> : vector<8xf32>
    %330 = vector.multi_reduction <maximumf>, %329, %cst_123 [1] : vector<8x8xf32> to vector<8xf32>
    %331 = vector.shape_cast %330 : vector<8xf32> to vector<8x1xf32>
    %332 = vector.broadcast %331 : vector<8x1xf32> to vector<8x8xf32>
    %333 = arith.subf %329, %332 : vector<8x8xf32>
    %334 = math.exp %333 : vector<8x8xf32>
    %cst_124 = arith.constant dense<0.000000e+00> : vector<8xf32>
    %335 = vector.multi_reduction <add>, %334, %cst_124 [1] : vector<8x8xf32> to vector<8xf32>
    %336 = vector.shape_cast %335 : vector<8xf32> to vector<8x1xf32>
    %337 = vector.broadcast %336 : vector<8x1xf32> to vector<8x8xf32>
    %338 = arith.divf %334, %337 : vector<8x8xf32>
    %339 = vector.extract_strided_slice %308 {offsets = [0, 8], sizes = [8, 8], strides = [1, 1]} : vector<8x32xf32> to vector<8x8xf32>
    %cst_125 = arith.constant dense<0.000000e+00> : vector<8x8xf32>
    %340 = tpu.matmul %338, %339, %cst_125 {dimension_numbers = #tpu.dot_dimension_numbers<[1], [0], [0], [1], [0, 0, 1, 1], [], []>} : vector<8x8xf32>, vector<8x8xf32>, vector<8x8xf32> -> vector<8x8xf32>
    %341 = vector.extract_strided_slice %293 {offsets = [8, 0], sizes = [8, 32], strides = [1, 1]} : vector<32x32xf32> to vector<8x32xf32>
    %cst_126 = arith.constant dense<0.000000e+00> : vector<8x32xf32>
    %342 = tpu.matmul %340, %341, %cst_126 {dimension_numbers = #tpu.dot_dimension_numbers<[1], [0], [0], [1], [0, 0, 1, 1], [], []>} : vector<8x8xf32>, vector<8x32xf32>, vector<8x32xf32> -> vector<8x32xf32>
    %343 = arith.addf %326, %342 : vector<8x32xf32>
    %344 = vector.extract_strided_slice %302 {offsets = [0, 16], sizes = [8, 8], strides = [1, 1]} : vector<8x32xf32> to vector<8x8xf32>
    %345 = vector.extract_strided_slice %305 {offsets = [0, 16], sizes = [8, 8], strides = [1, 1]} : vector<8x32xf32> to vector<8x8xf32>
    %cst_127 = arith.constant dense<0.000000e+00> : vector<8x8xf32>
    %346 = tpu.matmul %344, %345, %cst_127 {dimension_numbers = #tpu.dot_dimension_numbers<[1], [1], [0], [0], [0, 0, 1, 0], [], []>} : vector<8x8xf32>, vector<8x8xf32>, vector<8x8xf32> -> vector<8x8xf32>
    %cst_128 = arith.constant dense<0xFF800000> : vector<8xf32>
    %347 = vector.multi_reduction <maximumf>, %346, %cst_128 [1] : vector<8x8xf32> to vector<8xf32>
    %348 = vector.shape_cast %347 : vector<8xf32> to vector<8x1xf32>
    %349 = vector.broadcast %348 : vector<8x1xf32> to vector<8x8xf32>
    %350 = arith.subf %346, %349 : vector<8x8xf32>
    %351 = math.exp %350 : vector<8x8xf32>
    %cst_129 = arith.constant dense<0.000000e+00> : vector<8xf32>
    %352 = vector.multi_reduction <add>, %351, %cst_129 [1] : vector<8x8xf32> to vector<8xf32>
    %353 = vector.shape_cast %352 : vector<8xf32> to vector<8x1xf32>
    %354 = vector.broadcast %353 : vector<8x1xf32> to vector<8x8xf32>
    %355 = arith.divf %351, %354 : vector<8x8xf32>
    %356 = vector.extract_strided_slice %308 {offsets = [0, 16], sizes = [8, 8], strides = [1, 1]} : vector<8x32xf32> to vector<8x8xf32>
    %cst_130 = arith.constant dense<0.000000e+00> : vector<8x8xf32>
    %357 = tpu.matmul %355, %356, %cst_130 {dimension_numbers = #tpu.dot_dimension_numbers<[1], [0], [0], [1], [0, 0, 1, 1], [], []>} : vector<8x8xf32>, vector<8x8xf32>, vector<8x8xf32> -> vector<8x8xf32>
    %358 = vector.extract_strided_slice %293 {offsets = [16, 0], sizes = [8, 32], strides = [1, 1]} : vector<32x32xf32> to vector<8x32xf32>
    %cst_131 = arith.constant dense<0.000000e+00> : vector<8x32xf32>
    %359 = tpu.matmul %357, %358, %cst_131 {dimension_numbers = #tpu.dot_dimension_numbers<[1], [0], [0], [1], [0, 0, 1, 1], [], []>} : vector<8x8xf32>, vector<8x32xf32>, vector<8x32xf32> -> vector<8x32xf32>
    %360 = arith.addf %343, %359 : vector<8x32xf32>
    %361 = vector.extract_strided_slice %302 {offsets = [0, 24], sizes = [8, 8], strides = [1, 1]} : vector<8x32xf32> to vector<8x8xf32>
    %362 = vector.extract_strided_slice %305 {offsets = [0, 24], sizes = [8, 8], strides = [1, 1]} : vector<8x32xf32> to vector<8x8xf32>
    %cst_132 = arith.constant dense<0.000000e+00> : vector<8x8xf32>
    %363 = tpu.matmul %361, %362, %cst_132 {dimension_numbers = #tpu.dot_dimension_numbers<[1], [1], [0], [0], [0, 0, 1, 0], [], []>} : vector<8x8xf32>, vector<8x8xf32>, vector<8x8xf32> -> vector<8x8xf32>
    %cst_133 = arith.constant dense<0xFF800000> : vector<8xf32>
    %364 = vector.multi_reduction <maximumf>, %363, %cst_133 [1] : vector<8x8xf32> to vector<8xf32>
    %365 = vector.shape_cast %364 : vector<8xf32> to vector<8x1xf32>
    %366 = vector.broadcast %365 : vector<8x1xf32> to vector<8x8xf32>
    %367 = arith.subf %363, %366 : vector<8x8xf32>
    %368 = math.exp %367 : vector<8x8xf32>
    %cst_134 = arith.constant dense<0.000000e+00> : vector<8xf32>
    %369 = vector.multi_reduction <add>, %368, %cst_134 [1] : vector<8x8xf32> to vector<8xf32>
    %370 = vector.shape_cast %369 : vector<8xf32> to vector<8x1xf32>
    %371 = vector.broadcast %370 : vector<8x1xf32> to vector<8x8xf32>
    %372 = arith.divf %368, %371 : vector<8x8xf32>
    %373 = vector.extract_strided_slice %308 {offsets = [0, 24], sizes = [8, 8], strides = [1, 1]} : vector<8x32xf32> to vector<8x8xf32>
    %cst_135 = arith.constant dense<0.000000e+00> : vector<8x8xf32>
    %374 = tpu.matmul %372, %373, %cst_135 {dimension_numbers = #tpu.dot_dimension_numbers<[1], [0], [0], [1], [0, 0, 1, 1], [], []>} : vector<8x8xf32>, vector<8x8xf32>, vector<8x8xf32> -> vector<8x8xf32>
    %375 = vector.extract_strided_slice %293 {offsets = [24, 0], sizes = [8, 32], strides = [1, 1]} : vector<32x32xf32> to vector<8x32xf32>
    %cst_136 = arith.constant dense<0.000000e+00> : vector<8x32xf32>
    %376 = tpu.matmul %374, %375, %cst_136 {dimension_numbers = #tpu.dot_dimension_numbers<[1], [0], [0], [1], [0, 0, 1, 1], [], []>} : vector<8x8xf32>, vector<8x32xf32>, vector<8x32xf32> -> vector<8x32xf32>
    %377 = arith.addf %360, %376 : vector<8x32xf32>
    %378 = vector.broadcast %297 : vector<1x32xf32> to vector<8x32xf32>
    %379 = arith.addf %377, %378 : vector<8x32xf32>
    %380 = arith.addf %283, %379 : vector<8x32xf32>
    %381 = vector.extract_strided_slice %285 {offsets = [8, 0], sizes = [1, 32], strides = [1, 1]} : vector<15x32xf32> to vector<1x32xf32>
    %382 = vector.extract_strided_slice %285 {offsets = [9, 0], sizes = [1, 32], strides = [1, 1]} : vector<15x32xf32> to vector<1x32xf32>
    %cst_137 = arith.constant dense<0.000000e+00> : vector<8xf32>
    %383 = vector.multi_reduction <add>, %380, %cst_137 [1] : vector<8x32xf32> to vector<8xf32>
    %384 = vector.shape_cast %383 : vector<8xf32> to vector<8x1xf32>
    %cst_138 = arith.constant 3.200000e+01 : f32
    %385 = vector.broadcast %cst_138 : f32 to vector<8x1xf32>
    %386 = arith.divf %384, %385 : vector<8x1xf32>
    %387 = vector.broadcast %386 : vector<8x1xf32> to vector<8x32xf32>
    %388 = arith.subf %380, %387 : vector<8x32xf32>
    %389 = arith.mulf %388, %388 : vector<8x32xf32>
    %cst_139 = arith.constant dense<0.000000e+00> : vector<8xf32>
    %390 = vector.multi_reduction <add>, %389, %cst_139 [1] : vector<8x32xf32> to vector<8xf32>
    %391 = vector.shape_cast %390 : vector<8xf32> to vector<8x1xf32>
    %cst_140 = arith.constant 3.200000e+01 : f32
    %392 = vector.broadcast %cst_140 : f32 to vector<8x1xf32>
    %393 = arith.divf %391, %392 : vector<8x1xf32>
    %394 = vector.broadcast %386 : vector<8x1xf32> to vector<8x32xf32>
    %395 = arith.subf %380, %394 : vector<8x32xf32>
    %cst_141 = arith.constant 9.99999974E-6 : f32
    %396 = vector.broadcast %cst_141 : f32 to vector<8x1xf32>
    %397 = arith.addf %393, %396 : vector<8x1xf32>
    %398 = math.rsqrt %397 : vector<8x1xf32>
    %399 = vector.broadcast %398 : vector<8x1xf32> to vector<8x32xf32>
    %400 = arith.mulf %395, %399 : vector<8x32xf32>
    %401 = vector.broadcast %381 : vector<1x32xf32> to vector<8x32xf32>
    %402 = arith.mulf %400, %401 : vector<8x32xf32>
    %403 = vector.broadcast %382 : vector<1x32xf32> to vector<8x32xf32>
    %404 = arith.addf %402, %403 : vector<8x32xf32>
    %c12 = arith.constant 12 : index
    %c0_142 = arith.constant 0 : index
    %c0_143 = arith.constant 0 : index
    %405 = vector.load %arg3[%c12, %c0_142, %c0_143] : memref<16x32x32xf32, #tpu.memory_space<vmem>>, vector<1x32x32xf32>
    %406 = vector.shape_cast %405 : vector<1x32x32xf32> to vector<32x32xf32>
    %c13 = arith.constant 13 : index
    %c0_144 = arith.constant 0 : index
    %c0_145 = arith.constant 0 : index
    %407 = vector.load %arg3[%c13, %c0_144, %c0_145] : memref<16x32x32xf32, #tpu.memory_space<vmem>>, vector<1x32x32xf32>
    %408 = vector.shape_cast %407 : vector<1x32x32xf32> to vector<32x32xf32>
    %c14 = arith.constant 14 : index
    %c0_146 = arith.constant 0 : index
    %c0_147 = arith.constant 0 : index
    %409 = vector.load %arg3[%c14, %c0_146, %c0_147] : memref<16x32x32xf32, #tpu.memory_space<vmem>>, vector<1x32x32xf32>
    %410 = vector.shape_cast %409 : vector<1x32x32xf32> to vector<32x32xf32>
    %c15 = arith.constant 15 : index
    %c0_148 = arith.constant 0 : index
    %c0_149 = arith.constant 0 : index
    %411 = vector.load %arg3[%c15, %c0_148, %c0_149] : memref<16x32x32xf32, #tpu.memory_space<vmem>>, vector<1x32x32xf32>
    %412 = vector.shape_cast %411 : vector<1x32x32xf32> to vector<32x32xf32>
    %413 = vector.extract_strided_slice %285 {offsets = [4, 0], sizes = [1, 32], strides = [1, 1]} : vector<15x32xf32> to vector<1x32xf32>
    %414 = vector.extract_strided_slice %285 {offsets = [5, 0], sizes = [1, 32], strides = [1, 1]} : vector<15x32xf32> to vector<1x32xf32>
    %415 = vector.extract_strided_slice %285 {offsets = [6, 0], sizes = [1, 32], strides = [1, 1]} : vector<15x32xf32> to vector<1x32xf32>
    %416 = vector.extract_strided_slice %285 {offsets = [7, 0], sizes = [1, 32], strides = [1, 1]} : vector<15x32xf32> to vector<1x32xf32>
    %cst_150 = arith.constant dense<0.000000e+00> : vector<8x32xf32>
    %417 = tpu.matmul %404, %406, %cst_150 {dimension_numbers = #tpu.dot_dimension_numbers<[1], [0], [0], [1], [0, 0, 1, 1], [], []>} : vector<8x32xf32>, vector<32x32xf32>, vector<8x32xf32> -> vector<8x32xf32>
    %418 = vector.broadcast %413 : vector<1x32xf32> to vector<8x32xf32>
    %419 = arith.addf %417, %418 : vector<8x32xf32>
    %cst_151 = arith.constant 0.353553385 : f32
    %420 = vector.broadcast %cst_151 : f32 to vector<8x32xf32>
    %421 = arith.mulf %419, %420 : vector<8x32xf32>
    %cst_152 = arith.constant dense<0.000000e+00> : vector<8x32xf32>
    %422 = tpu.matmul %3, %408, %cst_152 {dimension_numbers = #tpu.dot_dimension_numbers<[1], [0], [0], [1], [0, 0, 1, 1], [], []>} : vector<8x32xf32>, vector<32x32xf32>, vector<8x32xf32> -> vector<8x32xf32>
    %423 = vector.broadcast %414 : vector<1x32xf32> to vector<8x32xf32>
    %424 = arith.addf %422, %423 : vector<8x32xf32>
    %cst_153 = arith.constant dense<0.000000e+00> : vector<8x32xf32>
    %425 = tpu.matmul %3, %410, %cst_153 {dimension_numbers = #tpu.dot_dimension_numbers<[1], [0], [0], [1], [0, 0, 1, 1], [], []>} : vector<8x32xf32>, vector<32x32xf32>, vector<8x32xf32> -> vector<8x32xf32>
    %426 = vector.broadcast %415 : vector<1x32xf32> to vector<8x32xf32>
    %427 = arith.addf %425, %426 : vector<8x32xf32>
    %cst_154 = arith.constant 0.000000e+00 : f32
    %428 = vector.broadcast %cst_154 : f32 to vector<8x32xf32>
    %429 = vector.extract_strided_slice %421 {offsets = [0, 0], sizes = [8, 8], strides = [1, 1]} : vector<8x32xf32> to vector<8x8xf32>
    %430 = vector.extract_strided_slice %424 {offsets = [0, 0], sizes = [8, 8], strides = [1, 1]} : vector<8x32xf32> to vector<8x8xf32>
    %cst_155 = arith.constant dense<0.000000e+00> : vector<8x8xf32>
    %431 = tpu.matmul %429, %430, %cst_155 {dimension_numbers = #tpu.dot_dimension_numbers<[1], [1], [0], [0], [0, 0, 1, 0], [], []>} : vector<8x8xf32>, vector<8x8xf32>, vector<8x8xf32> -> vector<8x8xf32>
    %cst_156 = arith.constant dense<0xFF800000> : vector<8xf32>
    %432 = vector.multi_reduction <maximumf>, %431, %cst_156 [1] : vector<8x8xf32> to vector<8xf32>
    %433 = vector.shape_cast %432 : vector<8xf32> to vector<8x1xf32>
    %434 = vector.broadcast %433 : vector<8x1xf32> to vector<8x8xf32>
    %435 = arith.subf %431, %434 : vector<8x8xf32>
    %436 = math.exp %435 : vector<8x8xf32>
    %cst_157 = arith.constant dense<0.000000e+00> : vector<8xf32>
    %437 = vector.multi_reduction <add>, %436, %cst_157 [1] : vector<8x8xf32> to vector<8xf32>
    %438 = vector.shape_cast %437 : vector<8xf32> to vector<8x1xf32>
    %439 = vector.broadcast %438 : vector<8x1xf32> to vector<8x8xf32>
    %440 = arith.divf %436, %439 : vector<8x8xf32>
    %441 = vector.extract_strided_slice %427 {offsets = [0, 0], sizes = [8, 8], strides = [1, 1]} : vector<8x32xf32> to vector<8x8xf32>
    %cst_158 = arith.constant dense<0.000000e+00> : vector<8x8xf32>
    %442 = tpu.matmul %440, %441, %cst_158 {dimension_numbers = #tpu.dot_dimension_numbers<[1], [0], [0], [1], [0, 0, 1, 1], [], []>} : vector<8x8xf32>, vector<8x8xf32>, vector<8x8xf32> -> vector<8x8xf32>
    %443 = vector.extract_strided_slice %412 {offsets = [0, 0], sizes = [8, 32], strides = [1, 1]} : vector<32x32xf32> to vector<8x32xf32>
    %cst_159 = arith.constant dense<0.000000e+00> : vector<8x32xf32>
    %444 = tpu.matmul %442, %443, %cst_159 {dimension_numbers = #tpu.dot_dimension_numbers<[1], [0], [0], [1], [0, 0, 1, 1], [], []>} : vector<8x8xf32>, vector<8x32xf32>, vector<8x32xf32> -> vector<8x32xf32>
    %445 = arith.addf %428, %444 : vector<8x32xf32>
    %446 = vector.extract_strided_slice %421 {offsets = [0, 8], sizes = [8, 8], strides = [1, 1]} : vector<8x32xf32> to vector<8x8xf32>
    %447 = vector.extract_strided_slice %424 {offsets = [0, 8], sizes = [8, 8], strides = [1, 1]} : vector<8x32xf32> to vector<8x8xf32>
    %cst_160 = arith.constant dense<0.000000e+00> : vector<8x8xf32>
    %448 = tpu.matmul %446, %447, %cst_160 {dimension_numbers = #tpu.dot_dimension_numbers<[1], [1], [0], [0], [0, 0, 1, 0], [], []>} : vector<8x8xf32>, vector<8x8xf32>, vector<8x8xf32> -> vector<8x8xf32>
    %cst_161 = arith.constant dense<0xFF800000> : vector<8xf32>
    %449 = vector.multi_reduction <maximumf>, %448, %cst_161 [1] : vector<8x8xf32> to vector<8xf32>
    %450 = vector.shape_cast %449 : vector<8xf32> to vector<8x1xf32>
    %451 = vector.broadcast %450 : vector<8x1xf32> to vector<8x8xf32>
    %452 = arith.subf %448, %451 : vector<8x8xf32>
    %453 = math.exp %452 : vector<8x8xf32>
    %cst_162 = arith.constant dense<0.000000e+00> : vector<8xf32>
    %454 = vector.multi_reduction <add>, %453, %cst_162 [1] : vector<8x8xf32> to vector<8xf32>
    %455 = vector.shape_cast %454 : vector<8xf32> to vector<8x1xf32>
    %456 = vector.broadcast %455 : vector<8x1xf32> to vector<8x8xf32>
    %457 = arith.divf %453, %456 : vector<8x8xf32>
    %458 = vector.extract_strided_slice %427 {offsets = [0, 8], sizes = [8, 8], strides = [1, 1]} : vector<8x32xf32> to vector<8x8xf32>
    %cst_163 = arith.constant dense<0.000000e+00> : vector<8x8xf32>
    %459 = tpu.matmul %457, %458, %cst_163 {dimension_numbers = #tpu.dot_dimension_numbers<[1], [0], [0], [1], [0, 0, 1, 1], [], []>} : vector<8x8xf32>, vector<8x8xf32>, vector<8x8xf32> -> vector<8x8xf32>
    %460 = vector.extract_strided_slice %412 {offsets = [8, 0], sizes = [8, 32], strides = [1, 1]} : vector<32x32xf32> to vector<8x32xf32>
    %cst_164 = arith.constant dense<0.000000e+00> : vector<8x32xf32>
    %461 = tpu.matmul %459, %460, %cst_164 {dimension_numbers = #tpu.dot_dimension_numbers<[1], [0], [0], [1], [0, 0, 1, 1], [], []>} : vector<8x8xf32>, vector<8x32xf32>, vector<8x32xf32> -> vector<8x32xf32>
    %462 = arith.addf %445, %461 : vector<8x32xf32>
    %463 = vector.extract_strided_slice %421 {offsets = [0, 16], sizes = [8, 8], strides = [1, 1]} : vector<8x32xf32> to vector<8x8xf32>
    %464 = vector.extract_strided_slice %424 {offsets = [0, 16], sizes = [8, 8], strides = [1, 1]} : vector<8x32xf32> to vector<8x8xf32>
    %cst_165 = arith.constant dense<0.000000e+00> : vector<8x8xf32>
    %465 = tpu.matmul %463, %464, %cst_165 {dimension_numbers = #tpu.dot_dimension_numbers<[1], [1], [0], [0], [0, 0, 1, 0], [], []>} : vector<8x8xf32>, vector<8x8xf32>, vector<8x8xf32> -> vector<8x8xf32>
    %cst_166 = arith.constant dense<0xFF800000> : vector<8xf32>
    %466 = vector.multi_reduction <maximumf>, %465, %cst_166 [1] : vector<8x8xf32> to vector<8xf32>
    %467 = vector.shape_cast %466 : vector<8xf32> to vector<8x1xf32>
    %468 = vector.broadcast %467 : vector<8x1xf32> to vector<8x8xf32>
    %469 = arith.subf %465, %468 : vector<8x8xf32>
    %470 = math.exp %469 : vector<8x8xf32>
    %cst_167 = arith.constant dense<0.000000e+00> : vector<8xf32>
    %471 = vector.multi_reduction <add>, %470, %cst_167 [1] : vector<8x8xf32> to vector<8xf32>
    %472 = vector.shape_cast %471 : vector<8xf32> to vector<8x1xf32>
    %473 = vector.broadcast %472 : vector<8x1xf32> to vector<8x8xf32>
    %474 = arith.divf %470, %473 : vector<8x8xf32>
    %475 = vector.extract_strided_slice %427 {offsets = [0, 16], sizes = [8, 8], strides = [1, 1]} : vector<8x32xf32> to vector<8x8xf32>
    %cst_168 = arith.constant dense<0.000000e+00> : vector<8x8xf32>
    %476 = tpu.matmul %474, %475, %cst_168 {dimension_numbers = #tpu.dot_dimension_numbers<[1], [0], [0], [1], [0, 0, 1, 1], [], []>} : vector<8x8xf32>, vector<8x8xf32>, vector<8x8xf32> -> vector<8x8xf32>
    %477 = vector.extract_strided_slice %412 {offsets = [16, 0], sizes = [8, 32], strides = [1, 1]} : vector<32x32xf32> to vector<8x32xf32>
    %cst_169 = arith.constant dense<0.000000e+00> : vector<8x32xf32>
    %478 = tpu.matmul %476, %477, %cst_169 {dimension_numbers = #tpu.dot_dimension_numbers<[1], [0], [0], [1], [0, 0, 1, 1], [], []>} : vector<8x8xf32>, vector<8x32xf32>, vector<8x32xf32> -> vector<8x32xf32>
    %479 = arith.addf %462, %478 : vector<8x32xf32>
    %480 = vector.extract_strided_slice %421 {offsets = [0, 24], sizes = [8, 8], strides = [1, 1]} : vector<8x32xf32> to vector<8x8xf32>
    %481 = vector.extract_strided_slice %424 {offsets = [0, 24], sizes = [8, 8], strides = [1, 1]} : vector<8x32xf32> to vector<8x8xf32>
    %cst_170 = arith.constant dense<0.000000e+00> : vector<8x8xf32>
    %482 = tpu.matmul %480, %481, %cst_170 {dimension_numbers = #tpu.dot_dimension_numbers<[1], [1], [0], [0], [0, 0, 1, 0], [], []>} : vector<8x8xf32>, vector<8x8xf32>, vector<8x8xf32> -> vector<8x8xf32>
    %cst_171 = arith.constant dense<0xFF800000> : vector<8xf32>
    %483 = vector.multi_reduction <maximumf>, %482, %cst_171 [1] : vector<8x8xf32> to vector<8xf32>
    %484 = vector.shape_cast %483 : vector<8xf32> to vector<8x1xf32>
    %485 = vector.broadcast %484 : vector<8x1xf32> to vector<8x8xf32>
    %486 = arith.subf %482, %485 : vector<8x8xf32>
    %487 = math.exp %486 : vector<8x8xf32>
    %cst_172 = arith.constant dense<0.000000e+00> : vector<8xf32>
    %488 = vector.multi_reduction <add>, %487, %cst_172 [1] : vector<8x8xf32> to vector<8xf32>
    %489 = vector.shape_cast %488 : vector<8xf32> to vector<8x1xf32>
    %490 = vector.broadcast %489 : vector<8x1xf32> to vector<8x8xf32>
    %491 = arith.divf %487, %490 : vector<8x8xf32>
    %492 = vector.extract_strided_slice %427 {offsets = [0, 24], sizes = [8, 8], strides = [1, 1]} : vector<8x32xf32> to vector<8x8xf32>
    %cst_173 = arith.constant dense<0.000000e+00> : vector<8x8xf32>
    %493 = tpu.matmul %491, %492, %cst_173 {dimension_numbers = #tpu.dot_dimension_numbers<[1], [0], [0], [1], [0, 0, 1, 1], [], []>} : vector<8x8xf32>, vector<8x8xf32>, vector<8x8xf32> -> vector<8x8xf32>
    %494 = vector.extract_strided_slice %412 {offsets = [24, 0], sizes = [8, 32], strides = [1, 1]} : vector<32x32xf32> to vector<8x32xf32>
    %cst_174 = arith.constant dense<0.000000e+00> : vector<8x32xf32>
    %495 = tpu.matmul %493, %494, %cst_174 {dimension_numbers = #tpu.dot_dimension_numbers<[1], [0], [0], [1], [0, 0, 1, 1], [], []>} : vector<8x8xf32>, vector<8x32xf32>, vector<8x32xf32> -> vector<8x32xf32>
    %496 = arith.addf %479, %495 : vector<8x32xf32>
    %497 = vector.broadcast %416 : vector<1x32xf32> to vector<8x32xf32>
    %498 = arith.addf %496, %497 : vector<8x32xf32>
    %499 = arith.addf %404, %498 : vector<8x32xf32>
    %500 = vector.extract_strided_slice %285 {offsets = [10, 0], sizes = [1, 32], strides = [1, 1]} : vector<15x32xf32> to vector<1x32xf32>
    %501 = vector.extract_strided_slice %285 {offsets = [11, 0], sizes = [1, 32], strides = [1, 1]} : vector<15x32xf32> to vector<1x32xf32>
    %cst_175 = arith.constant dense<0.000000e+00> : vector<8xf32>
    %502 = vector.multi_reduction <add>, %499, %cst_175 [1] : vector<8x32xf32> to vector<8xf32>
    %503 = vector.shape_cast %502 : vector<8xf32> to vector<8x1xf32>
    %cst_176 = arith.constant 3.200000e+01 : f32
    %504 = vector.broadcast %cst_176 : f32 to vector<8x1xf32>
    %505 = arith.divf %503, %504 : vector<8x1xf32>
    %506 = vector.broadcast %505 : vector<8x1xf32> to vector<8x32xf32>
    %507 = arith.subf %499, %506 : vector<8x32xf32>
    %508 = arith.mulf %507, %507 : vector<8x32xf32>
    %cst_177 = arith.constant dense<0.000000e+00> : vector<8xf32>
    %509 = vector.multi_reduction <add>, %508, %cst_177 [1] : vector<8x32xf32> to vector<8xf32>
    %510 = vector.shape_cast %509 : vector<8xf32> to vector<8x1xf32>
    %cst_178 = arith.constant 3.200000e+01 : f32
    %511 = vector.broadcast %cst_178 : f32 to vector<8x1xf32>
    %512 = arith.divf %510, %511 : vector<8x1xf32>
    %513 = vector.broadcast %505 : vector<8x1xf32> to vector<8x32xf32>
    %514 = arith.subf %499, %513 : vector<8x32xf32>
    %cst_179 = arith.constant 9.99999974E-6 : f32
    %515 = vector.broadcast %cst_179 : f32 to vector<8x1xf32>
    %516 = arith.addf %512, %515 : vector<8x1xf32>
    %517 = math.rsqrt %516 : vector<8x1xf32>
    %518 = vector.broadcast %517 : vector<8x1xf32> to vector<8x32xf32>
    %519 = arith.mulf %514, %518 : vector<8x32xf32>
    %520 = vector.broadcast %500 : vector<1x32xf32> to vector<8x32xf32>
    %521 = arith.mulf %519, %520 : vector<8x32xf32>
    %522 = vector.broadcast %501 : vector<1x32xf32> to vector<8x32xf32>
    %523 = arith.addf %521, %522 : vector<8x32xf32>
    %c1_180 = arith.constant 1 : index
    %c0_181 = arith.constant 0 : index
    %c0_182 = arith.constant 0 : index
    %524 = vector.load %arg4[%c1_180, %c0_181, %c0_182] : memref<2x32x64xf32, #tpu.memory_space<vmem>>, vector<1x32x64xf32>
    %525 = vector.shape_cast %524 : vector<1x32x64xf32> to vector<32x64xf32>
    %cst_183 = arith.constant dense<0.000000e+00> : vector<8x64xf32>
    %526 = tpu.matmul %523, %525, %cst_183 {dimension_numbers = #tpu.dot_dimension_numbers<[1], [0], [0], [1], [0, 0, 1, 1], [], []>} : vector<8x32xf32>, vector<32x64xf32>, vector<8x64xf32> -> vector<8x64xf32>
    %c1_184 = arith.constant 1 : index
    %c0_185 = arith.constant 0 : index
    %c0_186 = arith.constant 0 : index
    %527 = vector.load %arg5[%c1_184, %c0_185, %c0_186] : memref<2x1x64xf32, #tpu.memory_space<vmem>>, vector<1x1x64xf32>
    %528 = vector.shape_cast %527 : vector<1x1x64xf32> to vector<1x64xf32>
    %529 = vector.broadcast %528 : vector<1x64xf32> to vector<8x64xf32>
    %530 = arith.addf %526, %529 : vector<8x64xf32>
    %cst_187 = arith.constant 0.000000e+00 : f32
    %531 = vector.broadcast %cst_187 : f32 to vector<8x64xf32>
    %532 = arith.maximumf %530, %531 : vector<8x64xf32>
    %c1_188 = arith.constant 1 : index
    %c0_189 = arith.constant 0 : index
    %c0_190 = arith.constant 0 : index
    %533 = vector.load %arg6[%c1_188, %c0_189, %c0_190] : memref<2x64x32xf32, #tpu.memory_space<vmem>>, vector<1x64x32xf32>
    %534 = vector.shape_cast %533 : vector<1x64x32xf32> to vector<64x32xf32>
    %cst_191 = arith.constant dense<0.000000e+00> : vector<8x32xf32>
    %535 = tpu.matmul %532, %534, %cst_191 {dimension_numbers = #tpu.dot_dimension_numbers<[1], [0], [0], [1], [0, 0, 1, 1], [], []>} : vector<8x64xf32>, vector<64x32xf32>, vector<8x32xf32> -> vector<8x32xf32>
    %536 = vector.extract_strided_slice %285 {offsets = [14, 0], sizes = [1, 32], strides = [1, 1]} : vector<15x32xf32> to vector<1x32xf32>
    %537 = vector.broadcast %536 : vector<1x32xf32> to vector<8x32xf32>
    %538 = arith.addf %535, %537 : vector<8x32xf32>
    %539 = arith.addf %523, %538 : vector<8x32xf32>
    %540 = vector.extract_strided_slice %285 {offsets = [12, 0], sizes = [1, 32], strides = [1, 1]} : vector<15x32xf32> to vector<1x32xf32>
    %541 = vector.extract_strided_slice %285 {offsets = [13, 0], sizes = [1, 32], strides = [1, 1]} : vector<15x32xf32> to vector<1x32xf32>
    %cst_192 = arith.constant dense<0.000000e+00> : vector<8xf32>
    %542 = vector.multi_reduction <add>, %539, %cst_192 [1] : vector<8x32xf32> to vector<8xf32>
    %543 = vector.shape_cast %542 : vector<8xf32> to vector<8x1xf32>
    %cst_193 = arith.constant 3.200000e+01 : f32
    %544 = vector.broadcast %cst_193 : f32 to vector<8x1xf32>
    %545 = arith.divf %543, %544 : vector<8x1xf32>
    %546 = vector.broadcast %545 : vector<8x1xf32> to vector<8x32xf32>
    %547 = arith.subf %539, %546 : vector<8x32xf32>
    %548 = arith.mulf %547, %547 : vector<8x32xf32>
    %cst_194 = arith.constant dense<0.000000e+00> : vector<8xf32>
    %549 = vector.multi_reduction <add>, %548, %cst_194 [1] : vector<8x32xf32> to vector<8xf32>
    %550 = vector.shape_cast %549 : vector<8xf32> to vector<8x1xf32>
    %cst_195 = arith.constant 3.200000e+01 : f32
    %551 = vector.broadcast %cst_195 : f32 to vector<8x1xf32>
    %552 = arith.divf %550, %551 : vector<8x1xf32>
    %553 = vector.broadcast %545 : vector<8x1xf32> to vector<8x32xf32>
    %554 = arith.subf %539, %553 : vector<8x32xf32>
    %cst_196 = arith.constant 9.99999974E-6 : f32
    %555 = vector.broadcast %cst_196 : f32 to vector<8x1xf32>
    %556 = arith.addf %552, %555 : vector<8x1xf32>
    %557 = math.rsqrt %556 : vector<8x1xf32>
    %558 = vector.broadcast %557 : vector<8x1xf32> to vector<8x32xf32>
    %559 = arith.mulf %554, %558 : vector<8x32xf32>
    %560 = vector.broadcast %540 : vector<1x32xf32> to vector<8x32xf32>
    %561 = arith.mulf %559, %560 : vector<8x32xf32>
    %562 = vector.broadcast %541 : vector<1x32xf32> to vector<8x32xf32>
    %563 = arith.addf %561, %562 : vector<8x32xf32>
    %c0_197 = arith.constant 0 : index
    %c0_198 = arith.constant 0 : index
    %c0_199 = arith.constant 0 : index
    %564 = vector.load %arg8[%c0_197, %c0_198, %c0_199] : memref<1x8x32xf32, #tpu.memory_space<vmem>>, vector<1x8x32xf32>
    %565 = vector.shape_cast %564 : vector<1x8x32xf32> to vector<8x32xf32>
    %566 = vector.shape_cast %563 : vector<8x32xf32> to vector<1x8x32xf32>
    tpu.vector_store %arg8[%c0_197, %c0_198, %c0_199], %566 {strides = array<i32>} : memref<1x8x32xf32, #tpu.memory_space<vmem>>, vector<1x8x32xf32>,
    return
  }
  func.func @transform_0(%arg0: i32) -> (i32, i32, i32) {
    %c0_i32 = arith.constant 0 : i32
    %c0_i32_0 = arith.constant 0 : i32
    %c0_i32_1 = arith.constant 0 : i32
    return %arg0, %c0_i32, %c0_i32_0 : i32, i32, i32
  }
  func.func @transform_1(%arg0: i32) -> (i32, i32, i32) {
    %c0_i32 = arith.constant 0 : i32
    %c0_i32_0 = arith.constant 0 : i32
    %c0_i32_1 = arith.constant 0 : i32
    return %arg0, %c0_i32, %c0_i32_0 : i32, i32, i32
  }
  func.func @transform_2(%arg0: i32) -> (i32, i32, i32) {
    %c0_i32 = arith.constant 0 : i32
    %c0_i32_0 = arith.constant 0 : i32
    %c0_i32_1 = arith.constant 0 : i32
    %c0_i32_2 = arith.constant 0 : i32
    return %c0_i32, %c0_i32_0, %c0_i32_1 : i32, i32, i32
  }
  func.func @transform_3(%arg0: i32) -> (i32, i32, i32) {
    %c0_i32 = arith.constant 0 : i32
    %c0_i32_0 = arith.constant 0 : i32
    %c0_i32_1 = arith.constant 0 : i32
    %c0_i32_2 = arith.constant 0 : i32
    return %c0_i32, %c0_i32_0, %c0_i32_1 : i32, i32, i32
  }
  func.func @transform_4(%arg0: i32) -> (i32, i32, i32) {
    %c0_i32 = arith.constant 0 : i32
    %c0_i32_0 = arith.constant 0 : i32
    %c0_i32_1 = arith.constant 0 : i32
    %c0_i32_2 = arith.constant 0 : i32
    return %c0_i32, %c0_i32_0, %c0_i32_1 : i32, i32, i32
  }
  func.func @transform_5(%arg0: i32) -> (i32, i32, i32) {
    %c0_i32 = arith.constant 0 : i32
    %c0_i32_0 = arith.constant 0 : i32
    %c0_i32_1 = arith.constant 0 : i32
    %c0_i32_2 = arith.constant 0 : i32
    return %c0_i32, %c0_i32_0, %c0_i32_1 : i32, i32, i32
  }
  func.func @transform_6(%arg0: i32) -> (i32, i32, i32) {
    %c0_i32 = arith.constant 0 : i32
    %c0_i32_0 = arith.constant 0 : i32
    %c0_i32_1 = arith.constant 0 : i32
    %c0_i32_2 = arith.constant 0 : i32
    return %c0_i32, %c0_i32_0, %c0_i32_1 : i32, i32, i32
  }
  func.func @transform_7(%arg0: i32) -> (i32, i32, i32) {
    %c0_i32 = arith.constant 0 : i32
    %c0_i32_0 = arith.constant 0 : i32
    %c0_i32_1 = arith.constant 0 : i32
    return %arg0, %c0_i32, %c0_i32_0 : i32, i32, i32
  }
}

</mosaic_0001>

<bundles_post_ra>
// kernel: transformer_forward.2
= control target key start
LH: loop header
LB: loop body
LE: loop exit
PB: predicated region body
PF: predicated region fallthrough
CT: control target
= control target key end

     0   :  { %s1736_s21 = smov 0   ;;  %s2095_s0 = inlined_call_operand.vmem [shape: f32[2,8,32], index: 0, kind: input, shape index: {}]   ;;  %s2096_s1 = inlined_call_operand.vmem [shape: f32[8,32,32], index: 1, kind: input, shape index: {}]   ;;  %s2097_s2 = inlined_call_operand.vmem [shape: f32[2,32,64], index: 2, kind: input, shape index: {}]   ;;  %s2098_s3 = inlined_call_operand.vmem [shape: f32[2,1,64], index: 3, kind: input, shape index: {}]   ;;  %s2099_s4 = inlined_call_operand.vmem [shape: f32[2,64,32], index: 4, kind: input, shape index: {}]   ;;  %s2100_s5 = inlined_call_operand.vmem [shape: f32[2,9,32], index: 5, kind: input, shape index: {}]   ;;  %s2101_s6 = inlined_call_operand.vmem [shape: f32[2,8,32], index: 6, kind: output, shape index: {}]  }
   0x1 LB: > { %s1537_s22 = sadd.s32 4294967295, %s1695_s21   ;;  %p1541_p0 = scmp.ge.s32.totalorder %s1695_s21, 1  ;;  %s1695_s21 = sphi %s1736_s21, %s16_s21  }
   0x2   : > { %p211_p1 = scmp.lt.s32.totalorder %s1695_s21, 3 }
   0x4   : > { %p212_p2 = pnand %p1541_p0, %p211_p1 }
   0x5   : > { %p239_p3 = scmp.lt.s32.totalorder (!%p212_p2), %s1537_s22, 1  ;;  %s1697_s23 = smov (!%p212_p2), 112  }
   0x6   : > { %215 = sbr.rel (%p212_p2) target bundleno = 4281 (0x10b9), region = 44  ;;  %s1698_s24 = smov (!%p212_p2), 120  }
   0x7   : > { %s1699_s25 = smov (!%p212_p2), 104  }
   0xb   : > { %v1547_v0 = vld [vmem:[%s2096_s1 + $0x38] sm:$0xff]  ;;  %v1546_v1 = vld [vmem:[%s2096_s1 + $0x30] sm:$0xff]  ;;  %v1545_v4 = vld [vmem:[%s2096_s1 + $0x28] sm:$0xff]  ;;  %s2103_s22 = smov (!%p239_p3, %s1537_s22), 1  ;;  %vm270_vm0 = vcmask 261120   ;;  %vm337_vm1 = vcmask 64512  }
   0xc   : > { %308 = vmatpush.msra.mxu2 %v1547_v0  ;;  %v253_v2 = vld [vmem:[%s2096_s1 + $0x18] sm:$0xff]  ;;  %v252_v3 = vld [vmem:[%s2096_s1 + $0x10] sm:$0xff]  ;;  %v251_v5 = vld [vmem:[%s2096_s1 + $0x8] sm:$0xff]  ;;  %s1542_s13 = sshll.u32 %s2103_s22, 3 }
   0xd   : > { %286 = vmatpush.msra.mxu0 %v253_v2  ;;  %v1544_v6 = vld [vmem:[%s2096_s1 + $0x20] sm:$0xff]  ;;  %s242_s16 = scalar_lea.vmem %s2095_s0, %s1542_s13  ;;  %v1551_v22 = vld [vmem:[%s2096_s1 + $0x58] sm:$0xff]  ;;  %v1550_v23 = vld [vmem:[%s2096_s1 + $0x50] sm:$0xff]  ;;  %s246_s15 = scalar_lea.vmem %s2101_s6, %s1542_s13 }
   0xe   : > { %309 = vmatpush.msra.mxu2 %v1546_v1  ;;  %v250_v7 = vld [vmem:[%s2096_s1] sm:$0xff]  ;;  %v1549_v24 = vld [vmem:[%s2096_s1 + $0x48] sm:$0xff] }
   0xf   : > { %287 = vmatpush.msra.mxu0 %v252_v3  ;;  %v1776_v8 = vld [vmem:[%s242_s16] sm:$0xff] }
  0x10   : > { %310 = vmatpush.msra.mxu2 %v1545_v4  ;;  %v1785_v9 = vld [vmem:[%s2100_s5] sm:$0xff] }
  0x11   : > { %288 = vmatpush.msra.mxu0 %v251_v5  ;;  %v269_v10 = vperm.slane %v1785_v9, 0  ;;  %v295_v12 = vperm.slane %v1785_v9, 1  ;;  %v1548_v25 = vld [vmem:[%s2096_s1 + $0x40] sm:$0xff]  ;;  %v316_v34 = vperm.slane %v1785_v9, 2 }
  0x12   : > { %311 = vmatpush.msra.mxu2 %v1544_v6  ;;  %v1552_v37 = vld [vmem:[%s2096_s1 + $0x60] sm:$0xff] }
  0x13   : > { %1557 = vmatmul.msk.f32.vlgmr.msra.gmra.mxu2 %vm270_vm0, %v1776_v8  ;;  %289 = vmatpush.msra.mxu0 %v250_v7 }
  0x14   : > { %1556 = vmatmul.msk.f32.vlgmr.msra.gmra.mxu0 %vm270_vm0, %v1776_v8  ;;  %329 = vmatpush.msrb.mxu2 %v1551_v22 }
  0x16   : > { %330 = vmatpush.msrb.mxu2 %v1550_v23 }
  0x18   : > { %331 = vmatpush.msrb.mxu2 %v1549_v24 }
  0x1a   : > { %332 = vmatpush.msrb.mxu2 %v1548_v25 }
  0x1b   : > { %1558 = vmatmul.msk.f32.vlgmr.msrb.gmra.mxu2 %vm270_vm0, %v1776_v8 }
  0x91   : > { %v291_v11 = vpop.f32.mrf.mxu0 }
  0x92   : > { %v292_v13 = vadd.f32 %v291_v11, %v269_v10 }
  0x94   : > { %v294_v16 = vmul.f32 0.35355338, %v292_v13 }
  0x96   : > { %v313_v14 = vpop.f32.mrf.mxu2 }
  0x97   : > { %v314_v15 = vadd.f32 %v313_v14, %v295_v12 }
  0x99   : > { %538 = vrot.lane.b32.xlu2 %v314_v15, %s1697_s23  ;;  %413 = vrot.lane.b32.xlu1 %v314_v15, %s1698_s24 }
  0x9a   : > { %1559 = vmatpush.xpose.msk.msra.mxu3 %vm337_vm1, %v314_v15 }
  0x9d   : > { %1560 = vmatmul.msk.f32.vlgmr.msra.gmra.mxu3 %vm337_vm1, %v294_v16 }
  0x9e   : > { %v334_v35 = vpop.f32.mrf.mxu2 }
  0x9f   : > { %v1818_v36 = vadd.f32 %v334_v35, %v316_v34 }
  0xa1   : > { %640 = vrot.lane.b32.xlu2 %v314_v15, %s1699_s25  ;;  %411 = vrot.lane.b32.xlu1 %v294_v16, %s1698_s24 }
  0xa2   : > { %406 = vmatpush.msrb.mxu3 %v1818_v36 }
  0xa4   : > { %531 = vmatpush.msra.mxu3 %v1552_v37 }
  0xa9   : > { %638 = vrot.lane.b32.xlu1 %v294_v16, %s1699_s25 }
  0xf3   : > { %v539_v18 = vpop.permute.xlu2 %538 }
  0xfb   : > { %v641_v33 = vpop.permute.xlu2 %640 }
 0x10b   : > { %v414_v17 = vpop.permute.xlu1 %413 }
 0x10c   : > { %1562 = vmatpush.xpose.msk.msrb.mxu0 %vm337_vm1, %v414_v17 }
 0x110   : > { %1567 = vmatpush.xpose.msk.msra.mxu0 %vm337_vm1, %v539_v18 }
 0x113   : > { %v412_v19 = vpop.permute.xlu1 %411 }
 0x114   : > { %1563 = vmatmul.msk.f32.vlgmr.msrb.gmra.mxu0 %vm337_vm1, %v412_v19 }
 0x11b   : > { %v639_v59 = vpop.permute.xlu1 %638 }
 0x120   : > { %v361_v20 = vpop.f32.mrf.mxu3 }
 0x121   : > { %v364_v21 = vsel %vm337_vm1, %v361_v20, -inf }
 0x122   : > { %365 = vmax.xlane.f32.xlu0 %v364_v21 }
 0x191   : > { %v436_v26 = vpop.f32.mrf.mxu0 }
 0x192   : > { %v439_v27 = vsel %vm337_vm1, %v436_v26, -inf }
 0x193   : > { %440 = vmax.xlane.f32.xlu2 %v439_v27 }
 0x195   : > { %v366_v28 = vpop.xlane.xlu0 %365 }
 0x196   : > { %v367_v29 = vsub.f32 %v361_v20, %v366_v28 }
 0x198   : > { %v368_v30 = vmul.f32 1.442695, %v367_v29 }
 0x19a   : > { %1647 = vpow2.f32 %v368_v30 }
 0x1a0   : > { %v1648_v31 = vpop.eup %1647 }
 0x1a1   : > { %v370_v32 = vsel %vm337_vm1, %v1648_v31, 0.0 }
 0x1a2   : > { %371 = vadd.xlane.f32.xlu0 %v370_v32 }
 0x1b6   : > { %536 = vrot.lane.b32.xlu0 %v294_v16, %s1697_s23 }
 0x206   : > { %v441_v38 = vpop.xlane.xlu2 %440 }
 0x207   : > { %v442_v39 = vsub.f32 %v436_v26, %v441_v38  ;;  %v1553_v26 = vld [vmem:[%s2096_s1 + $0x68] sm:$0xff] }
 0x208   : > { %508 = vmatpush.msra.mxu2 %v1553_v26  ;;  %v811_v26 = vld [vmem:[%s2099_s4 + $0x18] sm:$0xff] }
 0x209   : > { %v443_v40 = vmul.f32 1.442695, %v442_v39 }
 0x20b   : > { %1649 = vpow2.f32 %v443_v40 }
 0x211   : > { %v1650_v41 = vpop.eup %1649 }
 0x212   : > { %v445_v42 = vsel %vm337_vm1, %v1650_v41, 0.0 }
 0x213   : > { %446 = vadd.xlane.f32.xlu2 %v445_v42 }
 0x215   : > { %v372_v43 = vpop.xlane.xlu0 %371 }
 0x216   : > { %1651 = vrcp.f32 %v372_v43  ;;  %v384_v47 = vand.u32 2147483648, %v372_v43  ;;  %v382_v49 = vand.u32 2147483647, %v372_v43  ;;  %vm378_vm3 = vweird.f32 %v372_v43 }
 0x218   : > { %v385_v51 = vor.u32 1.1754944e-38, %v384_v47  ;;  %vm383_vm5 = vcmp.eq.f32.partialorder %v382_v49, 8.507059e+37 }
 0x21c   : > { %v1652_v44 = vpop.eup %1651 }
 0x21d   : > { %v374_v45 = vmul.f32 %v1652_v44, %v372_v43  ;;  %vm379_vm2 = vweird.f32 %v1652_v44 }
 0x21e   : > { %vm380_vm4 = vmor %vm378_vm3, %vm379_vm2 }
 0x21f   : > { %v375_v46 = vsub.f32 1.0, %v374_v45 }
 0x221   : > { %v376_v48 = vmul.f32 %v1652_v44, %v375_v46 }
 0x223   : > { %v377_v50 = vadd.f32 %v1652_v44, %v376_v48 }
 0x225   : > { %v381_v52 = vsel %vm380_vm4, %v1652_v44, %v377_v50 }
 0x226   : > { %v386_v53 = vsel %vm383_vm5, %v385_v51, %v381_v52  ;;  %v1555_v52 = vld [vmem:[%s2096_s1 + $0x78] sm:$0xff] }
 0x227   : > { %v387_v54 = vmul.f32 %v1648_v31, %v386_v53  ;;  %v1554_v53 = vld [vmem:[%s2096_s1 + $0x70] sm:$0xff] }
 0x228   : > { %v537_v55 = vpop.permute.xlu0 %536  ;;  %632 = vmatpush.msrb.mxu2 %v1554_v53 }
 0x229   : > { %1561 = vmatmul.msk.f32.vlgmr.msrb.gmra.mxu3 %vm337_vm1, %v387_v54  ;;  %1568 = vmatmul.msk.f32.vlgmr.msra.gmra.mxu0 %vm337_vm1, %v537_v55 }
 0x22a   : > { %1571 = vmatpush.xpose.msk.msrb.mxu3 %vm337_vm1, %v641_v33 }
 0x286   : > { %v447_v4 = vpop.xlane.xlu2 %446 }
 0x287   : > { %v459_v12 = vand.u32 2147483648, %v447_v4  ;;  %vm453_vm7 = vweird.f32 %v447_v4  ;;  %v457_v14 = vand.u32 2147483647, %v447_v4 }
 0x289   : > { %v460_v16 = vor.u32 1.1754944e-38, %v459_v12  ;;  %vm458_vm9 = vcmp.eq.f32.partialorder %v457_v14, 8.507059e+37 }
 0x2a6   : > { %v561_v56 = vpop.f32.mrf.mxu0 }
 0x2a7   : > { %v564_v57 = vsel %vm337_vm1, %v561_v56, -inf }
 0x2a8   : > { %565 = vmax.xlane.f32.xlu1 %v564_v57 }
 0x2ac   : > { %v408_v58 = vpop.f32.mrf.mxu3 }
 0x2ad   : > { %1566 = vmatmul.msk.f32.vlgmr.msra.gmra.mxu3 %vm337_vm1, %v408_v58 }
 0x2b5   : > { %1572 = vmatmul.msk.f32.vlgmr.msrb.gmra.mxu3 %vm337_vm1, %v639_v59 }
 0x31b   : > { %v566_v60 = vpop.xlane.xlu1 %565 }
 0x31c   : > { %v567_v61 = vsub.f32 %v561_v56, %v566_v60  ;;  %v740_v60 = vperm.slane %v1785_v9, 3 }
 0x31e   : > { %v568_v62 = vmul.f32 1.442695, %v567_v61 }
 0x320   : > { %1653 = vpow2.f32 %v568_v62 }
 0x321   : > { %1655 = vrcp.f32 %v447_v4 }
 0x326   : > { %v1831_v63 = vpop.eup %1653 }
 0x327   : > { %v570_v0 = vsel %vm337_vm1, %v1831_v63, 0.0  ;;  %v1656_v5 = vpop.eup %1655 }
 0x328   : > { %571 = vadd.xlane.f32.xlu2 %v570_v0  ;;  %v449_v6 = vmul.f32 %v1656_v5, %v447_v4  ;;  %vm454_vm6 = vweird.f32 %v1656_v5 }
 0x329   : > { %vm455_vm8 = vmor %vm453_vm7, %vm454_vm6 }
 0x32a   : > { %v450_v7 = vsub.f32 1.0, %v449_v6 }
 0x32c   : > { %v451_v10 = vmul.f32 %v1656_v5, %v450_v7 }
 0x32e   : > { %v452_v11 = vadd.f32 %v1656_v5, %v451_v10 }
 0x330   : > { %v1835_v1 = vpop.f32.mrf.mxu3  ;;  %v456_v15 = vsel %vm455_vm8, %v1656_v5, %v452_v11  ;;  %vm817_vm8 = vcmask 523264  }
 0x331   : > { %v461_v17 = vsel %vm458_vm9, %v460_v16, %v456_v15  ;;  %v779_v15 = vld [vmem:[%s2097_s2 + $0x18] sm:$0xff]  ;;  %v778_v16 = vld [vmem:[%s2097_s2 + $0x10] sm:$0xff] }
 0x332   : > { %v462_v19 = vmul.f32 %v1650_v41, %v461_v17  ;;  %v777_v17 = vld [vmem:[%s2097_s2 + $0x8] sm:$0xff] }
 0x338   : > { %v663_v2 = vpop.f32.mrf.mxu3 }
 0x339   : > { %v666_v3 = vsel %vm337_vm1, %v663_v2, -inf }
 0x33a   : > { %667 = vmax.xlane.f32.xlu0 %v666_v3  ;;  %v1700_v3 = vmov 32.0  }
 0x340   : > { %464 = vrot.lane.b32.xlu2 %v1818_v36, %s1698_s24 }
 0x34e   : > { %690 = vrot.lane.b32.xlu0 %v1818_v36, %s1699_s25 }
 0x39b   : > { %v572_v13 = vpop.xlane.xlu2 %571 }
 0x39c   : > { %v584_v41 = vand.u32 2147483648, %v572_v13  ;;  %vm578_vm14 = vweird.f32 %v572_v13  ;;  %v582_v43 = vand.u32 2147483647, %v572_v13 }
 0x39e   : > { %v585_v48 = vor.u32 1.1754944e-38, %v584_v41  ;;  %vm583_vm3 = vcmp.eq.f32.partialorder %v582_v43, 8.507059e+37  ;;  %v808_v41 = vld [vmem:[%s2099_s4] sm:$0xff] }
 0x3a3   : > { %v465_v18 = vpop.permute.xlu2 %464 }
 0x3a4   : > { %485 = vmatpush.msra.mxu1 %v465_v18  ;;  %v776_v18 = vld [vmem:[%s2097_s2] sm:$0xff] }
 0x3a5   : > { %1564 = vmatmul.msk.f32.vlgmr.msra.gmra.mxu1 %vm337_vm1, %v462_v19  ;;  %v815_v19 = vld [vmem:[%s2099_s4 + $0x38] sm:$0xff] }
 0x3a6   : > { %829 = vmatpush.msra.mxu3 %v815_v19 }
 0x3ad   : > { %v668_v20 = vpop.xlane.xlu0 %667 }
 0x3ae   : > { %v669_v21 = vsub.f32 %v663_v2, %v668_v20  ;;  %v814_v20 = vld [vmem:[%s2099_s4 + $0x30] sm:$0xff] }
 0x3af   : > { %830 = vmatpush.msra.mxu3 %v814_v20 }
 0x3b0   : > { %v670_v22 = vmul.f32 1.442695, %v669_v21  ;;  %v813_v21 = vld [vmem:[%s2099_s4 + $0x28] sm:$0xff] }
 0x3b1   : > { %831 = vmatpush.msra.mxu3 %v813_v21  ;;  %v1969_v21 = vld [vmem:[%s2100_s5 + $0x10] sm:$0xff] }
 0x3b2   : > { %1657 = vpow2.f32 %v670_v22 }
 0x3b3   : > { %1659 = vrcp.f32 %v572_v13 }
 0x3b8   : > { %v1658_v23 = vpop.eup %1657 }
 0x3b9   : > { %v672_v24 = vsel %vm337_vm1, %v1658_v23, 0.0  ;;  %v1660_v28 = vpop.eup %1659 }
 0x3ba   : > { %673 = vadd.xlane.f32.xlu1 %v672_v24  ;;  %v574_v30 = vmul.f32 %v1660_v28, %v572_v13  ;;  %vm579_vm11 = vweird.f32 %v1660_v28  ;;  %v812_v24 = vld [vmem:[%s2099_s4 + $0x20] sm:$0xff] }
 0x3bb   : > { %vm580_vm2 = vmor %vm578_vm14, %vm579_vm11  ;;  %832 = vmatpush.msra.mxu3 %v812_v24 }
 0x3bc   : > { %v575_v31 = vsub.f32 1.0, %v574_v30 }
 0x3bd   : > { %833 = vmatpush.msra.mxu3 %v811_v26 }
 0x3be   : > { %v576_v34 = vmul.f32 %v1660_v28, %v575_v31 }
 0x3c0   : > { %v691_v25 = vpop.permute.xlu0 %690  ;;  %v577_v39 = vadd.f32 %v1660_v28, %v576_v34 }
 0x3c1   : > { %711 = vmatpush.msrb.mxu0 %v691_v25 }
 0x3c2   : > { %v581_v47 = vsel %vm580_vm2, %v1660_v28, %v577_v39  ;;  %v810_v39 = vld [vmem:[%s2099_s4 + $0x10] sm:$0xff] }
 0x3c3   : > { %v586_v49 = vsel %vm583_vm3, %v585_v48, %v581_v47  ;;  %834 = vmatpush.msra.mxu3 %v810_v39 }
 0x3c4   : > { %v587_v51 = vmul.f32 %v1831_v63, %v586_v49 }
 0x3d3   : > { %588 = vrot.lane.b32.xlu1 %v1818_v36, %s1697_s23 }
 0x422   : > { %v487_v27 = vpop.f32.mrf.mxu1 }
 0x423   : > { %1565 = vmatmul.msk.f32.vlgmr.msra.gmra.mxu2 %vm337_vm1, %v487_v27 }
 0x424   : > { %799 = vmatpush.msra.mxu2 %v779_v15  ;;  %v864_v15 = vperm.slane %v1785_v9, 6 }
 0x426   : > { %800 = vmatpush.msra.mxu2 %v778_v16 }
 0x428   : > { %801 = vmatpush.msra.mxu2 %v777_v17 }
 0x42a   : > { %802 = vmatpush.msra.mxu2 %v776_v18  ;;  %v866_v18 = vperm.slane %v1785_v9, 7 }
 0x42d   : > { %v674_v29 = vpop.xlane.xlu1 %673 }
 0x42e   : > { %1661 = vrcp.f32 %v674_v29  ;;  %v686_v37 = vand.u32 2147483648, %v674_v29  ;;  %v684_v38 = vand.u32 2147483647, %v674_v29  ;;  %vm680_vm12 = vweird.f32 %v674_v29 }
 0x42f   : > { %1663 = vrcp.f32 %v1700_v3  ;;  %v1583_v3 = vld [vmem:[%s2096_s1 + $0xa0] sm:$0xff] }
 0x430   : > { %v687_v42 = vor.u32 1.1754944e-38, %v686_v37  ;;  %vm685_vm15 = vcmp.eq.f32.partialorder %v684_v38, 8.507059e+37  ;;  %v774_v37 = vperm.slane %v1785_v9, 5 }
 0x434   : > { %v1662_v32 = vpop.eup %1661 }
 0x435   : > { %v676_v33 = vmul.f32 %v1662_v32, %v674_v29  ;;  %vm681_vm10 = vweird.f32 %v1662_v32  ;;  %v1664_v4 = vpop.eup %1663 }
 0x436   : > { %vm682_vm13 = vmor %vm680_vm12, %vm681_vm10  ;;  %v747_v5 = vmul.f32 32.0, %v1664_v4  ;;  %vm751_vm4 = vweird.f32 %v1664_v4 }
 0x437   : > { %v677_v35 = vsub.f32 1.0, %v676_v33  ;;  %v772_v33 = vperm.slane %v1785_v9, 4  ;;  %v916_v9 = vperm.slane %v1969_v21, 1 }
 0x438   : > { %v748_v6 = vsub.f32 1.0, %v747_v5 }
 0x439   : > { %v678_v36 = vmul.f32 %v1662_v32, %v677_v35 }
 0x43a   : > { %v749_v7 = vmul.f32 %v1664_v4, %v748_v6 }
 0x43b   : > { %v679_v40 = vadd.f32 %v1662_v32, %v678_v36 }
 0x43c   : > { %v750_v10 = vadd.f32 %v1664_v4, %v749_v7 }
 0x43d   : > { %v683_v44 = vsel %vm682_vm13, %v1662_v32, %v679_v40  ;;  %v809_v40 = vld [vmem:[%s2099_s4 + $0x8] sm:$0xff] }
 0x43e   : > { %v688_v45 = vsel %vm685_vm15, %v687_v42, %v683_v44  ;;  %835 = vmatpush.msra.mxu3 %v809_v40  ;;  %v1643_v42 = vld [vmem:[%s2098_s3] ss:$0 sm:$0xff] }
 0x43f   : > { %v689_v46 = vmul.f32 %v1658_v23, %v688_v45  ;;  %v1591_v40 = vld [vmem:[%s2096_s1 + $0xe0] sm:$0xff] }
 0x440   : > { %836 = vmatpush.msra.mxu3 %v808_v41 }
 0x441   : > { %1573 = vmatmul.msk.f32.vlgmr.msrb.gmra.mxu0 %vm337_vm1, %v689_v46  ;;  %v1644_v46 = vld [vmem:[%s2100_s5 + $0x8] ss:$0 sm:$0xff] }
 0x445   : > { %v589_v50 = vpop.permute.xlu1 %588 }
 0x446   : > { %609 = vmatpush.msrb.mxu1 %v589_v50 }
 0x447   : > { %1569 = vmatmul.msk.f32.vlgmr.msrb.gmra.mxu1 %vm337_vm1, %v587_v51 }
 0x448   : > { %734 = vmatpush.msra.mxu1 %v1555_v52 }
 0x4a6   : > { %v510_v56 = vpop.f32.mrf.mxu2 }
 0x4a7   : > { %v534_v57 = vadd.f32 %v1835_v1, %v510_v56  ;;  %v1865_v1 = vsel %vm751_vm4, %v1664_v4, %v750_v10  ;;  %v1582_v56 = vld [vmem:[%s2096_s1 + $0x98] sm:$0xff]  ;;  %v1587_v4 = vld [vmem:[%s2096_s1 + $0xc0] sm:$0xff] }
 0x4a8   : > { %907 = vmatpush.msra.mxu0 %v1582_v56 }
 0x4be   : > { %v713_v54 = vpop.f32.mrf.mxu0 }
 0x4bf   : > { %1574 = vmatmul.msk.f32.vlgmr.msra.gmra.mxu1 %vm337_vm1, %v713_v54 }
 0x4c4   : > { %v611_v55 = vpop.f32.mrf.mxu1 }
 0x4c5   : > { %1570 = vmatmul.msk.f32.vlgmr.msrb.gmra.mxu2 %vm337_vm1, %v611_v55 }
 0x53c   : > { %v736_v61 = vpop.f32.mrf.mxu1 }
 0x548   : > { %v634_v58 = vpop.f32.mrf.mxu2 }
 0x549   : > { %v637_v59 = vadd.f32 %v634_v58, %v534_v57  ;;  %v1586_v57 = vld [vmem:[%s2096_s1 + $0xb8] sm:$0xff] }
 0x54a   : > { %v1590_v58 = vld [vmem:[%s2096_s1 + $0xd8] sm:$0xff]  ;;  %929 = vmatpush.msrb.mxu1 %v1586_v57 }
 0x54b   : > { %v739_v62 = vadd.f32 %v736_v61, %v637_v59  ;;  %950 = vmatpush.msrb.mxu2 %v1590_v58  ;;  %v1581_v59 = vld [vmem:[%s2096_s1 + $0x90] sm:$0xff] }
 0x54c   : > { %v1589_v61 = vld [vmem:[%s2096_s1 + $0xd0] sm:$0xff]  ;;  %908 = vmatpush.msra.mxu0 %v1581_v59 }
 0x54d   : > { %v741_v63 = vadd.f32 %v740_v60, %v739_v62  ;;  %v1585_v60 = vld [vmem:[%s2096_s1 + $0xb0] sm:$0xff]  ;;  %v1580_v62 = vld [vmem:[%s2096_s1 + $0x88] sm:$0xff]  ;;  %951 = vmatpush.msrb.mxu2 %v1589_v61 }
 0x54e   : > { %930 = vmatpush.msrb.mxu1 %v1585_v60  ;;  %909 = vmatpush.msra.mxu0 %v1580_v62 }
 0x54f   : > { %v742_v0 = vadd.f32 %v741_v63, %v1776_v8  ;;  %v1584_v63 = vld [vmem:[%s2096_s1 + $0xa8] sm:$0xff] }
 0x550   : > { %931 = vmatpush.msrb.mxu1 %v1584_v63 }
 0x551   : > { %v743_v2 = vsel %vm270_vm0, %v742_v0, 0.0 }
 0x552   : > { %744 = vadd.xlane.f32.xlu2 %v743_v2  ;;  %v1579_v2 = vld [vmem:[%s2096_s1 + $0x80] sm:$0xff]  ;;  %932 = vmatpush.msrb.mxu1 %v1583_v3 }
 0x553   : > { %910 = vmatpush.msra.mxu0 %v1579_v2 }
 0x5c5   : > { %v745_v11 = vpop.xlane.xlu2 %744 }
 0x5c6   : > { %v753_v12 = vmul.f32 %v1865_v1, %v745_v11 }
 0x5c8   : > { %v754_v13 = vsub.f32 %v742_v0, %v753_v12  ;;  %v1588_v0 = vld [vmem:[%s2096_s1 + $0xc8] sm:$0xff] }
 0x5c9   : > { %952 = vmatpush.msrb.mxu2 %v1588_v0 }
 0x5ca   : > { %v755_v14 = vmul.f32 %v754_v13, %v754_v13 }
 0x5cb   : > { %953 = vmatpush.msrb.mxu2 %v1587_v4 }
 0x5cc   : > { %v756_v8 = vsel %vm270_vm0, %v755_v14, 0.0 }
 0x5cd   : > { %757 = vadd.xlane.f32.xlu0 %v756_v8 }
 0x640   : > { %v758_v22 = vpop.xlane.xlu0 %757 }
 0x641   : > { %v759_v23 = vmul.f32 %v758_v22, %v1865_v1  ;;  %v891_v22 = vperm.slane %v1969_v21, 0 }
 0x643   : > { %v760_v25 = vadd.f32 1e-05, %v759_v23 }
 0x645   : > { %1665 = vrsqrt.f32 %v760_v25  ;;  %vm767_vm6 = vweird.f32 %v760_v25 }
 0x64b   : > { %v1666_v27 = vpop.eup %1665 }
 0x64c   : > { %v762_v28 = vmul.f32 %v1666_v27, %v760_v25  ;;  %vm768_vm5 = vweird.f32 %v1666_v27 }
 0x64d   : > { %vm769_vm7 = vmor %vm767_vm6, %vm768_vm5 }
 0x64e   : > { %v763_v29 = vmul.f32 %v1666_v27, %v762_v28  ;;  %v937_v28 = vperm.slane %v1969_v21, 2 }
 0x650   : > { %v764_v30 = vmul.f32 0.5, %v763_v29 }
 0x652   : > { %v765_v31 = vsub.f32 1.5, %v764_v30 }
 0x654   : > { %v766_v32 = vmul.f32 %v1666_v27, %v765_v31 }
 0x656   : > { %v770_v34 = vsel %vm769_vm7, %v1666_v27, %v766_v32 }
 0x657   : > { %v771_v35 = vmul.f32 %v770_v34, %v754_v13 }
 0x659   : > { %v773_v36 = vmul.f32 %v772_v33, %v771_v35 }
 0x65b   : > { %v775_v38 = vadd.f32 %v774_v37, %v773_v36 }
 0x65d   : > { %1575 = vmatmul.msk.f32.vlgmr.msra.gmra.mxu2 %vm270_vm0, %v775_v38 }
 0x6e0   : > { %v804_v43 = vpop.f32.mrf.mxu2 }
 0x6e1   : > { %v805_v44 = vadd.f32 %v1643_v42, %v804_v43 }
 0x6e3   : > { %v807_v45 = vmax.f32 %v805_v44, 0.0 }
 0x6e5   : > { %1576 = vmatmul.msk.f32.vlgmr.msra.gmra.mxu3 %vm817_vm8, %v807_v45 }
 0x768   : > { %v838_v47 = vpop.f32.mrf.mxu3 }
 0x769   : > { %v839_v48 = vadd.f32 %v1644_v46, %v838_v47 }
 0x76b   : > { %v841_v49 = vadd.f32 %v839_v48, %v775_v38 }
 0x76d   : > { %v842_v50 = vsel %vm270_vm0, %v841_v49, 0.0 }
 0x76e   : > { %843 = vadd.xlane.f32.xlu1 %v842_v50 }
 0x7e1   : > { %v844_v51 = vpop.xlane.xlu1 %843 }
 0x7e2   : > { %v845_v52 = vmul.f32 %v844_v51, %v1865_v1 }
 0x7e4   : > { %v846_v53 = vsub.f32 %v841_v49, %v845_v52 }
 0x7e6   : > { %v847_v54 = vmul.f32 %v846_v53, %v846_v53 }
 0x7e8   : > { %v848_v55 = vsel %vm270_vm0, %v847_v54, 0.0 }
 0x7e9   : > { %849 = vadd.xlane.f32.xlu2 %v848_v55 }
 0x85c   : > { %v850_v5 = vpop.xlane.xlu2 %849 }
 0x85d   : > { %v851_v6 = vmul.f32 %v850_v5, %v1865_v1 }
 0x85f   : > { %v852_v7 = vadd.f32 1e-05, %v851_v6 }
 0x861   : > { %1667 = vrsqrt.f32 %v852_v7  ;;  %vm859_vm10 = vweird.f32 %v852_v7 }
 0x867   : > { %v1668_v10 = vpop.eup %1667 }
 0x868   : > { %v854_v11 = vmul.f32 %v1668_v10, %v852_v7  ;;  %vm860_vm9 = vweird.f32 %v1668_v10 }
 0x869   : > { %vm861_vm11 = vmor %vm859_vm10, %vm860_vm9 }
 0x86a   : > { %v855_v12 = vmul.f32 %v1668_v10, %v854_v11 }
 0x86c   : > { %v856_v13 = vmul.f32 0.5, %v855_v12 }
 0x86e   : > { %v857_v14 = vsub.f32 1.5, %v856_v13 }
 0x870   : > { %v858_v8 = vmul.f32 %v1668_v10, %v857_v14 }
 0x872   : > { %v862_v16 = vsel %vm861_vm11, %v1668_v10, %v858_v8 }
 0x873   : > { %v863_v17 = vmul.f32 %v862_v16, %v846_v53 }
 0x875   : > { %v865_v19 = vmul.f32 %v864_v15, %v863_v17 }
 0x877   : > { %v1958_v20 = vadd.f32 %v866_v18, %v865_v19 }
 0x879   : > { %1595 = vmatmul.msk.f32.vlgmr.msra.gmra.mxu0 %vm270_vm0, %v1958_v20  ;;  %1596 = vmatmul.msk.f32.vlgmr.msrb.gmra.mxu1 %vm270_vm0, %v1958_v20 }
 0x87a   : > { %1597 = vmatmul.msk.f32.vlgmr.msrb.gmra.mxu2 %vm270_vm0, %v1958_v20 }
 0x8f6   : > { %v912_v23 = vpop.f32.mrf.mxu0  ;;  %v934_v24 = vpop.f32.mrf.mxu1 }
 0x8f7   : > { %v913_v25 = vadd.f32 %v912_v23, %v891_v22  ;;  %v935_v26 = vadd.f32 %v934_v24, %v916_v9 }
 0x8f9   : > { %v915_v27 = vmul.f32 0.35355338, %v913_v25  ;;  %1033 = vrot.lane.b32.xlu2 %v935_v26, %s1698_s24  ;;  %1598 = vmatpush.xpose.msk.msrb.mxu0 %vm337_vm1, %v935_v26 }
 0x8fc   : > { %1599 = vmatmul.msk.f32.vlgmr.msrb.gmra.mxu0 %vm337_vm1, %v915_v27 }
 0x8fd   : > { %v955_v29 = vpop.f32.mrf.mxu2 }
 0x8fe   : > { %v1977_v30 = vadd.f32 %v955_v29, %v937_v28 }
 0x900   : > { %1026 = vmatpush.msra.mxu1 %v1977_v30 }
 0x901   : > { %1156 = vrot.lane.b32.xlu2 %v915_v27, %s1697_s23 }
 0x902   : > { %1151 = vmatpush.msrb.mxu1 %v1591_v40 }
 0x953   : > { %v1034_v31 = vpop.permute.xlu2 %1033 }
 0x954   : > { %1601 = vmatpush.xpose.msk.msra.mxu2 %vm337_vm1, %v1034_v31 }
 0x95b   : > { %v1157_v57 = vpop.permute.xlu2 %1156 }
 0x979   : > { %v981_v32 = vpop.f32.mrf.mxu0 }
 0x97a   : > { %v984_v33 = vsel %vm337_vm1, %v981_v32, -inf }
 0x97b   : > { %985 = vmax.xlane.f32.xlu0 %v984_v33 }
 0x98f   : > { %1031 = vrot.lane.b32.xlu0 %v915_v27, %s1698_s24 }
 0x997   : > { %1260 = vrot.lane.b32.xlu0 %v935_v26, %s1699_s25 }
 0x9ee   : > { %v986_v34 = vpop.xlane.xlu0 %985 }
 0x9ef   : > { %v987_v35 = vsub.f32 %v981_v32, %v986_v34 }
 0x9f1   : > { %v988_v37 = vmul.f32 1.442695, %v987_v35 }
 0x9f3   : > { %1669 = vpow2.f32 %v988_v37 }
 0x9f9   : > { %v1670_v36 = vpop.eup %1669 }
 0x9fa   : > { %v990_v38 = vsel %vm337_vm1, %v1670_v36, 0.0 }
 0x9fb   : > { %991 = vadd.xlane.f32.xlu1 %v990_v38 }
 0xa01   : > { %v1032_v39 = vpop.permute.xlu0 %1031 }
 0xa02   : > { %1602 = vmatmul.msk.f32.vlgmr.msra.gmra.mxu2 %vm337_vm1, %v1032_v39 }
 0xa09   : > { %v1261_v53 = vpop.permute.xlu0 %1260 }
 0xa14   : > { %1158 = vrot.lane.b32.xlu1 %v935_v26, %s1697_s23 }
 0xa1c   : > { %1258 = vrot.lane.b32.xlu1 %v915_v27, %s1699_s25  ;;  %v1592_v27 = vld [vmem:[%s2096_s1 + $0xe8] sm:$0xff] }
 0xa1d   : > { %1128 = vmatpush.msra.mxu0 %v1592_v27 }
 0xa6e   : > { %v992_v41 = vpop.xlane.xlu1 %991 }
 0xa6f   : > { %1671 = vrcp.f32 %v992_v41  ;;  %v1004_v45 = vand.u32 2147483648, %v992_v41  ;;  %v1002_v47 = vand.u32 2147483647, %v992_v41  ;;  %vm998_vm13 = vweird.f32 %v992_v41 }
 0xa71   : > { %v1005_v49 = vor.u32 1.1754944e-38, %v1004_v45  ;;  %vm1003_vm15 = vcmp.eq.f32.partialorder %v1002_v47, 8.507059e+37 }
 0xa75   : > { %v1672_v42 = vpop.eup %1671 }
 0xa76   : > { %v994_v43 = vmul.f32 %v1672_v42, %v992_v41  ;;  %vm999_vm12 = vweird.f32 %v1672_v42 }
 0xa77   : > { %vm1000_vm14 = vmor %vm998_vm13, %vm999_vm12 }
 0xa78   : > { %v995_v44 = vsub.f32 1.0, %v994_v43 }
 0xa7a   : > { %v996_v46 = vmul.f32 %v1672_v42, %v995_v44 }
 0xa7c   : > { %v997_v48 = vadd.f32 %v1672_v42, %v996_v46 }
 0xa7e   : > { %v1001_v50 = vsel %vm1000_vm14, %v1672_v42, %v997_v48 }
 0xa7f   : > { %v1006_v51 = vsel %vm1003_vm15, %v1005_v49, %v1001_v50  ;;  %v1593_v49 = vld [vmem:[%s2096_s1 + $0xf0] sm:$0xff] }
 0xa80   : > { %v1007_v52 = vmul.f32 %v1670_v36, %v1006_v51  ;;  %1252 = vmatpush.msrb.mxu0 %v1593_v49  ;;  %v1646_v49 = vld [vmem:[%s2100_s5 + $0x18] ss:$0 sm:$0xff] }
 0xa82   : > { %1600 = vmatmul.msk.f32.vlgmr.msra.gmra.mxu1 %vm337_vm1, %v1007_v52 }
 0xa83   : > { %1610 = vmatpush.xpose.msk.msra.mxu1 %vm337_vm1, %v1261_v53 }
 0xa85   : > { %v1056_v54 = vpop.f32.mrf.mxu2 }
 0xa86   : > { %v1159_v55 = vpop.permute.xlu1 %1158  ;;  %v1059_v56 = vsel %vm337_vm1, %v1056_v54, -inf }
 0xa87   : > { %1606 = vmatpush.xpose.msk.msrb.mxu2 %vm337_vm1, %v1159_v55  ;;  %1060 = vmax.xlane.f32.xlu0 %v1059_v56 }
 0xa8a   : > { %1607 = vmatmul.msk.f32.vlgmr.msrb.gmra.mxu2 %vm337_vm1, %v1157_v57 }
 0xa8e   : > { %v1259_v0 = vpop.permute.xlu1 %1258 }
 0xafa   : > { %v1061_v58 = vpop.xlane.xlu0 %1060 }
 0xafb   : > { %v1062_v59 = vsub.f32 %v1056_v54, %v1061_v58 }
 0xafd   : > { %v1063_v60 = vmul.f32 1.442695, %v1062_v59 }
 0xaff   : > { %1673 = vpow2.f32 %v1063_v60  ;;  %v1028_v61 = vpop.f32.mrf.mxu1 }
 0xb00   : > { %1605 = vmatmul.msk.f32.vlgmr.msrb.gmra.mxu1 %vm337_vm1, %v1028_v61 }
 0xb05   : > { %v1674_v62 = vpop.eup %1673 }
 0xb06   : > { %v1065_v63 = vsel %vm337_vm1, %v1674_v62, 0.0 }
 0xb07   : > { %1066 = vadd.xlane.f32.xlu0 %v1065_v63 }
 0xb08   : > { %1611 = vmatmul.msk.f32.vlgmr.msra.gmra.mxu1 %vm337_vm1, %v1259_v0 }
 0xb0d   : > { %v1181_v2 = vpop.f32.mrf.mxu2 }
 0xb0e   : > { %v1184_v3 = vsel %vm337_vm1, %v1181_v2, -inf }
 0xb0f   : > { %1185 = vmax.xlane.f32.xlu1 %v1184_v3 }
 0xb1b   : > { %1084 = vrot.lane.b32.xlu0 %v1977_v30, %s1698_s24 }
 0xb7a   : > { %v1067_v4 = vpop.xlane.xlu0 %1066 }
 0xb7b   : > { %1675 = vrcp.f32 %v1067_v4  ;;  %v1079_v13 = vand.u32 2147483648, %v1067_v4  ;;  %v1077_v16 = vand.u32 2147483647, %v1067_v4  ;;  %vm1073_vm3 = vweird.f32 %v1067_v4 }
 0xb7d   : > { %v2003_v5 = vpop.f32.mrf.mxu1  ;;  %v1080_v19 = vor.u32 1.1754944e-38, %v1079_v13  ;;  %vm1078_vm5 = vcmp.eq.f32.partialorder %v1077_v16, 8.507059e+37 }
 0xb81   : > { %v1676_v6 = vpop.eup %1675 }
 0xb82   : > { %v1069_v7 = vmul.f32 %v1676_v6, %v1067_v4  ;;  %v1186_v10 = vpop.xlane.xlu1 %1185  ;;  %vm1074_vm2 = vweird.f32 %v1676_v6 }
 0xb83   : > { %v1187_v11 = vsub.f32 %v1181_v2, %v1186_v10  ;;  %vm1075_vm4 = vmor %vm1073_vm3, %vm1074_vm2 }
 0xb84   : > { %v1070_v12 = vsub.f32 1.0, %v1069_v7 }
 0xb85   : > { %v1188_v14 = vmul.f32 1.442695, %v1187_v11  ;;  %v1283_v8 = vpop.f32.mrf.mxu1 }
 0xb86   : > { %v1071_v15 = vmul.f32 %v1676_v6, %v1070_v12  ;;  %v1286_v17 = vsel %vm337_vm1, %v1283_v8, -inf }
 0xb87   : > { %1677 = vpow2.f32 %v1188_v14  ;;  %1287 = vmax.xlane.f32.xlu2 %v1286_v17 }
 0xb88   : > { %v1072_v18 = vadd.f32 %v1676_v6, %v1071_v15 }
 0xb8a   : > { %v1076_v22 = vsel %vm1075_vm4, %v1676_v6, %v1072_v18  ;;  %v1360_v6 = vperm.slane %v1969_v21, 3  ;;  %v1615_v18 = vld [vmem:[%s2097_s2 + $0x28] sm:$0xff] }
 0xb8b   : > { %v1081_v9 = vsel %vm1078_vm5, %v1080_v19, %v1076_v22  ;;  %v1614_v19 = vld [vmem:[%s2097_s2 + $0x20] sm:$0xff]  ;;  %v1627_v22 = vld [vmem:[%s2099_s4 + $0x78] sm:$0xff] }
 0xb8c   : > { %v1082_v23 = vmul.f32 %v1674_v62, %v1081_v9  ;;  %v1594_v62 = vld [vmem:[%s2096_s1 + $0xf8] sm:$0xff]  ;;  %v1626_v9 = vld [vmem:[%s2099_s4 + $0x70] sm:$0xff]  ;;  %1444 = vmatpush.msrb.mxu1 %v1627_v22 }
 0xb8d   : > { %v1678_v24 = vpop.eup %1677  ;;  %v1085_v25 = vpop.permute.xlu0 %1084 }
 0xb8e   : > { %1105 = vmatpush.msrb.mxu3 %v1085_v25  ;;  %v1190_v26 = vsel %vm337_vm1, %v1678_v24, 0.0  ;;  %1445 = vmatpush.msrb.mxu1 %v1626_v9 }
 0xb8f   : > { %1191 = vadd.xlane.f32.xlu1 %v1190_v26  ;;  %1603 = vmatmul.msk.f32.vlgmr.msrb.gmra.mxu3 %vm337_vm1, %v1082_v23  ;;  %v1625_v23 = vld [vmem:[%s2099_s4 + $0x68] sm:$0xff]  ;;  %v1624_v26 = vld [vmem:[%s2099_s4 + $0x60] sm:$0xff] }
 0xb90   : > { %1446 = vmatpush.msrb.mxu1 %v1625_v23 }
 0xb92   : > { %1447 = vmatpush.msrb.mxu1 %v1624_v26 }
 0xba8   : > { %1208 = vrot.lane.b32.xlu1 %v1977_v30, %s1697_s23 }
 0xbfa   : > { %v1288_v28 = vpop.xlane.xlu2 %1287 }
 0xbfb   : > { %v1289_v29 = vsub.f32 %v1283_v8, %v1288_v28  ;;  %v1623_v28 = vld [vmem:[%s2099_s4 + $0x58] sm:$0xff] }
 0xbfc   : > { %1448 = vmatpush.msrb.mxu1 %v1623_v28 }
 0xbfd   : > { %v1290_v31 = vmul.f32 1.442695, %v1289_v29 }
 0xbff   : > { %1679 = vpow2.f32 %v1290_v31 }
 0xc02   : > { %v1192_v32 = vpop.xlane.xlu1 %1191 }
 0xc03   : > { %1681 = vrcp.f32 %v1192_v32  ;;  %v1204_v40 = vand.u32 2147483648, %v1192_v32  ;;  %vm1198_vm7 = vweird.f32 %v1192_v32  ;;  %v1202_v41 = vand.u32 2147483647, %v1192_v32 }
 0xc05   : > { %v1680_v33 = vpop.eup %1679  ;;  %v1205_v44 = vor.u32 1.1754944e-38, %v1204_v40  ;;  %vm1203_vm10 = vcmp.eq.f32.partialorder %v1202_v41, 8.507059e+37 }
 0xc06   : > { %v1292_v34 = vsel %vm337_vm1, %v1680_v33, 0.0 }
 0xc07   : > { %1293 = vadd.xlane.f32.xlu2 %v1292_v34 }
 0xc09   : > { %v1682_v35 = vpop.eup %1681 }
 0xc0a   : > { %v1194_v37 = vmul.f32 %v1682_v35, %v1192_v32  ;;  %vm1199_vm6 = vweird.f32 %v1682_v35 }
 0xc0b   : > { %vm1200_vm9 = vmor %vm1198_vm7, %vm1199_vm6 }
 0xc0c   : > { %v1195_v36 = vsub.f32 1.0, %v1194_v37  ;;  %v1385_v37 = vperm.slane %v1969_v21, 4 }
 0xc0e   : > { %v1196_v38 = vmul.f32 %v1682_v35, %v1195_v36 }
 0xc10   : > { %v1197_v39 = vadd.f32 %v1682_v35, %v1196_v38 }
 0xc12   : > { %v1107_v42 = vpop.f32.mrf.mxu3  ;;  %v1201_v43 = vsel %vm1200_vm9, %v1682_v35, %v1197_v39  ;;  %v1387_v39 = vperm.slane %v1969_v21, 5 }
 0xc13   : > { %1604 = vmatmul.msk.f32.vlgmr.msra.gmra.mxu0 %vm337_vm1, %v1107_v42  ;;  %v1206_v45 = vsel %vm1203_vm10, %v1205_v44, %v1201_v43  ;;  %v1622_v42 = vld [vmem:[%s2099_s4 + $0x50] sm:$0xff]  ;;  %v1621_v43 = vld [vmem:[%s2099_s4 + $0x48] sm:$0xff]  ;;  %v1620_v44 = vld [vmem:[%s2099_s4 + $0x40] sm:$0xff] }
 0xc14   : > { %v1207_v47 = vmul.f32 %v1678_v24, %v1206_v45  ;;  %1449 = vmatpush.msrb.mxu1 %v1622_v42  ;;  %v1645_v45 = vld [vmem:[%s2098_s3 + $0x1] ss:$0 sm:$0xff] }
 0xc16   : > { %1450 = vmatpush.msrb.mxu1 %v1621_v43 }
 0xc18   : > { %1451 = vmatpush.msrb.mxu1 %v1620_v44 }
 0xc1a   : > { %v1209_v46 = vpop.permute.xlu1 %1208 }
 0xc1b   : > { %1229 = vmatpush.msra.mxu3 %v1209_v46 }
 0xc1c   : > { %1608 = vmatmul.msk.f32.vlgmr.msra.gmra.mxu3 %vm337_vm1, %v1207_v47 }
 0xc1d   : > { %1354 = vmatpush.msrb.mxu3 %v1594_v62 }
 0xc1f   : > { %1310 = vrot.lane.b32.xlu2 %v1977_v30, %s1699_s25 }
 0xc7a   : > { %v1294_v48 = vpop.xlane.xlu2 %1293 }
 0xc7b   : > { %1683 = vrcp.f32 %v1294_v48  ;;  %v1306_v54 = vand.u32 2147483648, %v1294_v48  ;;  %v1304_v56 = vand.u32 2147483647, %v1294_v48  ;;  %vm1300_vm12 = vweird.f32 %v1294_v48 }
 0xc7d   : > { %v1307_v30 = vor.u32 1.1754944e-38, %v1306_v54  ;;  %vm1305_vm14 = vcmp.eq.f32.partialorder %v1304_v56, 8.507059e+37 }
 0xc81   : > { %v1684_v50 = vpop.eup %1683 }
 0xc82   : > { %v1296_v51 = vmul.f32 %v1684_v50, %v1294_v48  ;;  %v1311_v52 = vpop.permute.xlu2 %1310  ;;  %vm1301_vm11 = vweird.f32 %v1684_v50 }
 0xc83   : > { %1331 = vmatpush.msra.mxu2 %v1311_v52  ;;  %vm1302_vm13 = vmor %vm1300_vm12, %vm1301_vm11 }
 0xc84   : > { %v1297_v53 = vsub.f32 1.0, %v1296_v51 }
 0xc86   : > { %v1298_v55 = vmul.f32 %v1684_v50, %v1297_v53 }
 0xc88   : > { %v1299_v57 = vadd.f32 %v1684_v50, %v1298_v55 }
 0xc8a   : > { %v1303_v58 = vsel %vm1302_vm13, %v1684_v50, %v1299_v57 }
 0xc8b   : > { %v1308_v59 = vsel %vm1305_vm14, %v1307_v30, %v1303_v58 }
 0xc8c   : > { %v1309_v60 = vmul.f32 %v1680_v33, %v1308_v59 }
 0xc8e   : > { %1612 = vmatmul.msk.f32.vlgmr.msra.gmra.mxu2 %vm337_vm1, %v1309_v60 }
 0xc90   : > { %v1130_v0 = vpop.f32.mrf.mxu0 }
 0xc91   : > { %v1154_v3 = vadd.f32 %v2003_v5, %v1130_v0  ;;  %v1617_v5 = vld [vmem:[%s2097_s2 + $0x38] sm:$0xff] }
 0xc92   : > { %1414 = vmatpush.msra.mxu0 %v1617_v5 }
 0xc9f   : > { %v1231_v61 = vpop.f32.mrf.mxu3 }
 0xca0   : > { %1609 = vmatmul.msk.f32.vlgmr.msrb.gmra.mxu0 %vm337_vm1, %v1231_v61 }
 0xd11   : > { %v1333_v63 = vpop.f32.mrf.mxu2 }
 0xd12   : > { %1613 = vmatmul.msk.f32.vlgmr.msrb.gmra.mxu3 %vm337_vm1, %v1333_v63 }
 0xd1d   : > { %v1254_v2 = vpop.f32.mrf.mxu0 }
 0xd1e   : > { %v1257_v4 = vadd.f32 %v1254_v2, %v1154_v3 }
 0xd95   : > { %v1356_v7 = vpop.f32.mrf.mxu3 }
 0xd96   : > { %v1359_v10 = vadd.f32 %v1356_v7, %v1257_v4  ;;  %v1479_v4 = vperm.slane %v1969_v21, 6  ;;  %v1481_v7 = vperm.slane %v1969_v21, 7 }
 0xd98   : > { %v1361_v11 = vadd.f32 %v1360_v6, %v1359_v10 }
 0xd9a   : > { %v1362_v12 = vadd.f32 %v1361_v11, %v1958_v20  ;;  %v1616_v20 = vld [vmem:[%s2097_s2 + $0x30] sm:$0xff] }
 0xd9b   : > { %1415 = vmatpush.msra.mxu0 %v1616_v20 }
 0xd9c   : > { %v1363_v13 = vsel %vm270_vm0, %v1362_v12, 0.0 }
 0xd9d   : > { %1364 = vadd.xlane.f32.xlu0 %v1363_v13  ;;  %1416 = vmatpush.msra.mxu0 %v1615_v18 }
 0xd9f   : > { %1417 = vmatpush.msra.mxu0 %v1614_v19 }
 0xe10   : > { %v1365_v14 = vpop.xlane.xlu0 %1364 }
 0xe11   : > { %v1366_v8 = vmul.f32 %v1365_v14, %v1865_v1 }
 0xe13   : > { %v1367_v15 = vsub.f32 %v1362_v12, %v1366_v8 }
 0xe15   : > { %v1368_v16 = vmul.f32 %v1367_v15, %v1367_v15 }
 0xe17   : > { %v1369_v17 = vsel %vm270_vm0, %v1368_v16, 0.0 }
 0xe18   : > { %1370 = vadd.xlane.f32.xlu2 %v1369_v17 }
 0xe8b   : > { %v1371_v24 = vpop.xlane.xlu2 %1370 }
 0xe8c   : > { %v1372_v25 = vmul.f32 %v1371_v24, %v1865_v1 }
 0xe8e   : > { %v1373_v27 = vadd.f32 1e-05, %v1372_v25 }
 0xe90   : > { %1685 = vrsqrt.f32 %v1373_v27  ;;  %vm1380_vm15 = vweird.f32 %v1373_v27 }
 0xe96   : > { %v1686_v29 = vpop.eup %1685 }
 0xe97   : > { %v1375_v31 = vmul.f32 %v1686_v29, %v1373_v27  ;;  %vm1381_vm1 = vweird.f32 %v1686_v29 }
 0xe98   : > { %vm1382_vm2 = vmor %vm1380_vm15, %vm1381_vm1 }
 0xe99   : > { %v1376_v32 = vmul.f32 %v1686_v29, %v1375_v31 }
 0xe9b   : > { %v1377_v33 = vmul.f32 0.5, %v1376_v32 }
 0xe9d   : > { %v1378_v34 = vsub.f32 1.5, %v1377_v33 }
 0xe9f   : > { %v1379_v35 = vmul.f32 %v1686_v29, %v1378_v34 }
 0xea1   : > { %v1383_v36 = vsel %vm1382_vm2, %v1686_v29, %v1379_v35 }
 0xea2   : > { %v1384_v38 = vmul.f32 %v1383_v36, %v1367_v15 }
 0xea4   : > { %v1386_v40 = vmul.f32 %v1385_v37, %v1384_v38 }
 0xea6   : > { %v1388_v41 = vadd.f32 %v1387_v39, %v1386_v40 }
 0xea8   : > { %1619 = vmatmul.msk.f32.vlgmr.msra.gmra.mxu0 %vm270_vm0, %v1388_v41 }
 0xf25   : > { %v1419_v46 = vpop.f32.mrf.mxu0 }
 0xf26   : > { %v1420_v47 = vadd.f32 %v1645_v45, %v1419_v46 }
 0xf28   : > { %v1422_v48 = vmax.f32 %v1420_v47, 0.0 }
 0xf2a   : > { %1628 = vmatmul.msk.f32.vlgmr.msrb.gmra.mxu1 %vm817_vm8, %v1422_v48 }
 0xfa7   : > { %v1453_v50 = vpop.f32.mrf.mxu1 }
 0xfa8   : > { %v1454_v51 = vadd.f32 %v1646_v49, %v1453_v50 }
 0xfaa   : > { %v1456_v52 = vadd.f32 %v1454_v51, %v1388_v41 }
 0xfac   : > { %v1457_v53 = vsel %vm270_vm0, %v1456_v52, 0.0 }
 0xfad   : > { %1458 = vadd.xlane.f32.xlu1 %v1457_v53 }
0x1020   : > { %v1459_v54 = vpop.xlane.xlu1 %1458 }
0x1021   : > { %v1460_v55 = vmul.f32 %v1459_v54, %v1865_v1 }
0x1023   : > { %v1461_v56 = vsub.f32 %v1456_v52, %v1460_v55 }
0x1025   : > { %v1462_v57 = vmul.f32 %v1461_v56, %v1461_v56 }
0x1027   : > { %v1463_v30 = vsel %vm270_vm0, %v1462_v57, 0.0 }
0x1028   : > { %1464 = vadd.xlane.f32.xlu0 %v1463_v30 }
0x109b   : > { %v1465_v58 = vpop.xlane.xlu0 %1464 }
0x109c   : > { %v1466_v59 = vmul.f32 %v1465_v58, %v1865_v1 }
0x109e   : > { %v1467_v60 = vadd.f32 1e-05, %v1466_v59 }
0x10a0   : > { %1687 = vrsqrt.f32 %v1467_v60  ;;  %vm1474_vm3 = vweird.f32 %v1467_v60 }
0x10a6   : > { %v1688_v61 = vpop.eup %1687 }
0x10a7   : > { %v1469_v62 = vmul.f32 %v1688_v61, %v1467_v60  ;;  %vm1475_vm8 = vweird.f32 %v1688_v61 }
0x10a8   : > { %vm1476_vm4 = vmor %vm1474_vm3, %vm1475_vm8 }
0x10a9   : > { %v1470_v63 = vmul.f32 %v1688_v61, %v1469_v62 }
0x10ab   : > { %v1471_v0 = vmul.f32 0.5, %v1470_v63 }
0x10ad   : > { %v1472_v2 = vsub.f32 1.5, %v1471_v0 }
0x10af   : > { %v1473_v3 = vmul.f32 %v1688_v61, %v1472_v2 }
0x10b1   : > { %v1477_v6 = vsel %vm1476_vm4, %v1688_v61, %v1473_v3 }
0x10b2   : > { %v1478_v10 = vmul.f32 %v1477_v6, %v1461_v56 }
0x10b4   : > { %v1480_v11 = vmul.f32 %v1479_v4, %v1478_v10 }
0x10b6   : > { %v1482_v1 = vadd.f32 %v1481_v7, %v1480_v11 }
0x10b8   : > { %1483 = vst.msk [vmem:[%s246_s15] sm:$0xff] %vm270_vm0, %v1482_v1 }
0x10b9 PF: > { %s16_s21 = sadd.s32 1, %s1695_s21  }
0x10ba   : > { %p13_p4 = scmp.ge.s32.totalorder %s16_s21, 4  }
0x10bc   :  { %15 = sbr.rel (!%p13_p4) target bundleno = 1 (0x1), region = 85 }

// kernel: transformer_forward.3
= control target key start
LH: loop header
LB: loop body
LE: loop exit
PB: predicated region body
PF: predicated region fallthrough
CT: control target
= control target key end

     0   :  { %12 = vsyncpa [#allocation3], 0  ;;  %s3707_s0 = inlined_call_operand.vmem [shape: f32[2,8,32], index: 0, kind: input, shape index: {}]   ;;  %s3708_s1 = inlined_call_operand.vmem [shape: f32[2,8,32], index: 1, kind: input, shape index: {}]   ;;  %s3709_s2 = inlined_call_operand.vmem [shape: f32[16,32,32], index: 2, kind: input, shape index: {}]   ;;  %s3710_s3 = inlined_call_operand.vmem [shape: f32[2,32,64], index: 3, kind: input, shape index: {}]   ;;  %s3711_s4 = inlined_call_operand.vmem [shape: f32[2,1,64], index: 4, kind: input, shape index: {}]   ;;  %s3712_s5 = inlined_call_operand.vmem [shape: f32[2,64,32], index: 5, kind: input, shape index: {}]   ;;  %s3713_s6 = inlined_call_operand.vmem [shape: f32[2,15,32], index: 6, kind: input, shape index: {}]   ;;  %s3714_s7 = inlined_call_operand.hbm [shape: f32[2,8,32], index: 7, kind: output, shape index: {}]  }
   0x1   :  { %14 = vsyncpa [#allocation3 + $0x1], 0  ;;  %s3053_s24 = smov 0   ;;  %s3055_s25 = smov 0  }
   0x2   :  { %s3057_s26 = smov 0   ;;  %s3059_s27 = smov 0  }
   0x3 LB: > { %s3074_s28 = sadd.s32 4294967295, %s3007_s27   ;;  %s2655_s29 = sadd.s32 4294967294, %s3007_s27   ;;  %s3007_s27 = sphi %s3059_s27, %s3723_s27   ;;  %s3003_s26 = sphi %s3057_s26, %s3722_s26   ;;  %s2999_s25 = sphi %s3055_s25, %s3721_s25   ;;  %s2995_s24 = sphi %s3053_s24, %s3720_s24  }
   0x4   : > { %s3078_s30 = sadd.s32 1, %s3007_s27   ;;  %s184_s8 = sadd.s32 1, %s3003_s26 }
   0x5   : > { %s181_s9 = ssub.s32 %s3007_s27, %s3078_s30  ;;  %p194_p0 = scmp.ne.s32.totalorder %s3003_s26, %s2999_s25 }
   0x6   : > { %p182_p1 = scmp.eq.s32.totalorder %s181_s9, 0  ;;  %p195_p2 = scmp.eq.s32.totalorder %s3074_s28, 1 }
   0x7   : > { %p200_p3 = scmp.ne.s32.totalorder %s2999_s25, %s2995_s24  ;;  %p201_p4 = scmp.eq.s32.totalorder %s2655_s29, 1 }
   0x8   : > { %s3089_s10 = scalar_select %p182_p1, %s3003_s26, %s184_s8  }
   0x9   : > { %p3091_p5 = por %p195_p2, %p194_p0  ;;  %p3095_p6 = por %p201_p4, %p200_p3 }
   0xa   : > { %p2658_p7 = scmp.ge.s32.totalorder %s3007_s27, 1  ;;  %p248_p8 = scmp.lt.s32.totalorder %s3007_s27, 3 }
   0xc   : > { %p249_p9 = pnand %p2658_p7, %p248_p8 }
   0xd   : > { %p283_p10 = scmp.lt.s32.totalorder (!%p249_p9), %s3074_s28, 1  ;;  %s3715_s22 = smov (!%p249_p9), 112  }
   0xe   : > { %252 = sbr.rel (%p249_p9) target bundleno = 7484 (0x1d3c), region = 48  ;;  %s3010_s23 = smov (!%p249_p9), 120  }
   0xf   : > { %s3011_s29 = smov (!%p249_p9), 104   ;;  %s3719_s20 = smov (!%p249_p9), 112  }
  0x10   : > { %s2818_s14 = sshll.u32 (!%p249_p9), %s3074_s28, 3 }
  0x13   : > { %v2665_v0 = vld [vmem:[%s3709_s2 + $0x38] sm:$0xff]  ;;  %v2664_v2 = vld [vmem:[%s3709_s2 + $0x30] sm:$0xff]  ;;  %v2663_v4 = vld [vmem:[%s3709_s2 + $0x28] sm:$0xff]  ;;  %s3121_s8 = scalar_select %p283_p10, %s3074_s28, 1  ;;  %vm315_vm0 = vcmask 261120   ;;  %vm382_vm1 = vcmask 64512  }
  0x14   : > { %v298_v1 = vld [vmem:[%s3709_s2 + $0x18] sm:$0xff]  ;;  %353 = vmatpush.msra.mxu1 %v2665_v0  ;;  %v297_v3 = vld [vmem:[%s3709_s2 + $0x10] sm:$0xff]  ;;  %v296_v5 = vld [vmem:[%s3709_s2 + $0x8] sm:$0xff] }
  0x15   : > { %331 = vmatpush.msra.mxu0 %v298_v1  ;;  %v2662_v6 = vld [vmem:[%s3709_s2 + $0x20] sm:$0xff]  ;;  %s2660_s16 = sshll.u32 %s3121_s8, 3  ;;  %v2669_v22 = vld [vmem:[%s3709_s2 + $0x58] sm:$0xff]  ;;  %v2668_v23 = vld [vmem:[%s3709_s2 + $0x50] sm:$0xff] }
  0x16   : > { %354 = vmatpush.msra.mxu1 %v2664_v2  ;;  %v295_v7 = vld [vmem:[%s3709_s2] sm:$0xff]  ;;  %s286_s19 = scalar_lea.vmem %s3707_s0, %s2660_s16  ;;  %374 = vmatpush.msra.mxu2 %v2669_v22  ;;  %v2667_v24 = vld [vmem:[%s3709_s2 + $0x48] sm:$0xff]  ;;  %s3239_s17 = scalar_lea.vmem %s3708_s1, %s2660_s16 }
  0x17   : > { %332 = vmatpush.msra.mxu0 %v297_v3  ;;  %v3135_v8 = vld [vmem:[%s286_s19] sm:$0xff] }
  0x18   : > { %355 = vmatpush.msra.mxu1 %v2663_v4  ;;  %v3144_v9 = vld [vmem:[%s3713_s6] sm:$0xff]  ;;  %375 = vmatpush.msra.mxu2 %v2668_v23 }
  0x19   : > { %333 = vmatpush.msra.mxu0 %v296_v5  ;;  %v340_v10 = vperm.slane %v3144_v9, 1  ;;  %v314_v11 = vperm.slane %v3144_v9, 0  ;;  %v2666_v25 = vld [vmem:[%s3709_s2 + $0x40] sm:$0xff]  ;;  %v361_v33 = vperm.slane %v3144_v9, 2 }
  0x1a   : > { %356 = vmatpush.msra.mxu1 %v2662_v6  ;;  %376 = vmatpush.msra.mxu2 %v2667_v24  ;;  %v2670_v37 = vld [vmem:[%s3709_s2 + $0x60] sm:$0xff] }
  0x1b   : > { %334 = vmatpush.msra.mxu0 %v295_v7  ;;  %2675 = vmatmul.msk.f32.vlgmr.msra.gmra.mxu1 %vm315_vm0, %v3135_v8 }
  0x1c   : > { %2674 = vmatmul.msk.f32.vlgmr.msra.gmra.mxu0 %vm315_vm0, %v3135_v8  ;;  %377 = vmatpush.msra.mxu2 %v2666_v25 }
  0x1d   : > { %2676 = vmatmul.msk.f32.vlgmr.msra.gmra.mxu2 %vm315_vm0, %v3135_v8 }
  0x98   : > { %v358_v12 = vpop.f32.mrf.mxu1 }
  0x99   : > { %v336_v13 = vpop.f32.mrf.mxu0  ;;  %v359_v14 = vadd.f32 %v358_v12, %v340_v10 }
  0x9a   : > { %v337_v15 = vadd.f32 %v336_v13, %v314_v11 }
  0x9b   : > { %583 = vrot.lane.b32.xlu2 %v359_v14, %s3715_s22  ;;  %458 = vrot.lane.b32.xlu1 %v359_v14, %s3010_s23 }
  0x9c   : > { %v339_v16 = vmul.f32 0.35355338, %v337_v15  ;;  %2677 = vmatpush.xpose.msk.msrb.mxu0 %vm382_vm1, %v359_v14 }
  0x9f   : > { %2678 = vmatmul.msk.f32.vlgmr.msrb.gmra.mxu0 %vm382_vm1, %v339_v16 }
  0xa0   : > { %v379_v35 = vpop.f32.mrf.mxu2 }
  0xa1   : > { %v3177_v36 = vadd.f32 %v379_v35, %v361_v33 }
  0xa3   : > { %685 = vrot.lane.b32.xlu2 %v359_v14, %s3011_s29  ;;  %456 = vrot.lane.b32.xlu1 %v339_v16, %s3010_s23 }
  0xa4   : > { %451 = vmatpush.msra.mxu3 %v3177_v36 }
  0xa6   : > { %576 = vmatpush.msrb.mxu3 %v2670_v37 }
  0xab   : > { %683 = vrot.lane.b32.xlu1 %v339_v16, %s3011_s29 }
  0xf5   : > { %v584_v18 = vpop.permute.xlu2 %583 }
  0xfd   : > { %v686_v34 = vpop.permute.xlu2 %685 }
 0x10d   : > { %v459_v17 = vpop.permute.xlu1 %458 }
 0x10e   : > { %2680 = vmatpush.xpose.msk.msra.mxu0 %vm382_vm1, %v459_v17 }
 0x112   : > { %2685 = vmatpush.xpose.msk.msrb.mxu0 %vm382_vm1, %v584_v18 }
 0x115   : > { %v457_v19 = vpop.permute.xlu1 %456 }
 0x116   : > { %2681 = vmatmul.msk.f32.vlgmr.msra.gmra.mxu0 %vm382_vm1, %v457_v19 }
 0x11c   : > { %v406_v20 = vpop.f32.mrf.mxu0 }
 0x11d   : > { %v409_v21 = vsel %vm382_vm1, %v406_v20, -inf  ;;  %v684_v59 = vpop.permute.xlu1 %683 }
 0x11e   : > { %410 = vmax.xlane.f32.xlu0 %v409_v21 }
 0x191   : > { %v411_v26 = vpop.xlane.xlu0 %410 }
 0x192   : > { %v412_v27 = vsub.f32 %v406_v20, %v411_v26  ;;  %v2671_v26 = vld [vmem:[%s3709_s2 + $0x68] sm:$0xff] }
 0x193   : > { %v481_v28 = vpop.f32.mrf.mxu0  ;;  %553 = vmatpush.msrb.mxu2 %v2671_v26 }
 0x194   : > { %v413_v29 = vmul.f32 1.442695, %v412_v27  ;;  %v484_v30 = vsel %vm382_vm1, %v481_v28, -inf }
 0x195   : > { %485 = vmax.xlane.f32.xlu2 %v484_v30 }
 0x196   : > { %2866 = vpow2.f32 %v413_v29 }
 0x19c   : > { %v2867_v31 = vpop.eup %2866 }
 0x19d   : > { %v415_v32 = vsel %vm382_vm1, %v2867_v31, 0.0 }
 0x19e   : > { %416 = vadd.xlane.f32.xlu0 %v415_v32 }
 0x1b2   : > { %581 = vrot.lane.b32.xlu0 %v339_v16, %s3715_s22 }
 0x208   : > { %v486_v38 = vpop.xlane.xlu2 %485 }
 0x209   : > { %v487_v39 = vsub.f32 %v481_v28, %v486_v38 }
 0x20b   : > { %v488_v40 = vmul.f32 1.442695, %v487_v39 }
 0x20d   : > { %2868 = vpow2.f32 %v488_v40 }
 0x211   : > { %v417_v41 = vpop.xlane.xlu0 %416 }
 0x212   : > { %2870 = vrcp.f32 %v417_v41  ;;  %v429_v47 = vand.u32 2147483648, %v417_v41  ;;  %v427_v49 = vand.u32 2147483647, %v417_v41  ;;  %vm423_vm3 = vweird.f32 %v417_v41 }
 0x213   : > { %v2869_v42 = vpop.eup %2868 }
 0x214   : > { %v490_v43 = vsel %vm382_vm1, %v2869_v42, 0.0  ;;  %v430_v51 = vor.u32 1.1754944e-38, %v429_v47  ;;  %vm428_vm5 = vcmp.eq.f32.partialorder %v427_v49, 8.507059e+37 }
 0x215   : > { %491 = vadd.xlane.f32.xlu2 %v490_v43 }
 0x218   : > { %v2871_v44 = vpop.eup %2870 }
 0x219   : > { %v419_v45 = vmul.f32 %v2871_v44, %v417_v41  ;;  %vm424_vm2 = vweird.f32 %v2871_v44 }
 0x21a   : > { %vm425_vm4 = vmor %vm423_vm3, %vm424_vm2 }
 0x21b   : > { %v420_v46 = vsub.f32 1.0, %v419_v45 }
 0x21d   : > { %v421_v48 = vmul.f32 %v2871_v44, %v420_v46 }
 0x21f   : > { %v422_v50 = vadd.f32 %v2871_v44, %v421_v48 }
 0x221   : > { %v426_v52 = vsel %vm425_vm4, %v2871_v44, %v422_v50 }
 0x222   : > { %v431_v53 = vsel %vm428_vm5, %v430_v51, %v426_v52  ;;  %v2673_v52 = vld [vmem:[%s3709_s2 + $0x78] sm:$0xff] }
 0x223   : > { %v432_v54 = vmul.f32 %v2867_v31, %v431_v53  ;;  %v2672_v53 = vld [vmem:[%s3709_s2 + $0x70] sm:$0xff] }
 0x224   : > { %v582_v55 = vpop.permute.xlu0 %581  ;;  %677 = vmatpush.msra.mxu2 %v2672_v53  ;;  %v2701_v53 = vld [vmem:[%s3709_s2 + $0xc0] sm:$0xff] }
 0x225   : > { %2679 = vmatmul.msk.f32.vlgmr.msra.gmra.mxu3 %vm382_vm1, %v432_v54  ;;  %2686 = vmatmul.msk.f32.vlgmr.msrb.gmra.mxu0 %vm382_vm1, %v582_v55 }
 0x226   : > { %2689 = vmatpush.xpose.msk.msra.mxu3 %vm382_vm1, %v686_v34 }
 0x288   : > { %v492_v4 = vpop.xlane.xlu2 %491 }
 0x289   : > { %v504_v12 = vand.u32 2147483648, %v492_v4  ;;  %vm498_vm7 = vweird.f32 %v492_v4  ;;  %v502_v13 = vand.u32 2147483647, %v492_v4 }
 0x28b   : > { %v505_v16 = vor.u32 1.1754944e-38, %v504_v12  ;;  %vm503_vm9 = vcmp.eq.f32.partialorder %v502_v13, 8.507059e+37 }
 0x2a2   : > { %v606_v56 = vpop.f32.mrf.mxu0 }
 0x2a3   : > { %v609_v57 = vsel %vm382_vm1, %v606_v56, -inf }
 0x2a4   : > { %610 = vmax.xlane.f32.xlu1 %v609_v57 }
 0x2a8   : > { %v453_v58 = vpop.f32.mrf.mxu3 }
 0x2a9   : > { %2684 = vmatmul.msk.f32.vlgmr.msrb.gmra.mxu3 %vm382_vm1, %v453_v58 }
 0x2b1   : > { %2690 = vmatmul.msk.f32.vlgmr.msra.gmra.mxu3 %vm382_vm1, %v684_v59 }
 0x317   : > { %v611_v60 = vpop.xlane.xlu1 %610 }
 0x318   : > { %v612_v61 = vsub.f32 %v606_v56, %v611_v60  ;;  %v785_v60 = vperm.slane %v3144_v9, 3 }
 0x31a   : > { %v613_v62 = vmul.f32 1.442695, %v612_v61 }
 0x31c   : > { %2872 = vpow2.f32 %v613_v62 }
 0x31d   : > { %2874 = vrcp.f32 %v492_v4 }
 0x322   : > { %v3190_v63 = vpop.eup %2872 }
 0x323   : > { %v615_v0 = vsel %vm382_vm1, %v3190_v63, 0.0  ;;  %v2875_v5 = vpop.eup %2874 }
 0x324   : > { %616 = vadd.xlane.f32.xlu2 %v615_v0  ;;  %v494_v6 = vmul.f32 %v2875_v5, %v492_v4  ;;  %vm499_vm6 = vweird.f32 %v2875_v5 }
 0x325   : > { %vm500_vm8 = vmor %vm498_vm7, %vm499_vm6 }
 0x326   : > { %v495_v7 = vsub.f32 1.0, %v494_v6 }
 0x328   : > { %v496_v10 = vmul.f32 %v2875_v5, %v495_v7 }
 0x32a   : > { %v497_v11 = vadd.f32 %v2875_v5, %v496_v10 }
 0x32c   : > { %v3194_v1 = vpop.f32.mrf.mxu3  ;;  %v501_v15 = vsel %vm500_vm8, %v2875_v5, %v497_v11 }
 0x32d   : > { %v506_v17 = vsel %vm503_vm9, %v505_v16, %v501_v15  ;;  %v2700_v15 = vld [vmem:[%s3709_s2 + $0xb8] sm:$0xff]  ;;  %v2699_v16 = vld [vmem:[%s3709_s2 + $0xb0] sm:$0xff] }
 0x32e   : > { %v507_v19 = vmul.f32 %v2869_v42, %v506_v17  ;;  %882 = vmatpush.msrb.mxu3 %v2700_v15  ;;  %v2698_v17 = vld [vmem:[%s3709_s2 + $0xa8] sm:$0xff] }
 0x330   : > { %883 = vmatpush.msrb.mxu3 %v2699_v16 }
 0x332   : > { %884 = vmatpush.msrb.mxu3 %v2698_v17 }
 0x334   : > { %v708_v2 = vpop.f32.mrf.mxu3 }
 0x335   : > { %v711_v3 = vsel %vm382_vm1, %v708_v2, -inf }
 0x336   : > { %712 = vmax.xlane.f32.xlu0 %v711_v3  ;;  %v3012_v3 = vmov 32.0  }
 0x33c   : > { %509 = vrot.lane.b32.xlu2 %v3177_v36, %s3010_s23 }
 0x34a   : > { %735 = vrot.lane.b32.xlu0 %v3177_v36, %s3011_s29 }
 0x397   : > { %v617_v14 = vpop.xlane.xlu2 %616 }
 0x398   : > { %v629_v41 = vand.u32 2147483648, %v617_v14  ;;  %vm623_vm14 = vweird.f32 %v617_v14  ;;  %v627_v43 = vand.u32 2147483647, %v617_v14 }
 0x39a   : > { %v630_v48 = vor.u32 1.1754944e-38, %v629_v41  ;;  %vm628_vm3 = vcmp.eq.f32.partialorder %v627_v43, 8.507059e+37  ;;  %v841_v43 = vperm.slane %v3144_v9, 4 }
 0x39f   : > { %v510_v18 = vpop.permute.xlu2 %509 }
 0x3a0   : > { %530 = vmatpush.msrb.mxu1 %v510_v18  ;;  %v2696_v18 = vld [vmem:[%s3709_s2 + $0x98] sm:$0xff] }
 0x3a1   : > { %2682 = vmatmul.msk.f32.vlgmr.msrb.gmra.mxu1 %vm382_vm1, %v507_v19  ;;  %v2697_v19 = vld [vmem:[%s3709_s2 + $0xa0] sm:$0xff] }
 0x3a2   : > { %885 = vmatpush.msrb.mxu3 %v2697_v19 }
 0x3a9   : > { %v713_v20 = vpop.xlane.xlu0 %712 }
 0x3aa   : > { %v714_v21 = vsub.f32 %v708_v2, %v713_v20  ;;  %v292_v20 = vld [vmem:[%s3239_s17] sm:$0xff] }
 0x3ab   : > { %2710 = vmatmul.msk.f32.vlgmr.msrb.gmra.mxu3 %vm315_vm0, %v292_v20 }
 0x3ac   : > { %v715_v22 = vmul.f32 1.442695, %v714_v21  ;;  %v2695_v21 = vld [vmem:[%s3709_s2 + $0x90] sm:$0xff] }
 0x3ae   : > { %2876 = vpow2.f32 %v715_v22  ;;  %v2694_v22 = vld [vmem:[%s3709_s2 + $0x88] sm:$0xff] }
 0x3af   : > { %2878 = vrcp.f32 %v617_v14 }
 0x3b4   : > { %v2877_v23 = vpop.eup %2876 }
 0x3b5   : > { %v717_v24 = vsel %vm382_vm1, %v2877_v23, 0.0  ;;  %v2879_v28 = vpop.eup %2878 }
 0x3b6   : > { %718 = vadd.xlane.f32.xlu1 %v717_v24  ;;  %v619_v30 = vmul.f32 %v2879_v28, %v617_v14  ;;  %vm624_vm11 = vweird.f32 %v2879_v28 }
 0x3b7   : > { %vm625_vm2 = vmor %vm623_vm14, %vm624_vm11 }
 0x3b8   : > { %v620_v31 = vsub.f32 1.0, %v619_v30 }
 0x3ba   : > { %v621_v34 = vmul.f32 %v2879_v28, %v620_v31  ;;  %v3265_v31 = vld [vmem:[%s3713_s6 + $0x8] sm:$0x7f] }
 0x3bc   : > { %v736_v25 = vpop.permute.xlu0 %735  ;;  %v622_v39 = vadd.f32 %v2879_v28, %v621_v34  ;;  %v817_v34 = vperm.slane %v3265_v31, 0 }
 0x3bd   : > { %756 = vmatpush.msra.mxu0 %v736_v25 }
 0x3be   : > { %v626_v46 = vsel %vm625_vm2, %v2879_v28, %v622_v39 }
 0x3bf   : > { %v631_v49 = vsel %vm628_vm3, %v630_v48, %v626_v46 }
 0x3c0   : > { %v632_v51 = vmul.f32 %v3190_v63, %v631_v49 }
 0x3cf   : > { %633 = vrot.lane.b32.xlu1 %v3177_v36, %s3715_s22  ;;  %s2579_s22 = scalar_lea.hbm %s3714_s7, %s2818_s14 }
 0x3d0   : > { %s2583_s9 = sshll.u32 %s2579_s22, 4  ;;  %s2584_s9 = int_to_ptr.hbm [resolvable:$true] %s2583_s9 }
 0x3d1   : > { %s2959_s8 = sshra.s32 %s2584_s9, 4  ;;  %s2960_s8 = int_to_ptr.hbm [resolvable:$true] %s2959_s8 }
 0x3d2   : > { %p2966_p0 = scmp.lt.s32.totalorder %s2960_s8, %s3714_s7 }
 0x41e   : > { %v532_v27 = vpop.f32.mrf.mxu1 }
 0x41f   : > { %2683 = vmatmul.msk.f32.vlgmr.msrb.gmra.mxu2 %vm382_vm1, %v532_v27 }
 0x420   : > { %857 = vmatpush.msrb.mxu2 %v2696_v18 }
 0x422   : > { %858 = vmatpush.msrb.mxu2 %v2695_v21 }
 0x424   : > { %859 = vmatpush.msrb.mxu2 %v2694_v22 }
 0x429   : > { %v719_v29 = vpop.xlane.xlu1 %718 }
 0x42a   : > { %2880 = vrcp.f32 %v719_v29  ;;  %v731_v37 = vand.u32 2147483648, %v719_v29  ;;  %v729_v38 = vand.u32 2147483647, %v719_v29  ;;  %vm725_vm12 = vweird.f32 %v719_v29 }
 0x42b   : > { %2882 = vrcp.f32 %v3012_v3  ;;  %v2705_v3 = vld [vmem:[%s3709_s2 + $0xe0] sm:$0xff] }
 0x42c   : > { %v732_v42 = vor.u32 1.1754944e-38, %v731_v37  ;;  %vm730_vm15 = vcmp.eq.f32.partialorder %v729_v38, 8.507059e+37 }
 0x42e   : > { %v887_v41 = vpop.f32.mrf.mxu3 }
 0x430   : > { %v2881_v32 = vpop.eup %2880 }
 0x431   : > { %v721_v33 = vmul.f32 %v2881_v32, %v719_v29  ;;  %vm726_vm10 = vweird.f32 %v2881_v32  ;;  %v2883_v4 = vpop.eup %2882 }
 0x432   : > { %vm727_vm13 = vmor %vm725_vm12, %vm726_vm10  ;;  %v792_v5 = vmul.f32 32.0, %v2883_v4  ;;  %vm796_vm4 = vweird.f32 %v2883_v4 }
 0x433   : > { %v722_v35 = vsub.f32 1.0, %v721_v33 }
 0x434   : > { %v793_v6 = vsub.f32 1.0, %v792_v5 }
 0x435   : > { %v723_v36 = vmul.f32 %v2881_v32, %v722_v35 }
 0x436   : > { %v794_v7 = vmul.f32 %v2883_v4, %v793_v6 }
 0x437   : > { %v724_v40 = vadd.f32 %v2881_v32, %v723_v36  ;;  %v819_v36 = vperm.slane %v3265_v31, 1 }
 0x439   : > { %v728_v44 = vsel %vm727_vm13, %v2881_v32, %v724_v40  ;;  %v866_v40 = vperm.slane %v3144_v9, 5 }
 0x43a   : > { %v733_v45 = vsel %vm730_vm15, %v732_v42, %v728_v44 }
 0x43b   : > { %v734_v47 = vmul.f32 %v2877_v23, %v733_v45  ;;  %v2693_v23 = vld [vmem:[%s3709_s2 + $0x80] sm:$0xff]  ;;  %v888_v42 = vadd.f32 %v887_v41, %v866_v40 }
 0x43c   : > { %860 = vmatpush.msrb.mxu2 %v2693_v23 }
 0x43d   : > { %2691 = vmatmul.msk.f32.vlgmr.msra.gmra.mxu0 %vm382_vm1, %v734_v47 }
 0x441   : > { %v634_v50 = vpop.permute.xlu1 %633 }
 0x442   : > { %654 = vmatpush.msra.mxu1 %v634_v50  ;;  %v2704_v50 = vld [vmem:[%s3709_s2 + $0xd8] sm:$0xff] }
 0x443   : > { %2687 = vmatmul.msk.f32.vlgmr.msra.gmra.mxu1 %vm382_vm1, %v632_v51  ;;  %v2703_v51 = vld [vmem:[%s3709_s2 + $0xd0] sm:$0xff]  ;;  %903 = vmatpush.msrb.mxu0 %v2704_v50 }
 0x444   : > { %779 = vmatpush.msrb.mxu1 %v2673_v52  ;;  %v2702_v52 = vld [vmem:[%s3709_s2 + $0xc8] sm:$0xff] }
 0x445   : > { %904 = vmatpush.msrb.mxu0 %v2703_v51 }
 0x446   : > { %2712 = vmatpush.xpose.msk.msra.mxu1 %vm382_vm1, %v888_v42 }
 0x447   : > { %905 = vmatpush.msrb.mxu0 %v2702_v52 }
 0x449   : > { %906 = vmatpush.msrb.mxu0 %v2701_v53 }
 0x44a   : > { %2711 = vmatmul.msk.f32.vlgmr.msrb.gmra.mxu0 %vm315_vm0, %v292_v20 }
 0x4a2   : > { %v555_v56 = vpop.f32.mrf.mxu2 }
 0x4a3   : > { %v579_v57 = vadd.f32 %v3194_v1, %v555_v56  ;;  %v795_v1 = vadd.f32 %v2883_v4, %v794_v7 }
 0x4a5   : > { %v3224_v10 = vsel %vm796_vm4, %v2883_v4, %v795_v1 }
 0x4ba   : > { %v758_v54 = vpop.f32.mrf.mxu0 }
 0x4bb   : > { %2692 = vmatmul.msk.f32.vlgmr.msrb.gmra.mxu1 %vm382_vm1, %v758_v54 }
 0x4c0   : > { %v656_v55 = vpop.f32.mrf.mxu1 }
 0x4c1   : > { %2688 = vmatmul.msk.f32.vlgmr.msra.gmra.mxu2 %vm382_vm1, %v656_v55 }
 0x538   : > { %v781_v61 = vpop.f32.mrf.mxu1 }
 0x544   : > { %v679_v58 = vpop.f32.mrf.mxu2 }
 0x545   : > { %v682_v59 = vadd.f32 %v679_v58, %v579_v57 }
 0x547   : > { %v784_v62 = vadd.f32 %v781_v61, %v682_v59 }
 0x549   : > { %v786_v63 = vadd.f32 %v785_v60, %v784_v62 }
 0x54b   : > { %v787_v0 = vadd.f32 %v786_v63, %v3135_v8  ;;  %v890_v63 = vperm.slane %v3144_v9, 6 }
 0x54d   : > { %v788_v2 = vsel %vm315_vm0, %v787_v0, 0.0 }
 0x54e   : > { %789 = vadd.xlane.f32.xlu2 %v788_v2 }
 0x5c1   : > { %v790_v11 = vpop.xlane.xlu2 %789 }
 0x5c2   : > { %v798_v12 = vmul.f32 %v3224_v10, %v790_v11 }
 0x5c4   : > { %v799_v13 = vsub.f32 %v787_v0, %v798_v12  ;;  %v908_v0 = vpop.f32.mrf.mxu0 }
 0x5c5   : > { %v3303_v2 = vadd.f32 %v908_v0, %v890_v63  ;;  %v2706_v0 = vld [vmem:[%s3709_s2 + $0xe8] sm:$0xff] }
 0x5c6   : > { %v800_v14 = vmul.f32 %v799_v13, %v799_v13  ;;  %1081 = vmatpush.msrb.mxu1 %v2706_v0 }
 0x5c7   : > { %979 = vmatpush.msra.mxu2 %v3303_v2 }
 0x5c8   : > { %v801_v8 = vsel %vm315_vm0, %v800_v14, 0.0 }
 0x5c9   : > { %802 = vadd.xlane.f32.xlu0 %v801_v8 }
 0x5dd   : > { %986 = vrot.lane.b32.xlu0 %v888_v42, %s3010_s23 }
 0x63c   : > { %v803_v24 = vpop.xlane.xlu0 %802 }
 0x63d   : > { %v804_v25 = vmul.f32 %v803_v24, %v3224_v10 }
 0x63f   : > { %v805_v26 = vadd.f32 1e-05, %v804_v25 }
 0x641   : > { %2884 = vrsqrt.f32 %v805_v26  ;;  %vm812_vm6 = vweird.f32 %v805_v26 }
 0x647   : > { %v2885_v27 = vpop.eup %2884 }
 0x648   : > { %v807_v28 = vmul.f32 %v2885_v27, %v805_v26  ;;  %vm813_vm5 = vweird.f32 %v2885_v27 }
 0x649   : > { %vm814_vm7 = vmor %vm812_vm6, %vm813_vm5 }
 0x64a   : > { %v808_v29 = vmul.f32 %v2885_v27, %v807_v28 }
 0x64c   : > { %v809_v30 = vmul.f32 0.5, %v808_v29 }
 0x64e   : > { %v810_v32 = vsub.f32 1.5, %v809_v30 }
 0x64f   : > { %v987_v47 = vpop.permute.xlu0 %986 }
 0x650   : > { %v811_v33 = vmul.f32 %v2885_v27, %v810_v32  ;;  %2715 = vmatpush.xpose.msk.msra.mxu3 %vm382_vm1, %v987_v47 }
 0x652   : > { %v815_v35 = vsel %vm814_vm7, %v2885_v27, %v811_v33 }
 0x653   : > { %v816_v37 = vmul.f32 %v815_v35, %v799_v13 }
 0x655   : > { %v818_v38 = vmul.f32 %v817_v34, %v816_v37 }
 0x657   : > { %v3269_v39 = vadd.f32 %v819_v36, %v818_v38 }
 0x659   : > { %2709 = vmatmul.msk.f32.vlgmr.msrb.gmra.mxu2 %vm315_vm0, %v3269_v39 }
 0x65a   : > { %1104 = vmatpush.msrb.mxu2 %v2705_v3  ;;  %v2707_v3 = vld [vmem:[%s3709_s2 + $0xf0] sm:$0xff] }
 0x6dc   : > { %v862_v44 = vpop.f32.mrf.mxu2 }
 0x6dd   : > { %v863_v45 = vadd.f32 %v862_v44, %v841_v43 }
 0x6df   : > { %v865_v46 = vmul.f32 0.35355338, %v863_v45 }
 0x6e1   : > { %1211 = vrot.lane.b32.xlu0 %v865_v46, %s3011_s29  ;;  %2713 = vmatmul.msk.f32.vlgmr.msra.gmra.mxu1 %vm382_vm1, %v865_v46 }
 0x6e2   : > { %1205 = vmatpush.msra.mxu1 %v2707_v3  ;;  %v1376_v3 = vld [vmem:[%s3712_s5 + $0x10] sm:$0xff] }
 0x6e9   : > { %1109 = vrot.lane.b32.xlu0 %v865_v46, %s3719_s20 }
 0x753   : > { %v1212_v60 = vpop.permute.xlu0 %1211 }
 0x75b   : > { %v1110_v62 = vpop.permute.xlu0 %1109 }
 0x75e   : > { %v934_v48 = vpop.f32.mrf.mxu1 }
 0x75f   : > { %v937_v49 = vsel %vm382_vm1, %v934_v48, -inf }
 0x760   : > { %938 = vmax.xlane.f32.xlu1 %v937_v49 }
 0x779   : > { %984 = vrot.lane.b32.xlu1 %v865_v46, %s3010_s23 }
 0x781   : > { %1111 = vrot.lane.b32.xlu1 %v888_v42, %s3719_s20 }
 0x7d3   : > { %v939_v54 = vpop.xlane.xlu1 %938 }
 0x7d4   : > { %v940_v55 = vsub.f32 %v934_v48, %v939_v54 }
 0x7d6   : > { %v941_v56 = vmul.f32 1.442695, %v940_v55 }
 0x7d8   : > { %2886 = vpow2.f32 %v941_v56 }
 0x7de   : > { %v2887_v57 = vpop.eup %2886 }
 0x7df   : > { %v943_v58 = vsel %vm382_vm1, %v2887_v57, 0.0 }
 0x7e0   : > { %944 = vadd.xlane.f32.xlu2 %v943_v58 }
 0x7eb   : > { %v985_v59 = vpop.permute.xlu1 %984 }
 0x7ec   : > { %2716 = vmatmul.msk.f32.vlgmr.msra.gmra.mxu3 %vm382_vm1, %v985_v59 }
 0x7f3   : > { %v1112_v61 = vpop.permute.xlu1 %1111 }
 0x7f4   : > { %2720 = vmatpush.xpose.msk.msrb.mxu3 %vm382_vm1, %v1112_v61 }
 0x7f7   : > { %2721 = vmatmul.msk.f32.vlgmr.msrb.gmra.mxu3 %vm382_vm1, %v1110_v62 }
 0x7f8   : > { %1213 = vrot.lane.b32.xlu2 %v888_v42, %s3011_s29 }
 0x853   : > { %v945_v4 = vpop.xlane.xlu2 %944 }
 0x854   : > { %2888 = vrcp.f32 %v945_v4  ;;  %v957_v1 = vand.u32 2147483648, %v945_v4  ;;  %v955_v12 = vand.u32 2147483647, %v945_v4  ;;  %vm951_vm9 = vweird.f32 %v945_v4 }
 0x856   : > { %v958_v14 = vor.u32 1.1754944e-38, %v957_v1  ;;  %vm956_vm11 = vcmp.eq.f32.partialorder %v955_v12, 8.507059e+37 }
 0x85a   : > { %v2889_v5 = vpop.eup %2888 }
 0x85b   : > { %v947_v6 = vmul.f32 %v2889_v5, %v945_v4  ;;  %vm952_vm8 = vweird.f32 %v2889_v5  ;;  %v1214_v17 = vpop.permute.xlu2 %1213 }
 0x85c   : > { %vm953_vm10 = vmor %vm951_vm9, %vm952_vm8 }
 0x85d   : > { %v948_v7 = vsub.f32 1.0, %v947_v6 }
 0x85f   : > { %v949_v11 = vmul.f32 %v2889_v5, %v948_v7 }
 0x861   : > { %v950_v13 = vadd.f32 %v2889_v5, %v949_v11 }
 0x863   : > { %v954_v8 = vsel %vm953_vm10, %v2889_v5, %v950_v13 }
 0x864   : > { %v959_v15 = vsel %vm956_vm11, %v958_v14, %v954_v8 }
 0x865   : > { %v960_v16 = vmul.f32 %v2887_v57, %v959_v15 }
 0x867   : > { %2714 = vmatmul.msk.f32.vlgmr.msra.gmra.mxu2 %vm382_vm1, %v960_v16 }
 0x868   : > { %2724 = vmatpush.xpose.msk.msra.mxu2 %vm382_vm1, %v1214_v17 }
 0x86f   : > { %v1009_v18 = vpop.f32.mrf.mxu3 }
 0x870   : > { %v1012_v19 = vsel %vm382_vm1, %v1009_v18, -inf }
 0x871   : > { %1013 = vmax.xlane.f32.xlu2 %v1012_v19 }
 0x87a   : > { %v1134_v20 = vpop.f32.mrf.mxu3 }
 0x87b   : > { %v1137_v21 = vsel %vm382_vm1, %v1134_v20, -inf }
 0x87c   : > { %1138 = vmax.xlane.f32.xlu0 %v1137_v21 }
 0x8e4   : > { %v1014_v22 = vpop.xlane.xlu2 %1013 }
 0x8e5   : > { %v1015_v23 = vsub.f32 %v1009_v18, %v1014_v22 }
 0x8e7   : > { %v1016_v24 = vmul.f32 1.442695, %v1015_v23 }
 0x8e9   : > { %2890 = vpow2.f32 %v1016_v24 }
 0x8ea   : > { %v981_v25 = vpop.f32.mrf.mxu2 }
 0x8eb   : > { %2719 = vmatmul.msk.f32.vlgmr.msrb.gmra.mxu2 %vm382_vm1, %v981_v25 }
 0x8ef   : > { %v2891_v26 = vpop.eup %2890  ;;  %v1139_v27 = vpop.xlane.xlu0 %1138 }
 0x8f0   : > { %v1140_v28 = vsub.f32 %v1134_v20, %v1139_v27  ;;  %v1018_v29 = vsel %vm382_vm1, %v2891_v26, 0.0 }
 0x8f1   : > { %1019 = vadd.xlane.f32.xlu2 %v1018_v29 }
 0x8f2   : > { %v1141_v30 = vmul.f32 1.442695, %v1140_v28 }
 0x8f3   : > { %2725 = vmatmul.msk.f32.vlgmr.msra.gmra.mxu2 %vm382_vm1, %v1212_v60 }
 0x8f4   : > { %2892 = vpow2.f32 %v1141_v30  ;;  %v1313_v30 = vperm.slane %v3144_v9, 7  ;;  %v1345_v9 = vld [vmem:[%s3710_s3 + $0x18] sm:$0xff] }
 0x8fa   : > { %v2893_v32 = vpop.eup %2892 }
 0x8fb   : > { %v1143_v33 = vsel %vm382_vm1, %v2893_v32, 0.0 }
 0x8fc   : > { %1144 = vadd.xlane.f32.xlu0 %v1143_v33 }
 0x909   : > { %1037 = vrot.lane.b32.xlu2 %v3303_v2, %s3010_s23 }
 0x910   : > { %1161 = vrot.lane.b32.xlu0 %v3303_v2, %s3719_s20 }
 0x964   : > { %v1020_v34 = vpop.xlane.xlu2 %1019 }
 0x965   : > { %2894 = vrcp.f32 %v1020_v34  ;;  %v1032_v41 = vand.u32 2147483648, %v1020_v34  ;;  %v1030_v44 = vand.u32 2147483647, %v1020_v34  ;;  %vm1026_vm13 = vweird.f32 %v1020_v34 }
 0x967   : > { %v1033_v46 = vor.u32 1.1754944e-38, %v1032_v41  ;;  %vm1031_vm15 = vcmp.eq.f32.partialorder %v1030_v44, 8.507059e+37  ;;  %v1342_v44 = vld [vmem:[%s3710_s3] sm:$0xff] }
 0x96b   : > { %v2895_v35 = vpop.eup %2894 }
 0x96c   : > { %v1022_v37 = vmul.f32 %v2895_v35, %v1020_v34  ;;  %v1038_v36 = vpop.permute.xlu2 %1037  ;;  %vm1027_vm12 = vweird.f32 %v2895_v35 }
 0x96d   : > { %1058 = vmatpush.msra.mxu0 %v1038_v36  ;;  %vm1028_vm14 = vmor %vm1026_vm13, %vm1027_vm12  ;;  %vm1383_vm13 = vcmask 523264  }
 0x96e   : > { %v1023_v38 = vsub.f32 1.0, %v1022_v37  ;;  %v3321_v40 = vpop.f32.mrf.mxu2 }
 0x96f   : > { %v1145_v42 = vpop.xlane.xlu0 %1144 }
 0x970   : > { %v1024_v43 = vmul.f32 %v2895_v35, %v1023_v38  ;;  %2896 = vrcp.f32 %v1145_v42  ;;  %v1157_v55 = vand.u32 2147483648, %v1145_v42  ;;  %v1155_v57 = vand.u32 2147483647, %v1145_v42 }
 0x971   : > { %vm1151_vm3 = vweird.f32 %v1145_v42 }
 0x972   : > { %v1025_v45 = vadd.f32 %v2895_v35, %v1024_v43  ;;  %v1158_v59 = vor.u32 1.1754944e-38, %v1157_v55  ;;  %vm1156_vm5 = vcmp.eq.f32.partialorder %v1155_v57, 8.507059e+37 }
 0x974   : > { %v1029_v47 = vsel %vm1028_vm14, %v2895_v35, %v1025_v45  ;;  %v1381_v45 = vld [vmem:[%s3712_s5 + $0x38] sm:$0xff] }
 0x975   : > { %v1034_v48 = vsel %vm1031_vm15, %v1033_v46, %v1029_v47  ;;  %v1380_v46 = vld [vmem:[%s3712_s5 + $0x30] sm:$0xff]  ;;  %1395 = vmatpush.msrb.mxu2 %v1381_v45  ;;  %v1379_v47 = vld [vmem:[%s3712_s5 + $0x28] sm:$0xff] }
 0x976   : > { %v2897_v49 = vpop.eup %2896  ;;  %v1236_v50 = vpop.f32.mrf.mxu2  ;;  %v1035_v51 = vmul.f32 %v2891_v26, %v1034_v48 }
 0x977   : > { %v1147_v52 = vmul.f32 %v2897_v49, %v1145_v42  ;;  %v1239_v53 = vsel %vm382_vm1, %v1236_v50, -inf  ;;  %vm1152_vm2 = vweird.f32 %v2897_v49  ;;  %1396 = vmatpush.msrb.mxu2 %v1380_v46 }
 0x978   : > { %2717 = vmatmul.msk.f32.vlgmr.msra.gmra.mxu0 %vm382_vm1, %v1035_v51  ;;  %1240 = vmax.xlane.f32.xlu1 %v1239_v53  ;;  %vm1153_vm4 = vmor %vm1151_vm3, %vm1152_vm2 }
 0x979   : > { %v1148_v54 = vsub.f32 1.0, %v1147_v52  ;;  %1397 = vmatpush.msrb.mxu2 %v1379_v47  ;;  %v1377_v52 = vld [vmem:[%s3712_s5 + $0x18] sm:$0xff]  ;;  %v3446_v47 = vld [vmem:[%s3713_s6 + $0x10] sm:$0xff] }
 0x97b   : > { %v1149_v56 = vmul.f32 %v2897_v49, %v1148_v54 }
 0x97d   : > { %v1150_v58 = vadd.f32 %v2897_v49, %v1149_v56 }
 0x97f   : > { %v1154_v60 = vsel %vm1153_vm4, %v2897_v49, %v1150_v58 }
 0x980   : > { %v1159_v61 = vsel %vm1156_vm5, %v1158_v59, %v1154_v60  ;;  %v1338_v59 = vperm.slane %v3265_v31, 2 }
 0x981   : > { %v1160_v62 = vmul.f32 %v2893_v32, %v1159_v61 }
 0x982   : > { %v1162_v63 = vpop.permute.xlu0 %1161 }
 0x983   : > { %1182 = vmatpush.msrb.mxu0 %v1162_v63 }
 0x984   : > { %2722 = vmatmul.msk.f32.vlgmr.msrb.gmra.mxu0 %vm382_vm1, %v1160_v62  ;;  %v1340_v62 = vperm.slane %v3265_v31, 3 }
 0x9eb   : > { %v1241_v4 = vpop.xlane.xlu1 %1240 }
 0x9ec   : > { %v1242_v5 = vsub.f32 %v1236_v50, %v1241_v4  ;;  %v1378_v50 = vld [vmem:[%s3712_s5 + $0x20] sm:$0xff]  ;;  %v1375_v4 = vld [vmem:[%s3712_s5 + $0x8] sm:$0xff] }
 0x9ed   : > { %1398 = vmatpush.msrb.mxu2 %v1378_v50 }
 0x9ee   : > { %v1243_v6 = vmul.f32 1.442695, %v1242_v5  ;;  %v1374_v5 = vld [vmem:[%s3712_s5] sm:$0xff] }
 0x9ef   : > { %1399 = vmatpush.msrb.mxu2 %v1377_v52 }
 0x9f0   : > { %2898 = vpow2.f32 %v1243_v6  ;;  %v2864_v6 = vld [vmem:[%s3711_s4] ss:$0 sm:$0xff] }
 0x9f1   : > { %1400 = vmatpush.msrb.mxu2 %v1376_v3 }
 0x9f3   : > { %1401 = vmatpush.msrb.mxu2 %v1375_v4  ;;  %v2744_v4 = vld [vmem:[%s3709_s2 + $0x160] sm:$0xff] }
 0x9f5   : > { %v1060_v7 = vpop.f32.mrf.mxu0  ;;  %1402 = vmatpush.msrb.mxu2 %v1374_v5 }
 0x9f6   : > { %v2899_v1 = vpop.eup %2898  ;;  %2718 = vmatmul.msk.f32.vlgmr.msrb.gmra.mxu1 %vm382_vm1, %v1060_v7 }
 0x9f7   : > { %v1245_v11 = vsel %vm382_vm1, %v2899_v1, 0.0  ;;  %1365 = vmatpush.msrb.mxu1 %v1345_v9  ;;  %v1430_v9 = vperm.slane %v3265_v31, 4 }
 0x9f8   : > { %1246 = vadd.xlane.f32.xlu1 %v1245_v11 }
 0xa01   : > { %v1184_v12 = vpop.f32.mrf.mxu0 }
 0xa02   : > { %2723 = vmatmul.msk.f32.vlgmr.msra.gmra.mxu1 %vm382_vm1, %v1184_v12  ;;  %v1382_v12 = vperm.slane %v3265_v31, 6 }
 0xa11   : > { %1263 = vrot.lane.b32.xlu1 %v3303_v2, %s3011_s29  ;;  %v2708_v2 = vld [vmem:[%s3709_s2 + $0xf8] sm:$0xff] }
 0xa12   : > { %1307 = vmatpush.msra.mxu0 %v2708_v2  ;;  %v2738_v2 = vld [vmem:[%s3709_s2 + $0x130] sm:$0xff] }
 0xa6b   : > { %v1247_v13 = vpop.xlane.xlu1 %1246 }
 0xa6c   : > { %2900 = vrcp.f32 %v1247_v13  ;;  %v1259_v18 = vand.u32 2147483648, %v1247_v13  ;;  %vm1253_vm7 = vweird.f32 %v1247_v13  ;;  %v1257_v19 = vand.u32 2147483647, %v1247_v13 }
 0xa6e   : > { %v1260_v21 = vor.u32 1.1754944e-38, %v1259_v18  ;;  %vm1258_vm9 = vcmp.eq.f32.partialorder %v1257_v19, 8.507059e+37 }
 0xa72   : > { %v2901_v14 = vpop.eup %2900 }
 0xa73   : > { %v1249_v8 = vmul.f32 %v2901_v14, %v1247_v13  ;;  %vm1254_vm6 = vweird.f32 %v2901_v14  ;;  %v1083_v26 = vpop.f32.mrf.mxu1 }
 0xa74   : > { %vm1255_vm8 = vmor %vm1253_vm7, %vm1254_vm6  ;;  %v1107_v28 = vadd.f32 %v3321_v40, %v1083_v26  ;;  %v1343_v40 = vld [vmem:[%s3710_s3 + $0x8] sm:$0xff] }
 0xa75   : > { %v1250_v15 = vsub.f32 1.0, %v1249_v8  ;;  %v2733_v26 = vld [vmem:[%s3709_s2 + $0x108] sm:$0xff] }
 0xa77   : > { %v1251_v16 = vmul.f32 %v2901_v14, %v1250_v15 }
 0xa79   : > { %v1252_v17 = vadd.f32 %v2901_v14, %v1251_v16 }
 0xa7b   : > { %v1256_v20 = vsel %vm1255_vm8, %v2901_v14, %v1252_v17 }
 0xa7c   : > { %v1261_v22 = vsel %vm1258_vm9, %v1260_v21, %v1256_v20  ;;  %v2735_v21 = vld [vmem:[%s3709_s2 + $0x118] sm:$0xff] }
 0xa7d   : > { %v1262_v24 = vmul.f32 %v2899_v1, %v1261_v22  ;;  %v2739_v22 = vld [vmem:[%s3709_s2 + $0x138] sm:$0xff] }
 0xa7e   : > { %1495 = vmatpush.msrb.mxu0 %v2739_v22 }
 0xa7f   : > { %v1207_v27 = vpop.f32.mrf.mxu1 }
 0xa80   : > { %v1210_v29 = vadd.f32 %v1207_v27, %v1107_v28  ;;  %1496 = vmatpush.msrb.mxu0 %v2738_v2  ;;  %v2737_v27 = vld [vmem:[%s3709_s2 + $0x128] sm:$0xff] }
 0xa81   : > { %v2741_v28 = vld [vmem:[%s3709_s2 + $0x148] sm:$0xff] }
 0xa82   : > { %1497 = vmatpush.msrb.mxu0 %v2737_v27 }
 0xa83   : > { %v1264_v23 = vpop.permute.xlu1 %1263 }
 0xa84   : > { %1284 = vmatpush.msra.mxu3 %v1264_v23  ;;  %v2743_v23 = vld [vmem:[%s3709_s2 + $0x158] sm:$0xff] }
 0xa85   : > { %2726 = vmatmul.msk.f32.vlgmr.msra.gmra.mxu3 %vm382_vm1, %v1262_v24  ;;  %v2734_v24 = vld [vmem:[%s3709_s2 + $0x110] sm:$0xff] }
 0xa86   : > { %1473 = vmatpush.msrb.mxu3 %v2735_v21 }
 0xa88   : > { %1474 = vmatpush.msrb.mxu3 %v2734_v24 }
 0xa8a   : > { %1475 = vmatpush.msrb.mxu3 %v2733_v26 }
 0xb08   : > { %v1286_v25 = vpop.f32.mrf.mxu3 }
 0xb09   : > { %2727 = vmatmul.msk.f32.vlgmr.msra.gmra.mxu0 %vm382_vm1, %v1286_v25  ;;  %v2742_v25 = vld [vmem:[%s3709_s2 + $0x150] sm:$0xff] }
 0xb86   : > { %v1309_v32 = vpop.f32.mrf.mxu0 }
 0xb87   : > { %v1312_v33 = vadd.f32 %v1309_v32, %v1210_v29  ;;  %v2732_v29 = vld [vmem:[%s3709_s2 + $0x100] sm:$0xff] }
 0xb88   : > { %v2740_v32 = vld [vmem:[%s3709_s2 + $0x140] sm:$0xff]  ;;  %1476 = vmatpush.msrb.mxu3 %v2732_v29 }
 0xb89   : > { %v1314_v34 = vadd.f32 %v1313_v30, %v1312_v33  ;;  %v2736_v30 = vld [vmem:[%s3709_s2 + $0x120] sm:$0xff] }
 0xb8a   : > { %1498 = vmatpush.msrb.mxu0 %v2736_v30 }
 0xb8b   : > { %v1315_v35 = vadd.f32 %v1314_v34, %v3269_v39  ;;  %v1344_v39 = vld [vmem:[%s3710_s3 + $0x10] sm:$0xff] }
 0xb8c   : > { %1366 = vmatpush.msrb.mxu1 %v1344_v39 }
 0xb8d   : > { %v1316_v37 = vsel %vm315_vm0, %v1315_v35, 0.0 }
 0xb8e   : > { %1317 = vadd.xlane.f32.xlu2 %v1316_v37  ;;  %1367 = vmatpush.msrb.mxu1 %v1343_v40 }
 0xb90   : > { %1368 = vmatpush.msrb.mxu1 %v1342_v44  ;;  %v1432_v44 = vperm.slane %v3265_v31, 5  ;;  %v1503_v31 = vperm.slane %v3446_v47, 2 }
 0xb92   : > { %1516 = vmatpush.msra.mxu1 %v2743_v23 }
 0xb94   : > { %1517 = vmatpush.msra.mxu1 %v2742_v25 }
 0xb96   : > { %1518 = vmatpush.msra.mxu1 %v2741_v28 }
 0xb98   : > { %1519 = vmatpush.msra.mxu1 %v2740_v32 }
 0xc01   : > { %v1318_v36 = vpop.xlane.xlu2 %1317 }
 0xc02   : > { %v1319_v38 = vmul.f32 %v1318_v36, %v3224_v10 }
 0xc04   : > { %v1320_v41 = vsub.f32 %v1315_v35, %v1319_v38 }
 0xc06   : > { %v1321_v42 = vmul.f32 %v1320_v41, %v1320_v41 }
 0xc08   : > { %v1322_v43 = vsel %vm315_vm0, %v1321_v42, 0.0 }
 0xc09   : > { %1323 = vadd.xlane.f32.xlu0 %v1322_v43 }
 0xc7c   : > { %v1324_v48 = vpop.xlane.xlu0 %1323 }
 0xc7d   : > { %v1325_v49 = vmul.f32 %v1324_v48, %v3224_v10  ;;  %v1482_v48 = vperm.slane %v3446_v47, 1 }
 0xc7f   : > { %v1326_v51 = vadd.f32 1e-05, %v1325_v49 }
 0xc81   : > { %2902 = vrsqrt.f32 %v1326_v51  ;;  %vm1333_vm11 = vweird.f32 %v1326_v51 }
 0xc87   : > { %v2903_v53 = vpop.eup %2902 }
 0xc88   : > { %v1328_v54 = vmul.f32 %v2903_v53, %v1326_v51  ;;  %vm1334_vm10 = vweird.f32 %v2903_v53 }
 0xc89   : > { %vm1335_vm12 = vmor %vm1333_vm11, %vm1334_vm10 }
 0xc8a   : > { %v1329_v55 = vmul.f32 %v2903_v53, %v1328_v54 }
 0xc8c   : > { %v1330_v56 = vmul.f32 0.5, %v1329_v55 }
 0xc8e   : > { %v1331_v57 = vsub.f32 1.5, %v1330_v56 }
 0xc90   : > { %v1332_v58 = vmul.f32 %v2903_v53, %v1331_v57 }
 0xc92   : > { %v1336_v60 = vsel %vm1335_vm12, %v2903_v53, %v1332_v58  ;;  %v1457_v53 = vperm.slane %v3446_v47, 0 }
 0xc93   : > { %v1337_v61 = vmul.f32 %v1336_v60, %v1320_v41 }
 0xc95   : > { %v1339_v63 = vmul.f32 %v1338_v59, %v1337_v61 }
 0xc97   : > { %v1341_v0 = vadd.f32 %v1340_v62, %v1339_v63 }
 0xc99   : > { %2728 = vmatmul.msk.f32.vlgmr.msrb.gmra.mxu1 %vm315_vm0, %v1341_v0 }
 0xd16   : > { %v1370_v7 = vpop.f32.mrf.mxu1 }
 0xd17   : > { %v1371_v1 = vadd.f32 %v2864_v6, %v1370_v7 }
 0xd19   : > { %v1373_v11 = vmax.f32 %v1371_v1, 0.0 }
 0xd1b   : > { %2729 = vmatmul.msk.f32.vlgmr.msrb.gmra.mxu2 %vm1383_vm13, %v1373_v11 }
 0xd9e   : > { %v1404_v13 = vpop.f32.mrf.mxu2 }
 0xd9f   : > { %v1405_v14 = vadd.f32 %v1404_v13, %v1382_v12 }
 0xda1   : > { %v1407_v8 = vadd.f32 %v1405_v14, %v1341_v0 }
 0xda3   : > { %v1408_v15 = vsel %vm315_vm0, %v1407_v8, 0.0 }
 0xda4   : > { %1409 = vadd.xlane.f32.xlu1 %v1408_v15 }
 0xe17   : > { %v1410_v16 = vpop.xlane.xlu1 %1409 }
 0xe18   : > { %v1411_v17 = vmul.f32 %v1410_v16, %v3224_v10 }
 0xe1a   : > { %v1412_v18 = vsub.f32 %v1407_v8, %v1411_v17 }
 0xe1c   : > { %v1413_v19 = vmul.f32 %v1412_v18, %v1412_v18 }
 0xe1e   : > { %v1414_v20 = vsel %vm315_vm0, %v1413_v19, 0.0 }
 0xe1f   : > { %1415 = vadd.xlane.f32.xlu2 %v1414_v20 }
 0xe92   : > { %v1416_v33 = vpop.xlane.xlu2 %1415 }
 0xe93   : > { %v1417_v34 = vmul.f32 %v1416_v33, %v3224_v10 }
 0xe95   : > { %v1418_v35 = vadd.f32 1e-05, %v1417_v34 }
 0xe97   : > { %2904 = vrsqrt.f32 %v1418_v35  ;;  %vm1425_vm15 = vweird.f32 %v1418_v35 }
 0xe9d   : > { %v2905_v37 = vpop.eup %2904 }
 0xe9e   : > { %v1420_v36 = vmul.f32 %v2905_v37, %v1418_v35  ;;  %vm1426_vm14 = vweird.f32 %v2905_v37 }
 0xe9f   : > { %vm1427_vm2 = vmor %vm1425_vm15, %vm1426_vm14 }
 0xea0   : > { %v1421_v38 = vmul.f32 %v2905_v37, %v1420_v36 }
 0xea2   : > { %v1422_v41 = vmul.f32 0.5, %v1421_v38 }
 0xea4   : > { %v1423_v42 = vsub.f32 1.5, %v1422_v41 }
 0xea6   : > { %v1424_v43 = vmul.f32 %v2905_v37, %v1423_v42 }
 0xea8   : > { %v1428_v39 = vsel %vm1427_vm2, %v2905_v37, %v1424_v43 }
 0xea9   : > { %v1429_v40 = vmul.f32 %v1428_v39, %v1412_v18 }
 0xeab   : > { %v1431_v45 = vmul.f32 %v1430_v9, %v1429_v40 }
 0xead   : > { %v3435_v46 = vadd.f32 %v1432_v44, %v1431_v45 }
 0xeaf   : > { %2748 = vmatmul.msk.f32.vlgmr.msrb.gmra.mxu3 %vm315_vm0, %v3435_v46  ;;  %2749 = vmatmul.msk.f32.vlgmr.msrb.gmra.mxu0 %vm315_vm0, %v3435_v46 }
 0xeb0   : > { %2750 = vmatmul.msk.f32.vlgmr.msra.gmra.mxu1 %vm315_vm0, %v3435_v46 }
 0xf2c   : > { %v1500_v49 = vpop.f32.mrf.mxu0 }
 0xf2d   : > { %v1501_v50 = vadd.f32 %v1500_v49, %v1482_v48  ;;  %v1521_v51 = vpop.f32.mrf.mxu1 }
 0xf2e   : > { %v3450_v52 = vadd.f32 %v1521_v51, %v1503_v31 }
 0xf2f   : > { %1599 = vrot.lane.b32.xlu2 %v1501_v50, %s3010_s23  ;;  %2751 = vmatpush.xpose.msk.msra.mxu3 %vm382_vm1, %v1501_v50 }
 0xf30   : > { %1592 = vmatpush.msra.mxu0 %v3450_v52 }
 0xf32   : > { %v1478_v54 = vpop.f32.mrf.mxu3  ;;  %1717 = vmatpush.msrb.mxu0 %v2744_v4 }
 0xf33   : > { %v1479_v55 = vadd.f32 %v1478_v54, %v1457_v53 }
 0xf35   : > { %v1481_v56 = vmul.f32 0.35355338, %v1479_v55 }
 0xf37   : > { %1826 = vrot.lane.b32.xlu2 %v1501_v50, %s3011_s29  ;;  %2752 = vmatmul.msk.f32.vlgmr.msra.gmra.mxu3 %vm382_vm1, %v1481_v56 }
 0xf89   : > { %v1600_v57 = vpop.permute.xlu2 %1599 }
 0xf8a   : > { %2754 = vmatpush.xpose.msk.msrb.mxu1 %vm382_vm1, %v1600_v57 }
 0xf91   : > { %v1827_v20 = vpop.permute.xlu2 %1826 }
 0xfba   : > { %v1547_v58 = vpop.f32.mrf.mxu3 }
 0xfbb   : > { %v1550_v59 = vsel %vm382_vm1, %v1547_v58, -inf }
 0xfbc   : > { %1551 = vmax.xlane.f32.xlu0 %v1550_v59 }
 0xfd0   : > { %1597 = vrot.lane.b32.xlu0 %v1481_v56, %s3010_s23 }
 0xfd8   : > { %1722 = vrot.lane.b32.xlu0 %v1481_v56, %s3719_s20 }
 0xfe0   : > { %1824 = vrot.lane.b32.xlu0 %v1481_v56, %s3011_s29 }
0x102f   : > { %v1552_v60 = vpop.xlane.xlu0 %1551 }
0x1030   : > { %v1553_v61 = vsub.f32 %v1547_v58, %v1552_v60 }
0x1032   : > { %v1554_v62 = vmul.f32 1.442695, %v1553_v61 }
0x1034   : > { %2906 = vpow2.f32 %v1554_v62 }
0x103a   : > { %v2907_v63 = vpop.eup %2906 }
0x103b   : > { %v1556_v0 = vsel %vm382_vm1, %v2907_v63, 0.0 }
0x103c   : > { %1557 = vadd.xlane.f32.xlu1 %v1556_v0 }
0x1042   : > { %v1598_v3 = vpop.permute.xlu0 %1597 }
0x1043   : > { %2755 = vmatmul.msk.f32.vlgmr.msrb.gmra.mxu1 %vm382_vm1, %v1598_v3 }
0x104a   : > { %v1723_v22 = vpop.permute.xlu0 %1722 }
0x1052   : > { %v1825_v26 = vpop.permute.xlu0 %1824 }
0x1055   : > { %1724 = vrot.lane.b32.xlu1 %v1501_v50, %s3719_s20 }
0x10af   : > { %v1558_v5 = vpop.xlane.xlu1 %1557 }
0x10b0   : > { %2908 = vrcp.f32 %v1558_v5  ;;  %v1570_v11 = vand.u32 2147483648, %v1558_v5  ;;  %v1568_v13 = vand.u32 2147483647, %v1558_v5  ;;  %vm1564_vm4 = vweird.f32 %v1558_v5 }
0x10b2   : > { %v1571_v8 = vor.u32 1.1754944e-38, %v1570_v11  ;;  %vm1569_vm6 = vcmp.eq.f32.partialorder %v1568_v13, 8.507059e+37 }
0x10b6   : > { %v2909_v6 = vpop.eup %2908 }
0x10b7   : > { %v1560_v7 = vmul.f32 %v2909_v6, %v1558_v5  ;;  %vm1565_vm3 = vweird.f32 %v2909_v6 }
0x10b8   : > { %vm1566_vm5 = vmor %vm1564_vm4, %vm1565_vm3 }
0x10b9   : > { %v1561_v1 = vsub.f32 1.0, %v1560_v7 }
0x10bb   : > { %v1562_v12 = vmul.f32 %v2909_v6, %v1561_v1 }
0x10bd   : > { %v1563_v14 = vadd.f32 %v2909_v6, %v1562_v12  ;;  %v2745_v12 = vld [vmem:[%s3709_s2 + $0x168] sm:$0xff] }
0x10be   : > { %1694 = vmatpush.msrb.mxu3 %v2745_v12  ;;  %v1975_v12 = vperm.slane %v3446_v47, 4 }
0x10bf   : > { %v1567_v15 = vsel %vm1566_vm5, %v2909_v6, %v1563_v14  ;;  %v2746_v14 = vld [vmem:[%s3709_s2 + $0x170] sm:$0xff] }
0x10c0   : > { %v1572_v16 = vsel %vm1569_vm6, %v1571_v8, %v1567_v15  ;;  %v1622_v17 = vpop.f32.mrf.mxu1  ;;  %1818 = vmatpush.msra.mxu3 %v2746_v14 }
0x10c1   : > { %v1625_v18 = vsel %vm382_vm1, %v1622_v17, -inf  ;;  %v1573_v19 = vmul.f32 %v2907_v63, %v1572_v16 }
0x10c2   : > { %1626 = vmax.xlane.f32.xlu1 %v1625_v18 }
0x10c3   : > { %2753 = vmatmul.msk.f32.vlgmr.msra.gmra.mxu0 %vm382_vm1, %v1573_v19 }
0x10c4   : > { %2763 = vmatpush.xpose.msk.msra.mxu0 %vm382_vm1, %v1827_v20 }
0x10c7   : > { %v1725_v21 = vpop.permute.xlu1 %1724 }
0x10c8   : > { %2759 = vmatpush.xpose.msk.msra.mxu1 %vm382_vm1, %v1725_v21 }
0x10cb   : > { %2760 = vmatmul.msk.f32.vlgmr.msra.gmra.mxu1 %vm382_vm1, %v1723_v22 }
0x1135   : > { %v1627_v23 = vpop.xlane.xlu1 %1626 }
0x1136   : > { %v1628_v24 = vsub.f32 %v1622_v17, %v1627_v23 }
0x1138   : > { %v1629_v25 = vmul.f32 1.442695, %v1628_v24 }
0x113a   : > { %2910 = vpow2.f32 %v1629_v25 }
0x1140   : > { %v1594_v2 = vpop.f32.mrf.mxu0  ;;  %v2911_v29 = vpop.eup %2910 }
0x1141   : > { %2758 = vmatmul.msk.f32.vlgmr.msrb.gmra.mxu0 %vm382_vm1, %v1594_v2  ;;  %v1631_v30 = vsel %vm382_vm1, %v2911_v29, 0.0 }
0x1148   : > { %v1747_v27 = vpop.f32.mrf.mxu1 }
0x1149   : > { %2764 = vmatmul.msk.f32.vlgmr.msra.gmra.mxu0 %vm382_vm1, %v1825_v26  ;;  %v1750_v28 = vsel %vm382_vm1, %v1747_v27, -inf  ;;  %v2747_v26 = vld [vmem:[%s3709_s2 + $0x178] sm:$0xff] }
0x114a   : > { %1751 = vmax.xlane.f32.xlu2 %v1750_v28 }
0x1152   : > { %1632 = vadd.xlane.f32.xlu2 %v1631_v30 }
0x11bd   : > { %v1752_v32 = vpop.xlane.xlu2 %1751 }
0x11be   : > { %v1753_v33 = vsub.f32 %v1747_v27, %v1752_v32  ;;  %v3478_v34 = vpop.f32.mrf.mxu0 }
0x11c0   : > { %v1754_v35 = vmul.f32 1.442695, %v1753_v33  ;;  %v1926_v33 = vperm.slane %v3446_v47, 3 }
0x11c2   : > { %2912 = vpow2.f32 %v1754_v35 }
0x11c5   : > { %v1633_v42 = vpop.xlane.xlu2 %1632 }
0x11c6   : > { %v1849_v37 = vpop.f32.mrf.mxu0  ;;  %2914 = vrcp.f32 %v1633_v42  ;;  %v1645_v51 = vand.u32 2147483648, %v1633_v42  ;;  %vm1639_vm8 = vweird.f32 %v1633_v42  ;;  %v1643_v55 = vand.u32 2147483647, %v1633_v42 }
0x11c7   : > { %v1852_v36 = vsel %vm382_vm1, %v1849_v37, -inf }
0x11c8   : > { %v2913_v38 = vpop.eup %2912  ;;  %1853 = vmax.xlane.f32.xlu0 %v1852_v36  ;;  %v1646_v59 = vor.u32 1.1754944e-38, %v1645_v51  ;;  %vm1644_vm10 = vcmp.eq.f32.partialorder %v1643_v55, 8.507059e+37  ;;  %v2944_v51 = vld [vmem:[%s3239_s17] sm:$0xff]  ;;  %s2965_s17 = scalar_lea.hbm %s3714_s7, 16 }
0x11c9   : > { %v1756_v41 = vsel %vm382_vm1, %v2913_v38, 0.0 }
0x11ca   : > { %1757 = vadd.xlane.f32.xlu1 %v1756_v41 }
0x11cc   : > { %v2915_v43 = vpop.eup %2914 }
0x11cd   : > { %v1635_v9 = vmul.f32 %v2915_v43, %v1633_v42  ;;  %vm1640_vm7 = vweird.f32 %v2915_v43 }
0x11ce   : > { %vm1641_vm9 = vmor %vm1639_vm8, %vm1640_vm7 }
0x11cf   : > { %v1636_v40 = vsub.f32 1.0, %v1635_v9 }
0x11d1   : > { %v1637_v31 = vmul.f32 %v2915_v43, %v1636_v40 }
0x11d3   : > { %v1638_v50 = vadd.f32 %v2915_v43, %v1637_v31  ;;  %v2772_v31 = vld [vmem:[%s3709_s2 + $0x1a8] sm:$0xff] }
0x11d5   : > { %v1642_v58 = vsel %vm1641_vm9, %v2915_v43, %v1638_v50  ;;  %v2771_v50 = vld [vmem:[%s3709_s2 + $0x1a0] sm:$0xff] }
0x11d6   : > { %v1647_v61 = vsel %vm1644_vm10, %v1646_v59, %v1642_v58 }
0x11d7   : > { %v1648_v4 = vmul.f32 %v2911_v29, %v1647_v61 }
0x11dc   : > { %1650 = vrot.lane.b32.xlu0 %v3450_v52, %s3010_s23 }
0x11e3   : > { %1774 = vrot.lane.b32.xlu1 %v3450_v52, %s3719_s20 }
0x123b   : > { %v1854_v39 = vpop.xlane.xlu0 %1853 }
0x123c   : > { %v1855_v44 = vsub.f32 %v1849_v37, %v1854_v39 }
0x123d   : > { %v1758_v45 = vpop.xlane.xlu1 %1757 }
0x123e   : > { %v1856_v48 = vmul.f32 1.442695, %v1855_v44  ;;  %2916 = vrcp.f32 %v1758_v45  ;;  %v1770_v63 = vand.u32 2147483648, %v1758_v45  ;;  %vm1764_vm12 = vweird.f32 %v1758_v45  ;;  %v2769_v44 = vld [vmem:[%s3709_s2 + $0x190] sm:$0xff] }
0x123f   : > { %v1768_v0 = vand.u32 2147483647, %v1758_v45 }
0x1240   : > { %2918 = vpow2.f32 %v1856_v48  ;;  %v1771_v6 = vor.u32 1.1754944e-38, %v1770_v63  ;;  %v2768_v48 = vld [vmem:[%s3709_s2 + $0x188] sm:$0xff] }
0x1241   : > { %vm1769_vm15 = vcmp.eq.f32.partialorder %v1768_v0, 8.507059e+37 }
0x1244   : > { %v2917_v49 = vpop.eup %2916 }
0x1245   : > { %v1760_v53 = vmul.f32 %v2917_v49, %v1758_v45  ;;  %vm1765_vm11 = vweird.f32 %v2917_v49  ;;  %v2773_v45 = vld [vmem:[%s3709_s2 + $0x1b0] sm:$0xff] }
0x1246   : > { %v2919_v54 = vpop.eup %2918  ;;  %vm1766_vm14 = vmor %vm1764_vm12, %vm1765_vm11 }
0x1247   : > { %v1761_v56 = vsub.f32 1.0, %v1760_v53  ;;  %v1858_v57 = vsel %vm382_vm1, %v2919_v54, 0.0 }
0x1248   : > { %1859 = vadd.xlane.f32.xlu2 %v1858_v57 }
0x1249   : > { %v1762_v60 = vmul.f32 %v2917_v49, %v1761_v56 }
0x124b   : > { %v1763_v62 = vadd.f32 %v2917_v49, %v1762_v60  ;;  %v3540_v60 = vld [vmem:[%s3713_s6 + $0x18] sm:$0x7f] }
0x124c   : > { %v1951_v63 = vperm.slane %v3540_v60, 0 }
0x124d   : > { %v1767_v5 = vsel %vm1766_vm14, %v2917_v49, %v1763_v62  ;;  %v2767_v49 = vld [vmem:[%s3709_s2 + $0x180] sm:$0xff] }
0x124e   : > { %v1651_v3 = vpop.permute.xlu0 %1650  ;;  %v1772_v7 = vsel %vm1769_vm15, %v1771_v6, %v1767_v5 }
0x124f   : > { %1671 = vmatpush.msra.mxu2 %v1651_v3  ;;  %v1773_v11 = vmul.f32 %v2913_v38, %v1772_v7  ;;  %v2000_v7 = vperm.slane %v3446_v47, 5 }
0x1250   : > { %2756 = vmatmul.msk.f32.vlgmr.msra.gmra.mxu2 %vm382_vm1, %v1648_v4  ;;  %v1953_v4 = vperm.slane %v3540_v60, 1 }
0x1255   : > { %v1775_v1 = vpop.permute.xlu1 %1774 }
0x1256   : > { %1795 = vmatpush.msrb.mxu2 %v1775_v1 }
0x1258   : > { %2761 = vmatmul.msk.f32.vlgmr.msrb.gmra.mxu2 %vm382_vm1, %v1773_v11 }
0x1259   : > { %1920 = vmatpush.msra.mxu2 %v2747_v26  ;;  %v2021_v26 = vperm.slane %v3446_v47, 6 }
0x1260   : > { %1876 = vrot.lane.b32.xlu2 %v3450_v52, %s3011_s29 }
0x12bb   : > { %v1860_v13 = vpop.xlane.xlu2 %1859 }
0x12bc   : > { %2920 = vrcp.f32 %v1860_v13  ;;  %v1872_v18 = vand.u32 2147483648, %v1860_v13  ;;  %v1870_v52 = vand.u32 2147483647, %v1860_v13  ;;  %vm1866_vm3 = vweird.f32 %v1860_v13 }
0x12be   : > { %v1873_v21 = vor.u32 1.1754944e-38, %v1872_v18  ;;  %vm1871_vm5 = vcmp.eq.f32.partialorder %v1870_v52, 8.507059e+37  ;;  %v2778_v18 = vld [vmem:[%s3709_s2 + $0x1d8] sm:$0xff]  ;;  %v2776_v52 = vld [vmem:[%s3709_s2 + $0x1c8] sm:$0xff] }
0x12c2   : > { %v2921_v8 = vpop.eup %2920 }
0x12c3   : > { %v1862_v15 = vmul.f32 %v2921_v8, %v1860_v13  ;;  %v1877_v16 = vpop.permute.xlu2 %1876  ;;  %vm1867_vm2 = vweird.f32 %v2921_v8 }
0x12c4   : > { %1897 = vmatpush.msrb.mxu1 %v1877_v16  ;;  %vm1868_vm4 = vmor %vm1866_vm3, %vm1867_vm2 }
0x12c5   : > { %v1863_v17 = vsub.f32 1.0, %v1862_v15 }
0x12c6   : > { %2034 = vmatpush.msra.mxu1 %v2778_v18 }
0x12c7   : > { %v1864_v19 = vmul.f32 %v2921_v8, %v1863_v17 }
0x12c9   : > { %v1865_v20 = vadd.f32 %v2921_v8, %v1864_v19  ;;  %v2777_v19 = vld [vmem:[%s3709_s2 + $0x1d0] sm:$0xff] }
0x12ca   : > { %2035 = vmatpush.msra.mxu1 %v2777_v19 }
0x12cb   : > { %v1869_v22 = vsel %vm1868_vm4, %v2921_v8, %v1865_v20  ;;  %v2775_v20 = vld [vmem:[%s3709_s2 + $0x1c0] sm:$0xff] }
0x12cc   : > { %v1874_v23 = vsel %vm1871_vm5, %v1873_v21, %v1869_v22  ;;  %2036 = vmatpush.msra.mxu1 %v2776_v52 }
0x12cd   : > { %v1875_v24 = vmul.f32 %v2919_v54, %v1874_v23 }
0x12ce   : > { %2037 = vmatpush.msra.mxu1 %v2775_v20 }
0x12cf   : > { %2765 = vmatmul.msk.f32.vlgmr.msrb.gmra.mxu1 %vm382_vm1, %v1875_v24 }
0x12d3   : > { %v1673_v2 = vpop.f32.mrf.mxu2 }
0x12d4   : > { %2757 = vmatmul.msk.f32.vlgmr.msrb.gmra.mxu3 %vm382_vm1, %v1673_v2 }
0x12d7   : > { %2785 = vmatmul.msk.f32.vlgmr.msra.gmra.mxu1 %vm315_vm0, %v2944_v51 }
0x12db   : > { %v1797_v25 = vpop.f32.mrf.mxu2 }
0x12dc   : > { %2762 = vmatmul.msk.f32.vlgmr.msra.gmra.mxu3 %vm382_vm1, %v1797_v25 }
0x134c   : > { %v1899_v27 = vpop.f32.mrf.mxu1 }
0x134d   : > { %2766 = vmatmul.msk.f32.vlgmr.msra.gmra.mxu2 %vm382_vm1, %v1899_v27 }
0x1354   : > { %v2039_v27 = vpop.f32.mrf.mxu1 }
0x1357   : > { %v1696_v28 = vpop.f32.mrf.mxu3 }
0x1358   : > { %v1720_v30 = vadd.f32 %v3478_v34, %v1696_v28  ;;  %v2770_v34 = vld [vmem:[%s3709_s2 + $0x198] sm:$0xff]  ;;  %v3576_v28 = vadd.f32 %v2039_v27, %v2021_v26  ;;  %v2780_v27 = vld [vmem:[%s3709_s2 + $0x1e8] sm:$0xff] }
0x1359   : > { %1991 = vmatpush.msrb.mxu3 %v2770_v34 }
0x135b   : > { %1992 = vmatpush.msrb.mxu3 %v2769_v44 }
0x135d   : > { %1993 = vmatpush.msrb.mxu3 %v2768_v48 }
0x135f   : > { %v1820_v29 = vpop.f32.mrf.mxu3  ;;  %1994 = vmatpush.msrb.mxu3 %v2767_v49 }
0x1360   : > { %v1823_v32 = vadd.f32 %v1820_v29, %v1720_v30  ;;  %v2779_v29 = vld [vmem:[%s3709_s2 + $0x1e0] sm:$0xff] }
0x1361   : > { %2110 = vmatpush.msra.mxu3 %v3576_v28 }
0x13d0   : > { %v1922_v35 = vpop.f32.mrf.mxu2 }
0x13d1   : > { %v1925_v37 = vadd.f32 %v1922_v35, %v1823_v32 }
0x13d3   : > { %v1927_v36 = vadd.f32 %v1926_v33, %v1925_v37 }
0x13d5   : > { %v1928_v38 = vadd.f32 %v1927_v36, %v3435_v46  ;;  %v2774_v46 = vld [vmem:[%s3709_s2 + $0x1b8] sm:$0xff] }
0x13d6   : > { %2013 = vmatpush.msrb.mxu0 %v2774_v46 }
0x13d7   : > { %v1929_v41 = vsel %vm315_vm0, %v1928_v38, 0.0 }
0x13d8   : > { %1930 = vadd.xlane.f32.xlu0 %v1929_v41  ;;  %2014 = vmatpush.msrb.mxu0 %v2773_v45 }
0x13da   : > { %2015 = vmatpush.msrb.mxu0 %v2772_v31 }
0x13dc   : > { %2016 = vmatpush.msrb.mxu0 %v2771_v50 }
0x13dd   : > { %2784 = vmatmul.msk.f32.vlgmr.msrb.gmra.mxu0 %vm315_vm0, %v2944_v51 }
0x144b   : > { %v1931_v42 = vpop.xlane.xlu0 %1930 }
0x144c   : > { %v1932_v43 = vmul.f32 %v1931_v42, %v3224_v10 }
0x144e   : > { %v1933_v9 = vsub.f32 %v1928_v38, %v1932_v43 }
0x1450   : > { %v1934_v39 = vmul.f32 %v1933_v9, %v1933_v9 }
0x1452   : > { %v1935_v40 = vsel %vm315_vm0, %v1934_v39, 0.0 }
0x1453   : > { %1936 = vadd.xlane.f32.xlu1 %v1935_v40 }
0x145a   : > { %v2018_v1 = vpop.f32.mrf.mxu0 }
0x145b   : > { %v2019_v11 = vadd.f32 %v2018_v1, %v2000_v7 }
0x145d   : > { %2786 = vmatpush.xpose.msk.msrb.mxu2 %vm382_vm1, %v2019_v11 }
0x1461   : > { %2212 = vmatpush.msra.mxu2 %v2780_v27 }
0x146c   : > { %2117 = vrot.lane.b32.xlu1 %v2019_v11, %s3010_s23 }
0x14c6   : > { %v1937_v53 = vpop.xlane.xlu1 %1936 }
0x14c7   : > { %v1938_v54 = vmul.f32 %v1937_v53, %v3224_v10 }
0x14c9   : > { %v1939_v55 = vadd.f32 1e-05, %v1938_v54 }
0x14cb   : > { %2922 = vrsqrt.f32 %v1939_v55  ;;  %vm1946_vm7 = vweird.f32 %v1939_v55 }
0x14d1   : > { %v2923_v56 = vpop.eup %2922 }
0x14d2   : > { %v1941_v57 = vmul.f32 %v2923_v56, %v1939_v55  ;;  %vm1947_vm6 = vweird.f32 %v2923_v56 }
0x14d3   : > { %vm1948_vm8 = vmor %vm1946_vm7, %vm1947_vm6 }
0x14d4   : > { %v1942_v58 = vmul.f32 %v2923_v56, %v1941_v57 }
0x14d6   : > { %v1943_v59 = vmul.f32 0.5, %v1942_v58 }
0x14d8   : > { %v1944_v61 = vsub.f32 1.5, %v1943_v59 }
0x14da   : > { %v1945_v62 = vmul.f32 %v2923_v56, %v1944_v61 }
0x14dc   : > { %v1949_v0 = vsel %vm1948_vm8, %v2923_v56, %v1945_v62 }
0x14dd   : > { %v1950_v3 = vmul.f32 %v1949_v0, %v1933_v9 }
0x14de   : > { %v2118_v15 = vpop.permute.xlu1 %2117 }
0x14df   : > { %v1952_v5 = vmul.f32 %v1951_v63, %v1950_v3  ;;  %2789 = vmatpush.xpose.msk.msra.mxu0 %vm382_vm1, %v2118_v15 }
0x14e1   : > { %v3544_v6 = vadd.f32 %v1953_v4, %v1952_v5 }
0x14e3   : > { %2783 = vmatmul.msk.f32.vlgmr.msrb.gmra.mxu3 %vm315_vm0, %v3544_v6 }
0x14e4   : > { %2235 = vmatpush.msrb.mxu3 %v2779_v29 }
0x1566   : > { %v1996_v13 = vpop.f32.mrf.mxu3 }
0x1567   : > { %v1997_v14 = vadd.f32 %v1996_v13, %v1975_v12 }
0x1569   : > { %v1999_v8 = vmul.f32 0.35355338, %v1997_v14 }
0x156b   : > { %2240 = vrot.lane.b32.xlu1 %v1999_v8, %s3719_s20  ;;  %2787 = vmatmul.msk.f32.vlgmr.msrb.gmra.mxu2 %vm382_vm1, %v1999_v8 }
0x15dd   : > { %v2241_v34 = vpop.permute.xlu1 %2240 }
0x15ee   : > { %v2065_v16 = vpop.f32.mrf.mxu2 }
0x15ef   : > { %v2068_v17 = vsel %vm382_vm1, %v2065_v16, -inf }
0x15f0   : > { %2069 = vmax.xlane.f32.xlu2 %v2068_v17 }
0x1608   : > { %2242 = vrot.lane.b32.xlu2 %v2019_v11, %s3719_s20 }
0x1610   : > { %2342 = vrot.lane.b32.xlu2 %v1999_v8, %s3011_s29 }
0x1663   : > { %v2070_v21 = vpop.xlane.xlu2 %2069 }
0x1664   : > { %v2071_v22 = vsub.f32 %v2065_v16, %v2070_v21 }
0x1666   : > { %v2072_v23 = vmul.f32 1.442695, %v2071_v22 }
0x1668   : > { %2924 = vpow2.f32 %v2072_v23 }
0x166b   : > { %v2243_v24 = vpop.permute.xlu2 %2242 }
0x166c   : > { %2794 = vmatpush.xpose.msk.msrb.mxu0 %vm382_vm1, %v2243_v24 }
0x166e   : > { %v2925_v2 = vpop.eup %2924 }
0x166f   : > { %v2074_v25 = vsel %vm382_vm1, %v2925_v2, 0.0 }
0x1670   : > { %2075 = vadd.xlane.f32.xlu0 %v2074_v25 }
0x1673   : > { %v2343_v50 = vpop.permute.xlu2 %2342 }
0x1684   : > { %2115 = vrot.lane.b32.xlu0 %v1999_v8, %s3010_s23 }
0x168c   : > { %2344 = vrot.lane.b32.xlu0 %v2019_v11, %s3011_s29 }
0x16e3   : > { %v2076_v30 = vpop.xlane.xlu0 %2075 }
0x16e4   : > { %2926 = vrcp.f32 %v2076_v30  ;;  %v2088_v37 = vand.u32 2147483648, %v2076_v30  ;;  %v2086_v38 = vand.u32 2147483647, %v2076_v30  ;;  %vm2082_vm10 = vweird.f32 %v2076_v30 }
0x16e6   : > { %v2089_v42 = vor.u32 1.1754944e-38, %v2088_v37  ;;  %vm2087_vm12 = vcmp.eq.f32.partialorder %v2086_v38, 8.507059e+37 }
0x16ea   : > { %v2927_v32 = vpop.eup %2926 }
0x16eb   : > { %v2078_v33 = vmul.f32 %v2927_v32, %v2076_v30  ;;  %vm2083_vm9 = vweird.f32 %v2927_v32 }
0x16ec   : > { %vm2084_vm11 = vmor %vm2082_vm10, %vm2083_vm9 }
0x16ed   : > { %v2079_v35 = vsub.f32 1.0, %v2078_v33 }
0x16ef   : > { %v2080_v36 = vmul.f32 %v2927_v32, %v2079_v35 }
0x16f1   : > { %v2081_v41 = vadd.f32 %v2927_v32, %v2080_v36 }
0x16f3   : > { %v2085_v43 = vsel %vm2084_vm11, %v2927_v32, %v2081_v41  ;;  %v2781_v41 = vld [vmem:[%s3709_s2 + $0x1f0] sm:$0xff] }
0x16f4   : > { %v2090_v9 = vsel %vm2087_vm12, %v2089_v42, %v2085_v43  ;;  %2336 = vmatpush.msrb.mxu2 %v2781_v41 }
0x16f5   : > { %v2091_v39 = vmul.f32 %v2925_v2, %v2090_v9 }
0x16f6   : > { %v2116_v40 = vpop.permute.xlu0 %2115 }
0x16f7   : > { %2788 = vmatmul.msk.f32.vlgmr.msra.gmra.mxu3 %vm382_vm1, %v2091_v39  ;;  %2790 = vmatmul.msk.f32.vlgmr.msra.gmra.mxu0 %vm382_vm1, %v2116_v40 }
0x16fe   : > { %v2345_v46 = vpop.permute.xlu0 %2344 }
0x16ff   : > { %2795 = vmatmul.msk.f32.vlgmr.msrb.gmra.mxu0 %vm382_vm1, %v2241_v34  ;;  %2798 = vmatpush.xpose.msk.msra.mxu3 %vm382_vm1, %v2345_v46 }
0x1774   : > { %v2140_v44 = vpop.f32.mrf.mxu0 }
0x1775   : > { %v2143_v45 = vsel %vm382_vm1, %v2140_v44, -inf }
0x1776   : > { %2144 = vmax.xlane.f32.xlu0 %v2143_v45 }
0x177a   : > { %v2112_v48 = vpop.f32.mrf.mxu3 }
0x177b   : > { %2793 = vmatmul.msk.f32.vlgmr.msrb.gmra.mxu3 %vm382_vm1, %v2112_v48 }
0x177c   : > { %v2265_v31 = vpop.f32.mrf.mxu0 }
0x177d   : > { %v2268_v49 = vsel %vm382_vm1, %v2265_v31, -inf }
0x177e   : > { %2269 = vmax.xlane.f32.xlu1 %v2268_v49 }
0x1783   : > { %2799 = vmatmul.msk.f32.vlgmr.msra.gmra.mxu3 %vm382_vm1, %v2343_v50 }
0x17e9   : > { %v2145_v51 = vpop.xlane.xlu0 %2144 }
0x17ea   : > { %v2146_v53 = vsub.f32 %v2140_v44, %v2145_v51 }
0x17ec   : > { %v2147_v54 = vmul.f32 1.442695, %v2146_v53  ;;  %v2782_v53 = vld [vmem:[%s3709_s2 + $0x1f8] sm:$0xff] }
0x17ee   : > { %2928 = vpow2.f32 %v2147_v54 }
0x17f1   : > { %v2270_v55 = vpop.xlane.xlu1 %2269 }
0x17f2   : > { %v2271_v56 = vsub.f32 %v2265_v31, %v2270_v55 }
0x17f4   : > { %v2929_v57 = vpop.eup %2928  ;;  %v2272_v58 = vmul.f32 1.442695, %v2271_v56 }
0x17f5   : > { %v2149_v59 = vsel %vm382_vm1, %v2929_v57, 0.0 }
0x17f6   : > { %2930 = vpow2.f32 %v2272_v58  ;;  %2150 = vadd.xlane.f32.xlu0 %v2149_v59  ;;  %v2444_v59 = vperm.slane %v3446_v47, 7  ;;  %v2805_v47 = vld [vmem:[%s3710_s3 + $0x38] sm:$0xff] }
0x17fc   : > { %v2931_v61 = vpop.eup %2930 }
0x17fd   : > { %v2274_v62 = vsel %vm382_vm1, %v2931_v61, 0.0 }
0x17fe   : > { %v3592_v63 = vpop.f32.mrf.mxu3  ;;  %2275 = vadd.xlane.f32.xlu1 %v2274_v62 }
0x1806   : > { %v2367_v0 = vpop.f32.mrf.mxu3 }
0x1807   : > { %v2370_v3 = vsel %vm382_vm1, %v2367_v0, -inf }
0x1808   : > { %2371 = vmax.xlane.f32.xlu2 %v2370_v3 }
0x180a   : > { %2168 = vrot.lane.b32.xlu0 %v3576_v28, %s3010_s23  ;;  %s2961_s23 = scalar_lea.hbm %s2960_s8, 8 }
0x180b   : > { %p2962_p11 = scmp.ne.s32.totalorder %s2960_s8, %s2961_s23  ;;  %p2967_p1 = scmp.lt.s32.totalorder %s2965_s17, %s2961_s23 }
0x180d   : > { %p2963_p12 = pnand %p2962_p11, %p3091_p5  ;;  %p2968_p2 = por %p2967_p1, %p2966_p0 }
0x180f   : > { %p2964_p13 = pneg %p2963_p12 }
0x1811   : > { %p2969_p3 = pnand %p2968_p2, %p2964_p13 }
0x1817   : > { %2292 = vrot.lane.b32.xlu1 %v3576_v28, %s3719_s20 }
0x1869   : > { %v2151_v4 = vpop.xlane.xlu0 %2150 }
0x186a   : > { %2932 = vrcp.f32 %v2151_v4  ;;  %v2163_v12 = vand.u32 2147483648, %v2151_v4  ;;  %v2161_v14 = vand.u32 2147483647, %v2151_v4  ;;  %vm2157_vm15 = vweird.f32 %v2151_v4 }
0x186c   : > { %v2164_v16 = vor.u32 1.1754944e-38, %v2163_v12  ;;  %vm2162_vm3 = vcmp.eq.f32.partialorder %v2161_v14, 8.507059e+37  ;;  %v2815_v14 = vld [vmem:[%s3712_s5 + $0x78] sm:$0xff] }
0x186d   : > { %2528 = vmatpush.msrb.mxu3 %v2815_v14 }
0x1870   : > { %v2933_v5 = vpop.eup %2932 }
0x1871   : > { %v2153_v7 = vmul.f32 %v2933_v5, %v2151_v4  ;;  %v2276_v1 = vpop.xlane.xlu1 %2275  ;;  %vm2158_vm14 = vweird.f32 %v2933_v5 }
0x1872   : > { %2934 = vrcp.f32 %v2276_v1  ;;  %vm2159_vm2 = vmor %vm2157_vm15, %vm2158_vm14  ;;  %v2288_v26 = vand.u32 2147483648, %v2276_v1  ;;  %vm2282_vm5 = vweird.f32 %v2276_v1  ;;  %v2286_v29 = vand.u32 2147483647, %v2276_v1 }
0x1873   : > { %v2154_v11 = vsub.f32 1.0, %v2153_v7 }
0x1874   : > { %v2289_v32 = vor.u32 1.1754944e-38, %v2288_v26  ;;  %vm2287_vm7 = vcmp.eq.f32.partialorder %v2286_v29, 8.507059e+37  ;;  %v2471_v29 = vperm.slane %v3540_v60, 3 }
0x1875   : > { %v2155_v13 = vmul.f32 %v2933_v5, %v2154_v11 }
0x1877   : > { %v2156_v8 = vadd.f32 %v2933_v5, %v2155_v13  ;;  %v2802_v13 = vld [vmem:[%s3710_s3 + $0x20] sm:$0xff] }
0x1878   : > { %v2935_v15 = vpop.eup %2934 }
0x1879   : > { %v2160_v17 = vsel %vm2159_vm2, %v2933_v5, %v2156_v8  ;;  %v2278_v18 = vmul.f32 %v2935_v15, %v2276_v1  ;;  %vm2283_vm4 = vweird.f32 %v2935_v15  ;;  %v2814_v8 = vld [vmem:[%s3712_s5 + $0x70] sm:$0xff] }
0x187a   : > { %v2165_v19 = vsel %vm2162_vm3, %v2164_v16, %v2160_v17  ;;  %vm2284_vm6 = vmor %vm2282_vm5, %vm2283_vm4  ;;  %2529 = vmatpush.msrb.mxu3 %v2814_v8 }
0x187b   : > { %v2279_v52 = vsub.f32 1.0, %v2278_v18  ;;  %v2372_v20 = vpop.xlane.xlu2 %2371  ;;  %v2166_v21 = vmul.f32 %v2929_v57, %v2165_v19  ;;  %v2812_v18 = vld [vmem:[%s3712_s5 + $0x60] sm:$0xff] }
0x187c   : > { %v2373_v22 = vsub.f32 %v2367_v0, %v2372_v20  ;;  %v2169_v23 = vpop.permute.xlu0 %2168 }
0x187d   : > { %v2280_v24 = vmul.f32 %v2935_v15, %v2279_v52  ;;  %2189 = vmatpush.msrb.mxu1 %v2169_v23  ;;  %v2811_v52 = vld [vmem:[%s3712_s5 + $0x58] sm:$0xff] }
0x187e   : > { %v2374_v2 = vmul.f32 1.442695, %v2373_v22  ;;  %2791 = vmatmul.msk.f32.vlgmr.msrb.gmra.mxu1 %vm382_vm1, %v2166_v21 }
0x187f   : > { %v2281_v25 = vadd.f32 %v2935_v15, %v2280_v24 }
0x1880   : > { %2936 = vpow2.f32 %v2374_v2 }
0x1881   : > { %v2285_v30 = vsel %vm2284_vm6, %v2935_v15, %v2281_v25  ;;  %v2813_v15 = vld [vmem:[%s3712_s5 + $0x68] sm:$0xff]  ;;  %v2469_v25 = vperm.slane %v3540_v60, 2 }
0x1882   : > { %v2290_v35 = vsel %vm2287_vm7, %v2289_v32, %v2285_v30  ;;  %2530 = vmatpush.msrb.mxu3 %v2813_v15 }
0x1883   : > { %v2291_v38 = vmul.f32 %v2931_v61, %v2290_v35  ;;  %v2809_v35 = vld [vmem:[%s3712_s5 + $0x48] sm:$0xff] }
0x1884   : > { %2531 = vmatpush.msrb.mxu3 %v2812_v18 }
0x1886   : > { %v2937_v33 = vpop.eup %2936  ;;  %2532 = vmatpush.msrb.mxu3 %v2811_v52 }
0x1887   : > { %v2376_v37 = vsel %vm382_vm1, %v2937_v33, 0.0 }
0x1888   : > { %2377 = vadd.xlane.f32.xlu2 %v2376_v37  ;;  %v2808_v37 = vld [vmem:[%s3712_s5 + $0x40] sm:$0xff] }
0x1889   : > { %v2293_v36 = vpop.permute.xlu1 %2292 }
0x188a   : > { %2313 = vmatpush.msra.mxu1 %v2293_v36  ;;  %v2865_v36 = vld [vmem:[%s3711_s4 + $0x1] ss:$0 sm:$0xff] }
0x188b   : > { %2796 = vmatmul.msk.f32.vlgmr.msra.gmra.mxu1 %vm382_vm1, %v2291_v38 }
0x188c   : > { %2438 = vmatpush.msrb.mxu1 %v2782_v53 }
0x18a0   : > { %2394 = vrot.lane.b32.xlu2 %v3576_v28, %s3011_s29  ;;  %s280_s29 = sand.u32 1, %s2999_s25  }
0x18a1   : > { %s2659_s13 = sshll.u32 %s280_s29, 3  ;;  %s2569_s28 = scalar_lea.sflag [#allocation3], %s280_s29 }
0x18a2   : > { %s282_s19 = scalar_lea.vmem [#allocation2], %s2659_s13 }
0x18a3   : > { %s2581_s21 = sshll.u32 %s282_s19, 4  ;;  %s2582_s21 = int_to_ptr.vmem [resolvable:$true] %s2581_s21 }
0x18fb   : > { %v2378_v42 = vpop.xlane.xlu2 %2377  ;;  %v2191_v43 = vpop.f32.mrf.mxu1 }
0x18fc   : > { %2938 = vrcp.f32 %v2378_v42  ;;  %2792 = vmatmul.msk.f32.vlgmr.msra.gmra.mxu2 %vm382_vm1, %v2191_v43  ;;  %v2390_v46 = vand.u32 2147483648, %v2378_v42  ;;  %v2388_v45 = vand.u32 2147483647, %v2378_v42  ;;  %vm2384_vm9 = vweird.f32 %v2378_v42 }
0x18fd   : > { %2498 = vmatpush.msra.mxu2 %v2805_v47  ;;  %v2516_v43 = vperm.slane %v3540_v60, 6 }
0x18fe   : > { %v2391_v31 = vor.u32 1.1754944e-38, %v2390_v46  ;;  %vm2389_vm11 = vcmp.eq.f32.partialorder %v2388_v45, 8.507059e+37 }
0x1902   : > { %v2939_v9 = vpop.eup %2938 }
0x1903   : > { %v2380_v39 = vmul.f32 %v2939_v9, %v2378_v42  ;;  %v2395_v40 = vpop.permute.xlu2 %2394  ;;  %vm2385_vm8 = vweird.f32 %v2939_v9 }
0x1904   : > { %2415 = vmatpush.msra.mxu0 %v2395_v40  ;;  %vm2386_vm10 = vmor %vm2384_vm9, %vm2385_vm8 }
0x1905   : > { %v2381_v34 = vsub.f32 1.0, %v2380_v39 }
0x1907   : > { %v2382_v44 = vmul.f32 %v2939_v9, %v2381_v34 }
0x1908   : > { %v2315_v28 = vpop.f32.mrf.mxu1 }
0x1909   : > { %v2383_v48 = vadd.f32 %v2939_v9, %v2382_v44  ;;  %2797 = vmatmul.msk.f32.vlgmr.msrb.gmra.mxu2 %vm382_vm1, %v2315_v28 }
0x190b   : > { %v2387_v49 = vsel %vm2386_vm10, %v2939_v9, %v2383_v48 }
0x190c   : > { %v2392_v50 = vsel %vm2389_vm11, %v2391_v31, %v2387_v49 }
0x190d   : > { %v2393_v51 = vmul.f32 %v2937_v33, %v2392_v50  ;;  %v2810_v33 = vld [vmem:[%s3712_s5 + $0x50] sm:$0xff] }
0x190e   : > { %2533 = vmatpush.msrb.mxu3 %v2810_v33 }
0x190f   : > { %2800 = vmatmul.msk.f32.vlgmr.msra.gmra.mxu0 %vm382_vm1, %v2393_v51 }
0x1910   : > { %2534 = vmatpush.msrb.mxu3 %v2809_v35 }
0x1912   : > { %2535 = vmatpush.msrb.mxu3 %v2808_v37 }
0x197f   : > { %v2214_v55 = vpop.f32.mrf.mxu2 }
0x1980   : > { %v2238_v57 = vadd.f32 %v3592_v63, %v2214_v55  ;;  %v2803_v63 = vld [vmem:[%s3710_s3 + $0x28] sm:$0xff] }
0x198c   : > { %v2417_v54 = vpop.f32.mrf.mxu0  ;;  %v2338_v56 = vpop.f32.mrf.mxu2 }
0x198d   : > { %2801 = vmatmul.msk.f32.vlgmr.msrb.gmra.mxu1 %vm382_vm1, %v2417_v54  ;;  %v2341_v58 = vadd.f32 %v2338_v56, %v2238_v57 }
0x1a0a   : > { %v2440_v61 = vpop.f32.mrf.mxu1 }
0x1a0b   : > { %v2443_v62 = vadd.f32 %v2440_v61, %v2341_v58  ;;  %v2563_v58 = vperm.slane %v3540_v60, 4  ;;  %v2565_v61 = vperm.slane %v3540_v60, 5 }
0x1a0d   : > { %v2445_v0 = vadd.f32 %v2444_v59, %v2443_v62 }
0x1a0f   : > { %v2446_v3 = vadd.f32 %v2445_v0, %v3544_v6  ;;  %v2804_v6 = vld [vmem:[%s3710_s3 + $0x30] sm:$0xff] }
0x1a10   : > { %2499 = vmatpush.msra.mxu2 %v2804_v6 }
0x1a11   : > { %v2447_v4 = vsel %vm315_vm0, %v2446_v3, 0.0 }
0x1a12   : > { %2448 = vadd.xlane.f32.xlu0 %v2447_v4  ;;  %2500 = vmatpush.msra.mxu2 %v2803_v63 }
0x1a14   : > { %2501 = vmatpush.msra.mxu2 %v2802_v13 }
0x1a85   : > { %v2449_v5 = vpop.xlane.xlu0 %2448 }
0x1a86   : > { %v2450_v7 = vmul.f32 %v2449_v5, %v3224_v10 }
0x1a88   : > { %v2451_v1 = vsub.f32 %v2446_v3, %v2450_v7 }
0x1a8a   : > { %v2452_v11 = vmul.f32 %v2451_v1, %v2451_v1 }
0x1a8c   : > { %v2453_v12 = vsel %vm315_vm0, %v2452_v11, 0.0 }
0x1a8d   : > { %2454 = vadd.xlane.f32.xlu1 %v2453_v12 }
0x1b00   : > { %v2455_v16 = vpop.xlane.xlu1 %2454 }
0x1b01   : > { %v2456_v17 = vmul.f32 %v2455_v16, %v3224_v10 }
0x1b03   : > { %v2457_v19 = vadd.f32 1e-05, %v2456_v17 }
0x1b05   : > { %2940 = vrsqrt.f32 %v2457_v19  ;;  %vm2464_vm12 = vweird.f32 %v2457_v19 }
0x1b0b   : > { %v2941_v20 = vpop.eup %2940 }
0x1b0c   : > { %v2459_v21 = vmul.f32 %v2941_v20, %v2457_v19  ;;  %vm2465_vm1 = vweird.f32 %v2941_v20 }
0x1b0d   : > { %vm2466_vm14 = vmor %vm2464_vm12, %vm2465_vm1 }
0x1b0e   : > { %v2460_v22 = vmul.f32 %v2941_v20, %v2459_v21 }
0x1b10   : > { %v2461_v23 = vmul.f32 0.5, %v2460_v22 }
0x1b12   : > { %v2462_v24 = vsub.f32 1.5, %v2461_v23 }
0x1b14   : > { %v2463_v2 = vmul.f32 %v2941_v20, %v2462_v24 }
0x1b16   : > { %v2467_v26 = vsel %vm2466_vm14, %v2941_v20, %v2463_v2 }
0x1b17   : > { %v2468_v27 = vmul.f32 %v2467_v26, %v2451_v1 }
0x1b19   : > { %v2470_v30 = vmul.f32 %v2469_v25, %v2468_v27 }
0x1b1b   : > { %v2472_v32 = vadd.f32 %v2471_v29, %v2470_v30 }
0x1b1d   : > { %2807 = vmatmul.msk.f32.vlgmr.msra.gmra.mxu2 %vm315_vm0, %v2472_v32 }
0x1ba0   : > { %v2503_v38 = vpop.f32.mrf.mxu2 }
0x1ba1   : > { %v2504_v41 = vadd.f32 %v2865_v36, %v2503_v38 }
0x1ba3   : > { %v2506_v42 = vmax.f32 %v2504_v41, 0.0 }
0x1ba5   : > { %2816 = vmatmul.msk.f32.vlgmr.msrb.gmra.mxu3 %vm1383_vm13, %v2506_v42 }
0x1c28   : > { %v2537_v9 = vpop.f32.mrf.mxu3 }
0x1c29   : > { %v2538_v39 = vadd.f32 %v2537_v9, %v2516_v43 }
0x1c2b   : > { %v2540_v40 = vadd.f32 %v2538_v39, %v2472_v32 }
0x1c2d   : > { %v2541_v34 = vsel %vm315_vm0, %v2540_v40, 0.0 }
0x1c2e   : > { %2542 = vadd.xlane.f32.xlu2 %v2541_v34 }
0x1ca1   : > { %v2543_v46 = vpop.xlane.xlu2 %2542 }
0x1ca2   : > { %v2544_v44 = vmul.f32 %v2543_v46, %v3224_v10 }
0x1ca4   : > { %v2545_v45 = vsub.f32 %v2540_v40, %v2544_v44 }
0x1ca6   : > { %v2546_v28 = vmul.f32 %v2545_v45, %v2545_v45 }
0x1ca8   : > { %v2547_v48 = vsel %vm315_vm0, %v2546_v28, 0.0 }
0x1ca9   : > { %2548 = vadd.xlane.f32.xlu0 %v2547_v48 }
0x1d1c   : > { %v2549_v31 = vpop.xlane.xlu0 %2548 }
0x1d1d   : > { %v2550_v49 = vmul.f32 %v2549_v31, %v3224_v10 }
0x1d1f   : > { %v2551_v50 = vadd.f32 1e-05, %v2550_v49 }
0x1d21   : > { %2942 = vrsqrt.f32 %v2551_v50  ;;  %vm2558_vm15 = vweird.f32 %v2551_v50 }
0x1d27   : > { %v2943_v51 = vpop.eup %2942 }
0x1d28   : > { %v2553_v53 = vmul.f32 %v2943_v51, %v2551_v50  ;;  %vm2559_vm13 = vweird.f32 %v2943_v51 }
0x1d29   : > { %vm2560_vm2 = vmor %vm2558_vm15, %vm2559_vm13 }
0x1d2a   : > { %v2554_v54 = vmul.f32 %v2943_v51, %v2553_v53 }
0x1d2c   : > { %v2555_v55 = vmul.f32 0.5, %v2554_v54 }
0x1d2e   : > { %v2556_v56 = vsub.f32 1.5, %v2555_v55 }
0x1d30   : > { %v2557_v57 = vmul.f32 %v2943_v51, %v2556_v56 }
0x1d32   : > { %v2561_v10 = vsel %vm2560_vm2, %v2943_v51, %v2557_v57 }
0x1d33   : > { %v2562_v59 = vmul.f32 %v2561_v10, %v2545_v45 }
0x1d35   : > { %v2564_v62 = vmul.f32 %v2563_v58, %v2562_v59 }
0x1d37   : > { %v2566_v0 = vadd.f32 %v2565_v61, %v2564_v62 }
0x1d39   : > { %2567 = vst.msk [vmem:[%s282_s19] sm:$0xff] %vm315_vm0, %v2566_v0 }
0x1d3a   : > { %2972 = shalt.err (!%p2969_p3)
}
0x1d3b   : > { %2821 = dma.vmem_to_hbm [thread:$0]  (%p3091_p5), %s2582_s21, 128, %s2584_s9, %s2569_s28  }
0x1d3c PF: > { %p2827_p4 = scmp.ge.s32.totalorder %s3007_s27, 2  ;;  %s2595_s29 = sand.u32 1, %s2995_s24  }
0x1d3d   : > { %s2596_s15 = scalar_lea.sflag [#allocation3], %s2595_s29 }
0x1d3e   : > { %p2824_p7 = pnand %p2827_p4, %p3095_p6 }
0x1d40   : > { %p2825_p8 = pneg %p2824_p7 }
0x1d42   : > { %2990 = dma.done.wait (%p2825_p8), %s2596_s15, 128  }
0x1d43   : > { %2992 = vsyncadd (%p2825_p8), %s2596_s15, 4294967168  ;;  %p17_p9 = scmp.ge.s32.totalorder %s3078_s30, 4   ;;  %s3720_s24 = smov %s2999_s25 }
0x1d44   : > { %s3721_s25 = smov %s3003_s26  ;;  %s3722_s26 = smov %s3089_s10 }
0x1d45   : > { %s3723_s27 = smov %s3078_s30  ;;  %19 = sbr.rel (!%p17_p9) target bundleno = 3 (0x3), region = 105 }
0x1d4a   :  { %2602 = vsyncpa [#allocation3], 1 }
0x1d4b   :  { %2604 = vsyncpa [#allocation3 + $0x1], 1 }

</bundles_post_ra>
